<compile_context>
chip_gen: v7x
topology: tpu7x:2x2x1
jax: 0.10.0
libtpu: 0.0.40
codegen_flags: <defaults>
</compile_context>

<pallas_src>
import math

import jax
import jax.numpy as jnp
from jax.experimental import pallas as pl
from jax.experimental.pallas import tpu as pltpu

D_MODEL = 32
N_HEAD = 4
D_HEAD = D_MODEL // N_HEAD
D_FF = 64
LN_EPS = 1e-5

# ---- original (unfused) parameter naming, used by init + the reference -----
_ATTN_W_NAMES = ["sa_wq", "sa_wk", "sa_wv", "sa_wo",
                 "ca_wq", "ca_wk", "ca_wv", "ca_wo"]
_VEC_NAMES = ["sa_bq", "sa_bk", "sa_bv", "sa_bo",
              "ca_bq", "ca_bk", "ca_bv", "ca_bo",
              "n1_g", "n1_b", "n2_g", "n2_b", "n3_g", "n3_b",
              "ff_b2"]
PARAM_NAMES = _ATTN_W_NAMES + _VEC_NAMES + ["ff_w1", "ff_b1", "ff_w2"]
PARAM_SHAPES = {
    **{n: (D_MODEL, D_MODEL) for n in _ATTN_W_NAMES},
    **{n: (1, D_MODEL) for n in _VEC_NAMES},
    "ff_w1": (D_MODEL, D_FF),
    "ff_b1": (1, D_FF),
    "ff_w2": (D_FF, D_MODEL),
}

# ---- packed-slab layouts (host-side packing, done once at load time) -------
# fused "wide" matrices slab: (L, 3, D, 2D)
MAT_SA_QK = 0      # [Wq | Wk] of self-attn, applied to x + query_pos
MAT_CA_KV = 1      # [Wk | Wv] of cross-attn, applied to memory
MAT_FF_W1 = 2      # FFN first weight (D_FF == 2*D)
# square matrices slab: (L, 4, D, D)
MAT_SA_WV, MAT_SA_WO, MAT_CA_WQ, MAT_CA_WO = 0, 1, 2, 3
# wide bias rows slab: (L, 8, 2D)
ROW_SA_BQK, ROW_CA_BKV, ROW_FF_B1 = 0, 1, 2
# narrow bias / LN rows slab: (L, 16, D)
_BV_ROWS = ["sa_bv", "sa_bo", "ca_bq", "ca_bo", "ff_b2",
            "n1_g", "n1_b", "n2_g", "n2_b", "n3_g", "n3_b"]
(ROW_SA_BV, ROW_SA_BO, ROW_CA_BQ, ROW_CA_BO, ROW_FF_B2,
 ROW_N1_G, ROW_N1_B, ROW_N2_G, ROW_N2_B, ROW_N3_G, ROW_N3_B) = range(11)


# -----------------------------------------------------------------------------
# Host-side weight packing (would be done once at load time in production).
# -----------------------------------------------------------------------------
def _pack_params(layer_params):
    wf, wsq, wff2, bw, bv = [], [], [], [], []
    for p in layer_params:
        wf.append(jnp.stack([
            jnp.concatenate([p["sa_wq"], p["sa_wk"]], axis=1),   # (D, 2D)
            jnp.concatenate([p["ca_wk"], p["ca_wv"]], axis=1),   # (D, 2D)
            p["ff_w1"],                                          # (D, D_FF)
        ]))
        wsq.append(jnp.stack([p["sa_wv"], p["sa_wo"], p["ca_wq"], p["ca_wo"]]))
        wff2.append(p["ff_w2"])
        bw.append(jnp.concatenate([
            jnp.concatenate([p["sa_bq"], p["sa_bk"]], axis=1),
            jnp.concatenate([p["ca_bk"], p["ca_bv"]], axis=1),
            p["ff_b1"],
            jnp.zeros((5, 2 * D_MODEL), jnp.float32),            # pad to 8 rows
        ], axis=0))
        bv.append(jnp.concatenate(
            [p[n] for n in _BV_ROWS]
            + [jnp.zeros((16 - len(_BV_ROWS), D_MODEL), jnp.float32)], axis=0))
    return (jnp.stack(wf), jnp.stack(wsq), jnp.stack(wff2),
            jnp.stack(bw), jnp.stack(bv))


# -----------------------------------------------------------------------------
# NewDecoder.forward equivalent: ONE fused pallas_call, all layers unrolled,
# all weights VMEM-resident.
# -----------------------------------------------------------------------------
def new_decoder_forward(tgt, qpos, mem, layer_params):
    B, S, D = tgt.shape
    assert D == D_MODEL
    M = mem.shape[1]
    L = len(layer_params)
    wf_w, wsq_w, wff2_w, bw_w, bv_w = _pack_params(layer_params)

    # Flatten host-side so the kernel never reshapes the sublane axis.
    tgt2 = tgt.reshape(B * S, D)
    qpos2 = qpos.reshape(B * S, D)
    mem2 = mem.reshape(B * M, D)

    scale = 1.0 / math.sqrt(D_HEAD)

    # TODO(synk): the reference toggles `layer.inferencing = False` on the last
    # layer and collects per-layer `roi_feat`; decode_layer is undefined in the
    # source and the second return is None, so neither affects the output.
    # TODO(synk): for large B on v7x, add a leading "parallel" batch grid axis
    # (per-batch blocks) to use the second TensorCore; at B=2 it is overhead.
    def kernel(tgt_ref, qpos_ref, mem_ref, wf_ref, wsq_ref, wff2_ref,
               bw_ref, bv_ref, out_ref):
        x = tgt_ref[...]                    # (B*S, D) running activation
        qpos_v = qpos_ref[...]              # (B*S, D)
        mem_v = mem_ref[...]                # (B*M, D)

        def layernorm(z, g, b):
            mu = jnp.mean(z, axis=-1, keepdims=True)
            var = jnp.mean((z - mu) ** 2, axis=-1, keepdims=True)
            return (z - mu) * jax.lax.rsqrt(var + LN_EPS) * g + b

        def row(t, i):                      # (1, width) bias / LN row
            return t[i:i + 1, :]

        def attend(q, k, v, n_q, n_kv, wo, bo):
            # Per-head static loop: batched (B*H) einsums would unroll to the
            # same number of MXU pushes and need lane->sublane relayouts.
            acc = bo                        # broadcasts to (B*n_q, D)
            q = q * scale                   # fold 1/sqrt(d) once, not per head
            for h in range(N_HEAD):
                sl = slice(h * D_HEAD, (h + 1) * D_HEAD)
                qh = q[:, sl].reshape(B, n_q, D_HEAD)
                kh = k[:, sl].reshape(B, n_kv, D_HEAD)
                vh = v[:, sl].reshape(B, n_kv, D_HEAD)
                s = jnp.einsum("bqd,bkd->bqk", qh, kh,
                               preferred_element_type=jnp.float32)
                s = s - jnp.max(s, axis=-1, keepdims=True)
                p = jnp.exp(s)
                p = p * pl.reciprocal(jnp.sum(p, axis=-1, keepdims=True),
                                      approx=True)      # EUP, no Newton step
                oh = jnp.einsum("bqk,bkd->bqd", p, vh,
                                preferred_element_type=jnp.float32)
                # accumulate through W_o row-slice instead of a lane concat
                acc = acc + jnp.dot(oh.reshape(B * n_q, D_HEAD), wo[sl, :],
                                    preferred_element_type=jnp.float32)
            return acc

        # Static unroll over layers: weights are resident, activation carried
        # as a value, each layer stores into its slice of the stacked output.
        # (Switch to lax.fori_loop + dynamic first-axis ref indexing for very
        # deep decoders.)
        for l in range(L):
            bwl = bw_ref[l]                 # (8, 2D)  wide biases
            bvl = bv_ref[l]                 # (16, D)  biases + LN params

            # ---- self attention: q = k = x + qpos, v = x -------------------
            qk = jnp.dot(x + qpos_v, wf_ref[l, MAT_SA_QK],
                         preferred_element_type=jnp.float32) \
                + row(bwl, ROW_SA_BQK)                       # (B*S, 2D)
            v_sa = jnp.dot(x, wsq_ref[l, MAT_SA_WV],
                           preferred_element_type=jnp.float32) \
                + row(bvl, ROW_SA_BV)
            sa = attend(qk[:, :D_MODEL], qk[:, D_MODEL:], v_sa, S, S,
                        wsq_ref[l, MAT_SA_WO], row(bvl, ROW_SA_BO))
            x1 = layernorm(x + sa, row(bvl, ROW_N1_G), row(bvl, ROW_N1_B))

            # ---- cross attention: q = x1 + qpos, k = v = memory ------------
            q_ca = jnp.dot(x1 + qpos_v, wsq_ref[l, MAT_CA_WQ],
                           preferred_element_type=jnp.float32) \
                + row(bvl, ROW_CA_BQ)
            kv = jnp.dot(mem_v, wf_ref[l, MAT_CA_KV],
                         preferred_element_type=jnp.float32) \
                + row(bwl, ROW_CA_BKV)                       # (B*M, 2D)
            ca = attend(q_ca, kv[:, :D_MODEL], kv[:, D_MODEL:], S, M,
                        wsq_ref[l, MAT_CA_WO], row(bvl, ROW_CA_BO))
            x2 = layernorm(x1 + ca, row(bvl, ROW_N2_G), row(bvl, ROW_N2_B))

            # ---- feed forward ----------------------------------------------
            hid = jnp.maximum(
                jnp.dot(x2, wf_ref[l, MAT_FF_W1],
                        preferred_element_type=jnp.float32)
                + row(bwl, ROW_FF_B1), 0.0)
            ff = jnp.dot(hid, wff2_ref[l],
                         preferred_element_type=jnp.float32) \
                + row(bvl, ROW_FF_B2)
            x3 = layernorm(x2 + ff, row(bvl, ROW_N3_G), row(bvl, ROW_N3_B))

            out_ref[l] = x3                 # this layer's stacked-output slice
            x = x3                          # carry to next layer

    out = pl.pallas_call(
        kernel,
        out_shape=jax.ShapeDtypeStruct((L, B * S, D), jnp.float32),
        grid_spec=pltpu.PrefetchScalarGridSpec(
            num_scalar_prefetch=0,
            grid=(1,),                                        # single step
            in_specs=[
                pl.BlockSpec((B * S, D), lambda i: (0, 0)),          # tgt
                pl.BlockSpec((B * S, D), lambda i: (0, 0)),          # query_pos
                pl.BlockSpec((B * M, D), lambda i: (0, 0)),          # memory
                pl.BlockSpec((L, 3, D, 2 * D), lambda i: (0, 0, 0, 0)),  # wide mats
                pl.BlockSpec((L, 4, D, D), lambda i: (0, 0, 0, 0)),      # sq mats
                pl.BlockSpec((L, D_FF, D), lambda i: (0, 0, 0)),         # ff_w2
                pl.BlockSpec((L, 8, 2 * D), lambda i: (0, 0, 0)),        # wide biases
                pl.BlockSpec((L, 16, D), lambda i: (0, 0, 0)),           # biases/LN
            ],
            out_specs=pl.BlockSpec((L, B * S, D), lambda i: (0, 0, 0)),
        ),
        compiler_params=pltpu.CompilerParams(
            dimension_semantics=("arbitrary",)),
    )(tgt2, qpos2, mem2, wf_w, wsq_w, wff2_w, bw_w, bv_w)
    return out.reshape(L, B, S, D), None


# -----------------------------------------------------------------------------
# Deterministic parameter init (synthetic, no checkpoint).
# -----------------------------------------------------------------------------
def init_layer_params(key):
    params = {}
    keys = jax.random.split(key, len(PARAM_NAMES))
    for name, k in zip(PARAM_NAMES, keys):
        shape = PARAM_SHAPES[name]
        if name.endswith("_g"):                        # layernorm gamma
            params[name] = jnp.ones(shape, jnp.float32)
        elif "_b" in name:                             # biases / layernorm beta
            params[name] = jnp.zeros(shape, jnp.float32)
        else:                                          # projection weights
            params[name] = 0.02 * jax.random.normal(k, shape, jnp.float32)
    return params


# -----------------------------------------------------------------------------
# Pure-JAX reference (per batch element, per layer, unfused params).
# -----------------------------------------------------------------------------
def _layer_ref(tgt, qpos, mem, p):
    hp = jax.lax.Precision.HIGHEST

    def mha(q_in, k_in, v_in, wq, wk, wv, wo, bq, bk, bv, bo):
        q = jnp.dot(q_in, wq, precision=hp) + bq
        k = jnp.dot(k_in, wk, precision=hp) + bk
        v = jnp.dot(v_in, wv, precision=hp) + bv
        outs = []
        for h in range(N_HEAD):
            sl = slice(h * D_HEAD, (h + 1) * D_HEAD)
            s = jnp.dot(q[:, sl], k[:, sl].T, precision=hp) / math.sqrt(D_HEAD)
            a = jax.nn.softmax(s, axis=-1)
            outs.append(jnp.dot(a, v[:, sl], precision=hp))
        return jnp.dot(jnp.concatenate(outs, -1), wo, precision=hp) + bo

    def ln(z, g, b):
        mu = jnp.mean(z, -1, keepdims=True)
        var = jnp.mean((z - mu) ** 2, -1, keepdims=True)
        return (z - mu) * jax.lax.rsqrt(var + LN_EPS) * g + b

    qk = tgt + qpos
    sa = mha(qk, qk, tgt, p["sa_wq"], p["sa_wk"], p["sa_wv"], p["sa_wo"],
             p["sa_bq"], p["sa_bk"], p["sa_bv"], p["sa_bo"])
    x = ln(tgt + sa, p["n1_g"], p["n1_b"])
    ca = mha(x + qpos, mem, mem, p["ca_wq"], p["ca_wk"], p["ca_wv"], p["ca_wo"],
             p["ca_bq"], p["ca_bk"], p["ca_bv"], p["ca_bo"])
    x = ln(x + ca, p["n2_g"], p["n2_b"])
    hid = jnp.maximum(jnp.dot(x, p["ff_w1"], precision=hp) + p["ff_b1"], 0.0)
    ff = jnp.dot(hid, p["ff_w2"], precision=hp) + p["ff_b2"]
    return ln(x + ff, p["n3_g"], p["n3_b"])


if __name__ == "__main__":
    B, S, M_LEN = 2, 8, 16
    NUM_LAYERS = 2

    key = jax.random.PRNGKey(0)
    k_tgt, k_pos, k_mem, k_par = jax.random.split(key, 4)
    tgt = jax.random.normal(k_tgt, (B, S, D_MODEL), jnp.float32)
    qpos = jax.random.normal(k_pos, (B, S, D_MODEL), jnp.float32)
    mem = jax.random.normal(k_mem, (B, M_LEN, D_MODEL), jnp.float32)

    layer_params = [init_layer_params(k)
                    for k in jax.random.split(k_par, NUM_LAYERS)]

    out, roi = new_decoder_forward(tgt, qpos, mem, layer_params)
    out = jax.block_until_ready(out)
    assert out.shape == (NUM_LAYERS, B, S, D_MODEL)
    assert roi is None

    # pure-JAX reference check
    ref_inter = []
    x = tgt
    for p in layer_params:
        x = jax.vmap(lambda t, q, m: _layer_ref(t, q, m, p))(x, qpos, mem)
        ref_inter.append(x)
    ref_out = jnp.stack(ref_inter)
    max_err = float(jnp.max(jnp.abs(out - ref_out)))
    assert jnp.allclose(out, ref_out, atol=1e-3, rtol=1e-3), max_err

    print("KERNEL_OK")
</pallas_src>

<mosaic_0001>
module attributes {stable_mosaic.version = 11 : i64} {
  func.func @kernel(%arg0: i32, %arg1: memref<16x32xf32, #tpu.memory_space<vmem>>, %arg2: memref<16x32xf32, #tpu.memory_space<vmem>>, %arg3: memref<32x32xf32, #tpu.memory_space<vmem>>, %arg4: memref<2x3x32x64xf32, #tpu.memory_space<vmem>>, %arg5: memref<2x4x32x32xf32, #tpu.memory_space<vmem>>, %arg6: memref<2x64x32xf32, #tpu.memory_space<vmem>>, %arg7: memref<2x8x64xf32, #tpu.memory_space<vmem>>, %arg8: memref<2x16x32xf32, #tpu.memory_space<vmem>>, %arg9: memref<2x16x32xf32, #tpu.memory_space<vmem>>) attributes {dimension_semantics = [#tpu.dimension_semantics<arbitrary>], iteration_bounds = array<i64: 1>, scalar_prefetch = 0 : i64, scratch_operands = 0 : i64, tpu.core_type = #tpu.core_type<tc>, window_params = [{pipeline_mode = #tpu.pipeline_mode<synchronous>, transform_indices = @transform_0, window_bounds = array<i64: 16, 32>}, {pipeline_mode = #tpu.pipeline_mode<synchronous>, transform_indices = @transform_1, window_bounds = array<i64: 16, 32>}, {pipeline_mode = #tpu.pipeline_mode<synchronous>, transform_indices = @transform_2, window_bounds = array<i64: 32, 32>}, {pipeline_mode = #tpu.pipeline_mode<synchronous>, transform_indices = @transform_3, window_bounds = array<i64: 2, 3, 32, 64>}, {pipeline_mode = #tpu.pipeline_mode<synchronous>, transform_indices = @transform_4, window_bounds = array<i64: 2, 4, 32, 32>}, {pipeline_mode = #tpu.pipeline_mode<synchronous>, transform_indices = @transform_5, window_bounds = array<i64: 2, 64, 32>}, {pipeline_mode = #tpu.pipeline_mode<synchronous>, transform_indices = @transform_6, window_bounds = array<i64: 2, 8, 64>}, {pipeline_mode = #tpu.pipeline_mode<synchronous>, transform_indices = @transform_7, window_bounds = array<i64: 2, 16, 32>}, {pipeline_mode = #tpu.pipeline_mode<synchronous>, transform_indices = @transform_8, window_bounds = array<i64: 2, 16, 32>}]} {
    %c0 = arith.constant 0 : index
    %c0_0 = arith.constant 0 : index
    %0 = vector.load %arg1[%c0, %c0_0] : memref<16x32xf32, #tpu.memory_space<vmem>>, vector<16x32xf32>
    %c0_1 = arith.constant 0 : index
    %c0_2 = arith.constant 0 : index
    %1 = vector.load %arg2[%c0_1, %c0_2] : memref<16x32xf32, #tpu.memory_space<vmem>>, vector<16x32xf32>
    %c0_3 = arith.constant 0 : index
    %c0_4 = arith.constant 0 : index
    %2 = vector.load %arg3[%c0_3, %c0_4] : memref<32x32xf32, #tpu.memory_space<vmem>>, vector<32x32xf32>
    %c0_5 = arith.constant 0 : index
    %c0_6 = arith.constant 0 : index
    %c0_7 = arith.constant 0 : index
    %3 = vector.load %arg7[%c0_5, %c0_6, %c0_7] : memref<2x8x64xf32, #tpu.memory_space<vmem>>, vector<1x8x64xf32>
    %4 = vector.shape_cast %3 : vector<1x8x64xf32> to vector<8x64xf32>
    %c0_8 = arith.constant 0 : index
    %c0_9 = arith.constant 0 : index
    %c0_10 = arith.constant 0 : index
    %5 = vector.load %arg8[%c0_8, %c0_9, %c0_10] : memref<2x16x32xf32, #tpu.memory_space<vmem>>, vector<1x16x32xf32>
    %6 = vector.shape_cast %5 : vector<1x16x32xf32> to vector<16x32xf32>
    %7 = arith.addf %0, %1 : vector<16x32xf32>
    %c0_11 = arith.constant 0 : index
    %c0_12 = arith.constant 0 : index
    %c0_13 = arith.constant 0 : index
    %c0_14 = arith.constant 0 : index
    %8 = vector.load %arg4[%c0_11, %c0_12, %c0_13, %c0_14] : memref<2x3x32x64xf32, #tpu.memory_space<vmem>>, vector<1x1x32x64xf32>
    %9 = vector.shape_cast %8 : vector<1x1x32x64xf32> to vector<32x64xf32>
    %cst = arith.constant dense<0.000000e+00> : vector<16x64xf32>
    %10 = tpu.matmul %7, %9, %cst {dimension_numbers = #tpu.dot_dimension_numbers<[1], [0], [0], [1], [0, 0, 1, 1], [], []>} : vector<16x32xf32>, vector<32x64xf32>, vector<16x64xf32> -> vector<16x64xf32>
    %11 = vector.extract_strided_slice %4 {offsets = [0, 0], sizes = [1, 64], strides = [1, 1]} : vector<8x64xf32> to vector<1x64xf32>
    %12 = vector.broadcast %11 : vector<1x64xf32> to vector<16x64xf32>
    %13 = arith.addf %10, %12 : vector<16x64xf32>
    %c0_15 = arith.constant 0 : index
    %c0_16 = arith.constant 0 : index
    %c0_17 = arith.constant 0 : index
    %c0_18 = arith.constant 0 : index
    %14 = vector.load %arg5[%c0_15, %c0_16, %c0_17, %c0_18] : memref<2x4x32x32xf32, #tpu.memory_space<vmem>>, vector<1x1x32x32xf32>
    %15 = vector.shape_cast %14 : vector<1x1x32x32xf32> to vector<32x32xf32>
    %cst_19 = arith.constant dense<0.000000e+00> : vector<16x32xf32>
    %16 = tpu.matmul %0, %15, %cst_19 {dimension_numbers = #tpu.dot_dimension_numbers<[1], [0], [0], [1], [0, 0, 1, 1], [], []>} : vector<16x32xf32>, vector<32x32xf32>, vector<16x32xf32> -> vector<16x32xf32>
    %17 = vector.extract_strided_slice %6 {offsets = [0, 0], sizes = [1, 32], strides = [1, 1]} : vector<16x32xf32> to vector<1x32xf32>
    %18 = vector.broadcast %17 : vector<1x32xf32> to vector<16x32xf32>
    %19 = arith.addf %16, %18 : vector<16x32xf32>
    %20 = vector.extract_strided_slice %13 {offsets = [0, 0], sizes = [16, 32], strides = [1, 1]} : vector<16x64xf32> to vector<16x32xf32>
    %21 = vector.extract_strided_slice %13 {offsets = [0, 32], sizes = [16, 32], strides = [1, 1]} : vector<16x64xf32> to vector<16x32xf32>
    %c0_20 = arith.constant 0 : index
    %c1 = arith.constant 1 : index
    %c0_21 = arith.constant 0 : index
    %c0_22 = arith.constant 0 : index
    %22 = vector.load %arg5[%c0_20, %c1, %c0_21, %c0_22] : memref<2x4x32x32xf32, #tpu.memory_space<vmem>>, vector<1x1x32x32xf32>
    %23 = vector.shape_cast %22 : vector<1x1x32x32xf32> to vector<32x32xf32>
    %24 = vector.extract_strided_slice %6 {offsets = [1, 0], sizes = [1, 32], strides = [1, 1]} : vector<16x32xf32> to vector<1x32xf32>
    %cst_23 = arith.constant 0.353553385 : f32
    %25 = vector.broadcast %cst_23 : f32 to vector<16x32xf32>
    %26 = arith.mulf %20, %25 : vector<16x32xf32>
    %27 = vector.extract_strided_slice %26 {offsets = [0, 0], sizes = [16, 8], strides = [1, 1]} : vector<16x32xf32> to vector<16x8xf32>
    %28 = vector.shape_cast %27 : vector<16x8xf32> to vector<2x8x8xf32>
    %29 = vector.extract_strided_slice %21 {offsets = [0, 0], sizes = [16, 8], strides = [1, 1]} : vector<16x32xf32> to vector<16x8xf32>
    %30 = vector.shape_cast %29 : vector<16x8xf32> to vector<2x8x8xf32>
    %31 = vector.extract_strided_slice %19 {offsets = [0, 0], sizes = [16, 8], strides = [1, 1]} : vector<16x32xf32> to vector<16x8xf32>
    %32 = vector.shape_cast %31 : vector<16x8xf32> to vector<2x8x8xf32>
    "tpu.trace_start"() <{level = 10 : i32, message = "bqd,bkd->bqk"}> : () -> ()
    %cst_24 = arith.constant dense<0.000000e+00> : vector<2x8x8xf32>
    %33 = tpu.matmul %28, %30, %cst_24 {dimension_numbers = #tpu.dot_dimension_numbers<[2], [2], [1], [1], [0, 0, 0, 1, 1, 1], [0], [0]>} : vector<2x8x8xf32>, vector<2x8x8xf32>, vector<2x8x8xf32> -> vector<2x8x8xf32>
    "tpu.trace_stop"() : () -> ()
    %cst_25 = arith.constant dense<0xFF800000> : vector<2x8xf32>
    %34 = vector.multi_reduction <maximumf>, %33, %cst_25 [2] : vector<2x8x8xf32> to vector<2x8xf32>
    %35 = vector.shape_cast %34 : vector<2x8xf32> to vector<2x8x1xf32>
    %36 = vector.broadcast %35 : vector<2x8x1xf32> to vector<2x8x8xf32>
    %37 = arith.subf %33, %36 : vector<2x8x8xf32>
    %38 = math.exp %37 : vector<2x8x8xf32>
    %cst_26 = arith.constant dense<0.000000e+00> : vector<2x8xf32>
    %39 = vector.multi_reduction <add>, %38, %cst_26 [2] : vector<2x8x8xf32> to vector<2x8xf32>
    %40 = vector.shape_cast %39 : vector<2x8xf32> to vector<2x8x1xf32>
    %41 = tpu.reciprocal %40 {approx = true} : vector<2x8x1xf32> -> vector<2x8x1xf32>
    %42 = vector.broadcast %41 : vector<2x8x1xf32> to vector<2x8x8xf32>
    %43 = arith.mulf %38, %42 : vector<2x8x8xf32>
    "tpu.trace_start"() <{level = 10 : i32, message = "bqk,bkd->bqd"}> : () -> ()
    %cst_27 = arith.constant dense<0.000000e+00> : vector<2x8x8xf32>
    %44 = tpu.matmul %43, %32, %cst_27 {dimension_numbers = #tpu.dot_dimension_numbers<[2], [1], [1], [2], [0, 0, 0, 1, 1, 2], [0], [0]>} : vector<2x8x8xf32>, vector<2x8x8xf32>, vector<2x8x8xf32> -> vector<2x8x8xf32>
    "tpu.trace_stop"() : () -> ()
    %45 = vector.shape_cast %44 : vector<2x8x8xf32> to vector<16x8xf32>
    %46 = vector.extract_strided_slice %23 {offsets = [0, 0], sizes = [8, 32], strides = [1, 1]} : vector<32x32xf32> to vector<8x32xf32>
    %cst_28 = arith.constant dense<0.000000e+00> : vector<16x32xf32>
    %47 = tpu.matmul %45, %46, %cst_28 {dimension_numbers = #tpu.dot_dimension_numbers<[1], [0], [0], [1], [0, 0, 1, 1], [], []>} : vector<16x8xf32>, vector<8x32xf32>, vector<16x32xf32> -> vector<16x32xf32>
    %48 = vector.broadcast %24 : vector<1x32xf32> to vector<16x32xf32>
    %49 = arith.addf %48, %47 : vector<16x32xf32>
    %50 = vector.extract_strided_slice %26 {offsets = [0, 8], sizes = [16, 8], strides = [1, 1]} : vector<16x32xf32> to vector<16x8xf32>
    %51 = vector.shape_cast %50 : vector<16x8xf32> to vector<2x8x8xf32>
    %52 = vector.extract_strided_slice %21 {offsets = [0, 8], sizes = [16, 8], strides = [1, 1]} : vector<16x32xf32> to vector<16x8xf32>
    %53 = vector.shape_cast %52 : vector<16x8xf32> to vector<2x8x8xf32>
    %54 = vector.extract_strided_slice %19 {offsets = [0, 8], sizes = [16, 8], strides = [1, 1]} : vector<16x32xf32> to vector<16x8xf32>
    %55 = vector.shape_cast %54 : vector<16x8xf32> to vector<2x8x8xf32>
    "tpu.trace_start"() <{level = 10 : i32, message = "bqd,bkd->bqk"}> : () -> ()
    %cst_29 = arith.constant dense<0.000000e+00> : vector<2x8x8xf32>
    %56 = tpu.matmul %51, %53, %cst_29 {dimension_numbers = #tpu.dot_dimension_numbers<[2], [2], [1], [1], [0, 0, 0, 1, 1, 1], [0], [0]>} : vector<2x8x8xf32>, vector<2x8x8xf32>, vector<2x8x8xf32> -> vector<2x8x8xf32>
    "tpu.trace_stop"() : () -> ()
    %cst_30 = arith.constant dense<0xFF800000> : vector<2x8xf32>
    %57 = vector.multi_reduction <maximumf>, %56, %cst_30 [2] : vector<2x8x8xf32> to vector<2x8xf32>
    %58 = vector.shape_cast %57 : vector<2x8xf32> to vector<2x8x1xf32>
    %59 = vector.broadcast %58 : vector<2x8x1xf32> to vector<2x8x8xf32>
    %60 = arith.subf %56, %59 : vector<2x8x8xf32>
    %61 = math.exp %60 : vector<2x8x8xf32>
    %cst_31 = arith.constant dense<0.000000e+00> : vector<2x8xf32>
    %62 = vector.multi_reduction <add>, %61, %cst_31 [2] : vector<2x8x8xf32> to vector<2x8xf32>
    %63 = vector.shape_cast %62 : vector<2x8xf32> to vector<2x8x1xf32>
    %64 = tpu.reciprocal %63 {approx = true} : vector<2x8x1xf32> -> vector<2x8x1xf32>
    %65 = vector.broadcast %64 : vector<2x8x1xf32> to vector<2x8x8xf32>
    %66 = arith.mulf %61, %65 : vector<2x8x8xf32>
    "tpu.trace_start"() <{level = 10 : i32, message = "bqk,bkd->bqd"}> : () -> ()
    %cst_32 = arith.constant dense<0.000000e+00> : vector<2x8x8xf32>
    %67 = tpu.matmul %66, %55, %cst_32 {dimension_numbers = #tpu.dot_dimension_numbers<[2], [1], [1], [2], [0, 0, 0, 1, 1, 2], [0], [0]>} : vector<2x8x8xf32>, vector<2x8x8xf32>, vector<2x8x8xf32> -> vector<2x8x8xf32>
    "tpu.trace_stop"() : () -> ()
    %68 = vector.shape_cast %67 : vector<2x8x8xf32> to vector<16x8xf32>
    %69 = vector.extract_strided_slice %23 {offsets = [8, 0], sizes = [8, 32], strides = [1, 1]} : vector<32x32xf32> to vector<8x32xf32>
    %cst_33 = arith.constant dense<0.000000e+00> : vector<16x32xf32>
    %70 = tpu.matmul %68, %69, %cst_33 {dimension_numbers = #tpu.dot_dimension_numbers<[1], [0], [0], [1], [0, 0, 1, 1], [], []>} : vector<16x8xf32>, vector<8x32xf32>, vector<16x32xf32> -> vector<16x32xf32>
    %71 = arith.addf %49, %70 : vector<16x32xf32>
    %72 = vector.extract_strided_slice %26 {offsets = [0, 16], sizes = [16, 8], strides = [1, 1]} : vector<16x32xf32> to vector<16x8xf32>
    %73 = vector.shape_cast %72 : vector<16x8xf32> to vector<2x8x8xf32>
    %74 = vector.extract_strided_slice %21 {offsets = [0, 16], sizes = [16, 8], strides = [1, 1]} : vector<16x32xf32> to vector<16x8xf32>
    %75 = vector.shape_cast %74 : vector<16x8xf32> to vector<2x8x8xf32>
    %76 = vector.extract_strided_slice %19 {offsets = [0, 16], sizes = [16, 8], strides = [1, 1]} : vector<16x32xf32> to vector<16x8xf32>
    %77 = vector.shape_cast %76 : vector<16x8xf32> to vector<2x8x8xf32>
    "tpu.trace_start"() <{level = 10 : i32, message = "bqd,bkd->bqk"}> : () -> ()
    %cst_34 = arith.constant dense<0.000000e+00> : vector<2x8x8xf32>
    %78 = tpu.matmul %73, %75, %cst_34 {dimension_numbers = #tpu.dot_dimension_numbers<[2], [2], [1], [1], [0, 0, 0, 1, 1, 1], [0], [0]>} : vector<2x8x8xf32>, vector<2x8x8xf32>, vector<2x8x8xf32> -> vector<2x8x8xf32>
    "tpu.trace_stop"() : () -> ()
    %cst_35 = arith.constant dense<0xFF800000> : vector<2x8xf32>
    %79 = vector.multi_reduction <maximumf>, %78, %cst_35 [2] : vector<2x8x8xf32> to vector<2x8xf32>
    %80 = vector.shape_cast %79 : vector<2x8xf32> to vector<2x8x1xf32>
    %81 = vector.broadcast %80 : vector<2x8x1xf32> to vector<2x8x8xf32>
    %82 = arith.subf %78, %81 : vector<2x8x8xf32>
    %83 = math.exp %82 : vector<2x8x8xf32>
    %cst_36 = arith.constant dense<0.000000e+00> : vector<2x8xf32>
    %84 = vector.multi_reduction <add>, %83, %cst_36 [2] : vector<2x8x8xf32> to vector<2x8xf32>
    %85 = vector.shape_cast %84 : vector<2x8xf32> to vector<2x8x1xf32>
    %86 = tpu.reciprocal %85 {approx = true} : vector<2x8x1xf32> -> vector<2x8x1xf32>
    %87 = vector.broadcast %86 : vector<2x8x1xf32> to vector<2x8x8xf32>
    %88 = arith.mulf %83, %87 : vector<2x8x8xf32>
    "tpu.trace_start"() <{level = 10 : i32, message = "bqk,bkd->bqd"}> : () -> ()
    %cst_37 = arith.constant dense<0.000000e+00> : vector<2x8x8xf32>
    %89 = tpu.matmul %88, %77, %cst_37 {dimension_numbers = #tpu.dot_dimension_numbers<[2], [1], [1], [2], [0, 0, 0, 1, 1, 2], [0], [0]>} : vector<2x8x8xf32>, vector<2x8x8xf32>, vector<2x8x8xf32> -> vector<2x8x8xf32>
    "tpu.trace_stop"() : () -> ()
    %90 = vector.shape_cast %89 : vector<2x8x8xf32> to vector<16x8xf32>
    %91 = vector.extract_strided_slice %23 {offsets = [16, 0], sizes = [8, 32], strides = [1, 1]} : vector<32x32xf32> to vector<8x32xf32>
    %cst_38 = arith.constant dense<0.000000e+00> : vector<16x32xf32>
    %92 = tpu.matmul %90, %91, %cst_38 {dimension_numbers = #tpu.dot_dimension_numbers<[1], [0], [0], [1], [0, 0, 1, 1], [], []>} : vector<16x8xf32>, vector<8x32xf32>, vector<16x32xf32> -> vector<16x32xf32>
    %93 = arith.addf %71, %92 : vector<16x32xf32>
    %94 = vector.extract_strided_slice %26 {offsets = [0, 24], sizes = [16, 8], strides = [1, 1]} : vector<16x32xf32> to vector<16x8xf32>
    %95 = vector.shape_cast %94 : vector<16x8xf32> to vector<2x8x8xf32>
    %96 = vector.extract_strided_slice %21 {offsets = [0, 24], sizes = [16, 8], strides = [1, 1]} : vector<16x32xf32> to vector<16x8xf32>
    %97 = vector.shape_cast %96 : vector<16x8xf32> to vector<2x8x8xf32>
    %98 = vector.extract_strided_slice %19 {offsets = [0, 24], sizes = [16, 8], strides = [1, 1]} : vector<16x32xf32> to vector<16x8xf32>
    %99 = vector.shape_cast %98 : vector<16x8xf32> to vector<2x8x8xf32>
    "tpu.trace_start"() <{level = 10 : i32, message = "bqd,bkd->bqk"}> : () -> ()
    %cst_39 = arith.constant dense<0.000000e+00> : vector<2x8x8xf32>
    %100 = tpu.matmul %95, %97, %cst_39 {dimension_numbers = #tpu.dot_dimension_numbers<[2], [2], [1], [1], [0, 0, 0, 1, 1, 1], [0], [0]>} : vector<2x8x8xf32>, vector<2x8x8xf32>, vector<2x8x8xf32> -> vector<2x8x8xf32>
    "tpu.trace_stop"() : () -> ()
    %cst_40 = arith.constant dense<0xFF800000> : vector<2x8xf32>
    %101 = vector.multi_reduction <maximumf>, %100, %cst_40 [2] : vector<2x8x8xf32> to vector<2x8xf32>
    %102 = vector.shape_cast %101 : vector<2x8xf32> to vector<2x8x1xf32>
    %103 = vector.broadcast %102 : vector<2x8x1xf32> to vector<2x8x8xf32>
    %104 = arith.subf %100, %103 : vector<2x8x8xf32>
    %105 = math.exp %104 : vector<2x8x8xf32>
    %cst_41 = arith.constant dense<0.000000e+00> : vector<2x8xf32>
    %106 = vector.multi_reduction <add>, %105, %cst_41 [2] : vector<2x8x8xf32> to vector<2x8xf32>
    %107 = vector.shape_cast %106 : vector<2x8xf32> to vector<2x8x1xf32>
    %108 = tpu.reciprocal %107 {approx = true} : vector<2x8x1xf32> -> vector<2x8x1xf32>
    %109 = vector.broadcast %108 : vector<2x8x1xf32> to vector<2x8x8xf32>
    %110 = arith.mulf %105, %109 : vector<2x8x8xf32>
    "tpu.trace_start"() <{level = 10 : i32, message = "bqk,bkd->bqd"}> : () -> ()
    %cst_42 = arith.constant dense<0.000000e+00> : vector<2x8x8xf32>
    %111 = tpu.matmul %110, %99, %cst_42 {dimension_numbers = #tpu.dot_dimension_numbers<[2], [1], [1], [2], [0, 0, 0, 1, 1, 2], [0], [0]>} : vector<2x8x8xf32>, vector<2x8x8xf32>, vector<2x8x8xf32> -> vector<2x8x8xf32>
    "tpu.trace_stop"() : () -> ()
    %112 = vector.shape_cast %111 : vector<2x8x8xf32> to vector<16x8xf32>
    %113 = vector.extract_strided_slice %23 {offsets = [24, 0], sizes = [8, 32], strides = [1, 1]} : vector<32x32xf32> to vector<8x32xf32>
    %cst_43 = arith.constant dense<0.000000e+00> : vector<16x32xf32>
    %114 = tpu.matmul %112, %113, %cst_43 {dimension_numbers = #tpu.dot_dimension_numbers<[1], [0], [0], [1], [0, 0, 1, 1], [], []>} : vector<16x8xf32>, vector<8x32xf32>, vector<16x32xf32> -> vector<16x32xf32>
    %115 = arith.addf %93, %114 : vector<16x32xf32>
    %116 = arith.addf %0, %115 : vector<16x32xf32>
    %117 = vector.extract_strided_slice %6 {offsets = [5, 0], sizes = [1, 32], strides = [1, 1]} : vector<16x32xf32> to vector<1x32xf32>
    %118 = vector.extract_strided_slice %6 {offsets = [6, 0], sizes = [1, 32], strides = [1, 1]} : vector<16x32xf32> to vector<1x32xf32>
    %cst_44 = arith.constant dense<0.000000e+00> : vector<16xf32>
    %119 = vector.multi_reduction <add>, %116, %cst_44 [1] : vector<16x32xf32> to vector<16xf32>
    %120 = vector.shape_cast %119 : vector<16xf32> to vector<16x1xf32>
    %cst_45 = arith.constant 3.200000e+01 : f32
    %121 = vector.broadcast %cst_45 : f32 to vector<16x1xf32>
    %122 = arith.divf %120, %121 : vector<16x1xf32>
    %123 = vector.broadcast %122 : vector<16x1xf32> to vector<16x32xf32>
    %124 = arith.subf %116, %123 : vector<16x32xf32>
    %125 = arith.mulf %124, %124 : vector<16x32xf32>
    %cst_46 = arith.constant dense<0.000000e+00> : vector<16xf32>
    %126 = vector.multi_reduction <add>, %125, %cst_46 [1] : vector<16x32xf32> to vector<16xf32>
    %127 = vector.shape_cast %126 : vector<16xf32> to vector<16x1xf32>
    %cst_47 = arith.constant 3.200000e+01 : f32
    %128 = vector.broadcast %cst_47 : f32 to vector<16x1xf32>
    %129 = arith.divf %127, %128 : vector<16x1xf32>
    %130 = vector.broadcast %122 : vector<16x1xf32> to vector<16x32xf32>
    %131 = arith.subf %116, %130 : vector<16x32xf32>
    %cst_48 = arith.constant 9.99999974E-6 : f32
    %132 = vector.broadcast %cst_48 : f32 to vector<16x1xf32>
    %133 = arith.addf %129, %132 : vector<16x1xf32>
    %134 = math.rsqrt %133 : vector<16x1xf32>
    %135 = vector.broadcast %134 : vector<16x1xf32> to vector<16x32xf32>
    %136 = arith.mulf %131, %135 : vector<16x32xf32>
    %137 = vector.broadcast %117 : vector<1x32xf32> to vector<16x32xf32>
    %138 = arith.mulf %136, %137 : vector<16x32xf32>
    %139 = vector.broadcast %118 : vector<1x32xf32> to vector<16x32xf32>
    %140 = arith.addf %138, %139 : vector<16x32xf32>
    %141 = arith.addf %140, %1 : vector<16x32xf32>
    %c0_49 = arith.constant 0 : index
    %c2 = arith.constant 2 : index
    %c0_50 = arith.constant 0 : index
    %c0_51 = arith.constant 0 : index
    %142 = vector.load %arg5[%c0_49, %c2, %c0_50, %c0_51] : memref<2x4x32x32xf32, #tpu.memory_space<vmem>>, vector<1x1x32x32xf32>
    %143 = vector.shape_cast %142 : vector<1x1x32x32xf32> to vector<32x32xf32>
    %cst_52 = arith.constant dense<0.000000e+00> : vector<16x32xf32>
    %144 = tpu.matmul %141, %143, %cst_52 {dimension_numbers = #tpu.dot_dimension_numbers<[1], [0], [0], [1], [0, 0, 1, 1], [], []>} : vector<16x32xf32>, vector<32x32xf32>, vector<16x32xf32> -> vector<16x32xf32>
    %145 = vector.extract_strided_slice %6 {offsets = [2, 0], sizes = [1, 32], strides = [1, 1]} : vector<16x32xf32> to vector<1x32xf32>
    %146 = vector.broadcast %145 : vector<1x32xf32> to vector<16x32xf32>
    %147 = arith.addf %144, %146 : vector<16x32xf32>
    %c0_53 = arith.constant 0 : index
    %c1_54 = arith.constant 1 : index
    %c0_55 = arith.constant 0 : index
    %c0_56 = arith.constant 0 : index
    %148 = vector.load %arg4[%c0_53, %c1_54, %c0_55, %c0_56] : memref<2x3x32x64xf32, #tpu.memory_space<vmem>>, vector<1x1x32x64xf32>
    %149 = vector.shape_cast %148 : vector<1x1x32x64xf32> to vector<32x64xf32>
    %cst_57 = arith.constant dense<0.000000e+00> : vector<32x64xf32>
    %150 = tpu.matmul %2, %149, %cst_57 {dimension_numbers = #tpu.dot_dimension_numbers<[1], [0], [0], [1], [0, 0, 1, 1], [], []>} : vector<32x32xf32>, vector<32x64xf32>, vector<32x64xf32> -> vector<32x64xf32>
    %151 = vector.extract_strided_slice %4 {offsets = [1, 0], sizes = [1, 64], strides = [1, 1]} : vector<8x64xf32> to vector<1x64xf32>
    %152 = vector.broadcast %151 : vector<1x64xf32> to vector<32x64xf32>
    %153 = arith.addf %150, %152 : vector<32x64xf32>
    %154 = vector.extract_strided_slice %153 {offsets = [0, 0], sizes = [32, 32], strides = [1, 1]} : vector<32x64xf32> to vector<32x32xf32>
    %155 = vector.extract_strided_slice %153 {offsets = [0, 32], sizes = [32, 32], strides = [1, 1]} : vector<32x64xf32> to vector<32x32xf32>
    %c0_58 = arith.constant 0 : index
    %c3 = arith.constant 3 : index
    %c0_59 = arith.constant 0 : index
    %c0_60 = arith.constant 0 : index
    %156 = vector.load %arg5[%c0_58, %c3, %c0_59, %c0_60] : memref<2x4x32x32xf32, #tpu.memory_space<vmem>>, vector<1x1x32x32xf32>
    %157 = vector.shape_cast %156 : vector<1x1x32x32xf32> to vector<32x32xf32>
    %158 = vector.extract_strided_slice %6 {offsets = [3, 0], sizes = [1, 32], strides = [1, 1]} : vector<16x32xf32> to vector<1x32xf32>
    %cst_61 = arith.constant 0.353553385 : f32
    %159 = vector.broadcast %cst_61 : f32 to vector<16x32xf32>
    %160 = arith.mulf %147, %159 : vector<16x32xf32>
    %161 = vector.extract_strided_slice %160 {offsets = [0, 0], sizes = [16, 8], strides = [1, 1]} : vector<16x32xf32> to vector<16x8xf32>
    %162 = vector.shape_cast %161 : vector<16x8xf32> to vector<2x8x8xf32>
    %163 = vector.extract_strided_slice %154 {offsets = [0, 0], sizes = [32, 8], strides = [1, 1]} : vector<32x32xf32> to vector<32x8xf32>
    %164 = vector.shape_cast %163 : vector<32x8xf32> to vector<2x16x8xf32>
    %165 = vector.extract_strided_slice %155 {offsets = [0, 0], sizes = [32, 8], strides = [1, 1]} : vector<32x32xf32> to vector<32x8xf32>
    %166 = vector.shape_cast %165 : vector<32x8xf32> to vector<2x16x8xf32>
    "tpu.trace_start"() <{level = 10 : i32, message = "bqd,bkd->bqk"}> : () -> ()
    %cst_62 = arith.constant dense<0.000000e+00> : vector<2x8x16xf32>
    %167 = tpu.matmul %162, %164, %cst_62 {dimension_numbers = #tpu.dot_dimension_numbers<[2], [2], [1], [1], [0, 0, 0, 1, 1, 1], [0], [0]>} : vector<2x8x8xf32>, vector<2x16x8xf32>, vector<2x8x16xf32> -> vector<2x8x16xf32>
    "tpu.trace_stop"() : () -> ()
    %cst_63 = arith.constant dense<0xFF800000> : vector<2x8xf32>
    %168 = vector.multi_reduction <maximumf>, %167, %cst_63 [2] : vector<2x8x16xf32> to vector<2x8xf32>
    %169 = vector.shape_cast %168 : vector<2x8xf32> to vector<2x8x1xf32>
    %170 = vector.broadcast %169 : vector<2x8x1xf32> to vector<2x8x16xf32>
    %171 = arith.subf %167, %170 : vector<2x8x16xf32>
    %172 = math.exp %171 : vector<2x8x16xf32>
    %cst_64 = arith.constant dense<0.000000e+00> : vector<2x8xf32>
    %173 = vector.multi_reduction <add>, %172, %cst_64 [2] : vector<2x8x16xf32> to vector<2x8xf32>
    %174 = vector.shape_cast %173 : vector<2x8xf32> to vector<2x8x1xf32>
    %175 = tpu.reciprocal %174 {approx = true} : vector<2x8x1xf32> -> vector<2x8x1xf32>
    %176 = vector.broadcast %175 : vector<2x8x1xf32> to vector<2x8x16xf32>
    %177 = arith.mulf %172, %176 : vector<2x8x16xf32>
    "tpu.trace_start"() <{level = 10 : i32, message = "bqk,bkd->bqd"}> : () -> ()
    %cst_65 = arith.constant dense<0.000000e+00> : vector<2x8x8xf32>
    %178 = tpu.matmul %177, %166, %cst_65 {dimension_numbers = #tpu.dot_dimension_numbers<[2], [1], [1], [2], [0, 0, 0, 1, 1, 2], [0], [0]>} : vector<2x8x16xf32>, vector<2x16x8xf32>, vector<2x8x8xf32> -> vector<2x8x8xf32>
    "tpu.trace_stop"() : () -> ()
    %179 = vector.shape_cast %178 : vector<2x8x8xf32> to vector<16x8xf32>
    %180 = vector.extract_strided_slice %157 {offsets = [0, 0], sizes = [8, 32], strides = [1, 1]} : vector<32x32xf32> to vector<8x32xf32>
    %cst_66 = arith.constant dense<0.000000e+00> : vector<16x32xf32>
    %181 = tpu.matmul %179, %180, %cst_66 {dimension_numbers = #tpu.dot_dimension_numbers<[1], [0], [0], [1], [0, 0, 1, 1], [], []>} : vector<16x8xf32>, vector<8x32xf32>, vector<16x32xf32> -> vector<16x32xf32>
    %182 = vector.broadcast %158 : vector<1x32xf32> to vector<16x32xf32>
    %183 = arith.addf %182, %181 : vector<16x32xf32>
    %184 = vector.extract_strided_slice %160 {offsets = [0, 8], sizes = [16, 8], strides = [1, 1]} : vector<16x32xf32> to vector<16x8xf32>
    %185 = vector.shape_cast %184 : vector<16x8xf32> to vector<2x8x8xf32>
    %186 = vector.extract_strided_slice %154 {offsets = [0, 8], sizes = [32, 8], strides = [1, 1]} : vector<32x32xf32> to vector<32x8xf32>
    %187 = vector.shape_cast %186 : vector<32x8xf32> to vector<2x16x8xf32>
    %188 = vector.extract_strided_slice %155 {offsets = [0, 8], sizes = [32, 8], strides = [1, 1]} : vector<32x32xf32> to vector<32x8xf32>
    %189 = vector.shape_cast %188 : vector<32x8xf32> to vector<2x16x8xf32>
    "tpu.trace_start"() <{level = 10 : i32, message = "bqd,bkd->bqk"}> : () -> ()
    %cst_67 = arith.constant dense<0.000000e+00> : vector<2x8x16xf32>
    %190 = tpu.matmul %185, %187, %cst_67 {dimension_numbers = #tpu.dot_dimension_numbers<[2], [2], [1], [1], [0, 0, 0, 1, 1, 1], [0], [0]>} : vector<2x8x8xf32>, vector<2x16x8xf32>, vector<2x8x16xf32> -> vector<2x8x16xf32>
    "tpu.trace_stop"() : () -> ()
    %cst_68 = arith.constant dense<0xFF800000> : vector<2x8xf32>
    %191 = vector.multi_reduction <maximumf>, %190, %cst_68 [2] : vector<2x8x16xf32> to vector<2x8xf32>
    %192 = vector.shape_cast %191 : vector<2x8xf32> to vector<2x8x1xf32>
    %193 = vector.broadcast %192 : vector<2x8x1xf32> to vector<2x8x16xf32>
    %194 = arith.subf %190, %193 : vector<2x8x16xf32>
    %195 = math.exp %194 : vector<2x8x16xf32>
    %cst_69 = arith.constant dense<0.000000e+00> : vector<2x8xf32>
    %196 = vector.multi_reduction <add>, %195, %cst_69 [2] : vector<2x8x16xf32> to vector<2x8xf32>
    %197 = vector.shape_cast %196 : vector<2x8xf32> to vector<2x8x1xf32>
    %198 = tpu.reciprocal %197 {approx = true} : vector<2x8x1xf32> -> vector<2x8x1xf32>
    %199 = vector.broadcast %198 : vector<2x8x1xf32> to vector<2x8x16xf32>
    %200 = arith.mulf %195, %199 : vector<2x8x16xf32>
    "tpu.trace_start"() <{level = 10 : i32, message = "bqk,bkd->bqd"}> : () -> ()
    %cst_70 = arith.constant dense<0.000000e+00> : vector<2x8x8xf32>
    %201 = tpu.matmul %200, %189, %cst_70 {dimension_numbers = #tpu.dot_dimension_numbers<[2], [1], [1], [2], [0, 0, 0, 1, 1, 2], [0], [0]>} : vector<2x8x16xf32>, vector<2x16x8xf32>, vector<2x8x8xf32> -> vector<2x8x8xf32>
    "tpu.trace_stop"() : () -> ()
    %202 = vector.shape_cast %201 : vector<2x8x8xf32> to vector<16x8xf32>
    %203 = vector.extract_strided_slice %157 {offsets = [8, 0], sizes = [8, 32], strides = [1, 1]} : vector<32x32xf32> to vector<8x32xf32>
    %cst_71 = arith.constant dense<0.000000e+00> : vector<16x32xf32>
    %204 = tpu.matmul %202, %203, %cst_71 {dimension_numbers = #tpu.dot_dimension_numbers<[1], [0], [0], [1], [0, 0, 1, 1], [], []>} : vector<16x8xf32>, vector<8x32xf32>, vector<16x32xf32> -> vector<16x32xf32>
    %205 = arith.addf %183, %204 : vector<16x32xf32>
    %206 = vector.extract_strided_slice %160 {offsets = [0, 16], sizes = [16, 8], strides = [1, 1]} : vector<16x32xf32> to vector<16x8xf32>
    %207 = vector.shape_cast %206 : vector<16x8xf32> to vector<2x8x8xf32>
    %208 = vector.extract_strided_slice %154 {offsets = [0, 16], sizes = [32, 8], strides = [1, 1]} : vector<32x32xf32> to vector<32x8xf32>
    %209 = vector.shape_cast %208 : vector<32x8xf32> to vector<2x16x8xf32>
    %210 = vector.extract_strided_slice %155 {offsets = [0, 16], sizes = [32, 8], strides = [1, 1]} : vector<32x32xf32> to vector<32x8xf32>
    %211 = vector.shape_cast %210 : vector<32x8xf32> to vector<2x16x8xf32>
    "tpu.trace_start"() <{level = 10 : i32, message = "bqd,bkd->bqk"}> : () -> ()
    %cst_72 = arith.constant dense<0.000000e+00> : vector<2x8x16xf32>
    %212 = tpu.matmul %207, %209, %cst_72 {dimension_numbers = #tpu.dot_dimension_numbers<[2], [2], [1], [1], [0, 0, 0, 1, 1, 1], [0], [0]>} : vector<2x8x8xf32>, vector<2x16x8xf32>, vector<2x8x16xf32> -> vector<2x8x16xf32>
    "tpu.trace_stop"() : () -> ()
    %cst_73 = arith.constant dense<0xFF800000> : vector<2x8xf32>
    %213 = vector.multi_reduction <maximumf>, %212, %cst_73 [2] : vector<2x8x16xf32> to vector<2x8xf32>
    %214 = vector.shape_cast %213 : vector<2x8xf32> to vector<2x8x1xf32>
    %215 = vector.broadcast %214 : vector<2x8x1xf32> to vector<2x8x16xf32>
    %216 = arith.subf %212, %215 : vector<2x8x16xf32>
    %217 = math.exp %216 : vector<2x8x16xf32>
    %cst_74 = arith.constant dense<0.000000e+00> : vector<2x8xf32>
    %218 = vector.multi_reduction <add>, %217, %cst_74 [2] : vector<2x8x16xf32> to vector<2x8xf32>
    %219 = vector.shape_cast %218 : vector<2x8xf32> to vector<2x8x1xf32>
    %220 = tpu.reciprocal %219 {approx = true} : vector<2x8x1xf32> -> vector<2x8x1xf32>
    %221 = vector.broadcast %220 : vector<2x8x1xf32> to vector<2x8x16xf32>
    %222 = arith.mulf %217, %221 : vector<2x8x16xf32>
    "tpu.trace_start"() <{level = 10 : i32, message = "bqk,bkd->bqd"}> : () -> ()
    %cst_75 = arith.constant dense<0.000000e+00> : vector<2x8x8xf32>
    %223 = tpu.matmul %222, %211, %cst_75 {dimension_numbers = #tpu.dot_dimension_numbers<[2], [1], [1], [2], [0, 0, 0, 1, 1, 2], [0], [0]>} : vector<2x8x16xf32>, vector<2x16x8xf32>, vector<2x8x8xf32> -> vector<2x8x8xf32>
    "tpu.trace_stop"() : () -> ()
    %224 = vector.shape_cast %223 : vector<2x8x8xf32> to vector<16x8xf32>
    %225 = vector.extract_strided_slice %157 {offsets = [16, 0], sizes = [8, 32], strides = [1, 1]} : vector<32x32xf32> to vector<8x32xf32>
    %cst_76 = arith.constant dense<0.000000e+00> : vector<16x32xf32>
    %226 = tpu.matmul %224, %225, %cst_76 {dimension_numbers = #tpu.dot_dimension_numbers<[1], [0], [0], [1], [0, 0, 1, 1], [], []>} : vector<16x8xf32>, vector<8x32xf32>, vector<16x32xf32> -> vector<16x32xf32>
    %227 = arith.addf %205, %226 : vector<16x32xf32>
    %228 = vector.extract_strided_slice %160 {offsets = [0, 24], sizes = [16, 8], strides = [1, 1]} : vector<16x32xf32> to vector<16x8xf32>
    %229 = vector.shape_cast %228 : vector<16x8xf32> to vector<2x8x8xf32>
    %230 = vector.extract_strided_slice %154 {offsets = [0, 24], sizes = [32, 8], strides = [1, 1]} : vector<32x32xf32> to vector<32x8xf32>
    %231 = vector.shape_cast %230 : vector<32x8xf32> to vector<2x16x8xf32>
    %232 = vector.extract_strided_slice %155 {offsets = [0, 24], sizes = [32, 8], strides = [1, 1]} : vector<32x32xf32> to vector<32x8xf32>
    %233 = vector.shape_cast %232 : vector<32x8xf32> to vector<2x16x8xf32>
    "tpu.trace_start"() <{level = 10 : i32, message = "bqd,bkd->bqk"}> : () -> ()
    %cst_77 = arith.constant dense<0.000000e+00> : vector<2x8x16xf32>
    %234 = tpu.matmul %229, %231, %cst_77 {dimension_numbers = #tpu.dot_dimension_numbers<[2], [2], [1], [1], [0, 0, 0, 1, 1, 1], [0], [0]>} : vector<2x8x8xf32>, vector<2x16x8xf32>, vector<2x8x16xf32> -> vector<2x8x16xf32>
    "tpu.trace_stop"() : () -> ()
    %cst_78 = arith.constant dense<0xFF800000> : vector<2x8xf32>
    %235 = vector.multi_reduction <maximumf>, %234, %cst_78 [2] : vector<2x8x16xf32> to vector<2x8xf32>
    %236 = vector.shape_cast %235 : vector<2x8xf32> to vector<2x8x1xf32>
    %237 = vector.broadcast %236 : vector<2x8x1xf32> to vector<2x8x16xf32>
    %238 = arith.subf %234, %237 : vector<2x8x16xf32>
    %239 = math.exp %238 : vector<2x8x16xf32>
    %cst_79 = arith.constant dense<0.000000e+00> : vector<2x8xf32>
    %240 = vector.multi_reduction <add>, %239, %cst_79 [2] : vector<2x8x16xf32> to vector<2x8xf32>
    %241 = vector.shape_cast %240 : vector<2x8xf32> to vector<2x8x1xf32>
    %242 = tpu.reciprocal %241 {approx = true} : vector<2x8x1xf32> -> vector<2x8x1xf32>
    %243 = vector.broadcast %242 : vector<2x8x1xf32> to vector<2x8x16xf32>
    %244 = arith.mulf %239, %243 : vector<2x8x16xf32>
    "tpu.trace_start"() <{level = 10 : i32, message = "bqk,bkd->bqd"}> : () -> ()
    %cst_80 = arith.constant dense<0.000000e+00> : vector<2x8x8xf32>
    %245 = tpu.matmul %244, %233, %cst_80 {dimension_numbers = #tpu.dot_dimension_numbers<[2], [1], [1], [2], [0, 0, 0, 1, 1, 2], [0], [0]>} : vector<2x8x16xf32>, vector<2x16x8xf32>, vector<2x8x8xf32> -> vector<2x8x8xf32>
    "tpu.trace_stop"() : () -> ()
    %246 = vector.shape_cast %245 : vector<2x8x8xf32> to vector<16x8xf32>
    %247 = vector.extract_strided_slice %157 {offsets = [24, 0], sizes = [8, 32], strides = [1, 1]} : vector<32x32xf32> to vector<8x32xf32>
    %cst_81 = arith.constant dense<0.000000e+00> : vector<16x32xf32>
    %248 = tpu.matmul %246, %247, %cst_81 {dimension_numbers = #tpu.dot_dimension_numbers<[1], [0], [0], [1], [0, 0, 1, 1], [], []>} : vector<16x8xf32>, vector<8x32xf32>, vector<16x32xf32> -> vector<16x32xf32>
    %249 = arith.addf %227, %248 : vector<16x32xf32>
    %250 = arith.addf %140, %249 : vector<16x32xf32>
    %251 = vector.extract_strided_slice %6 {offsets = [7, 0], sizes = [1, 32], strides = [1, 1]} : vector<16x32xf32> to vector<1x32xf32>
    %252 = vector.extract_strided_slice %6 {offsets = [8, 0], sizes = [1, 32], strides = [1, 1]} : vector<16x32xf32> to vector<1x32xf32>
    %cst_82 = arith.constant dense<0.000000e+00> : vector<16xf32>
    %253 = vector.multi_reduction <add>, %250, %cst_82 [1] : vector<16x32xf32> to vector<16xf32>
    %254 = vector.shape_cast %253 : vector<16xf32> to vector<16x1xf32>
    %cst_83 = arith.constant 3.200000e+01 : f32
    %255 = vector.broadcast %cst_83 : f32 to vector<16x1xf32>
    %256 = arith.divf %254, %255 : vector<16x1xf32>
    %257 = vector.broadcast %256 : vector<16x1xf32> to vector<16x32xf32>
    %258 = arith.subf %250, %257 : vector<16x32xf32>
    %259 = arith.mulf %258, %258 : vector<16x32xf32>
    %cst_84 = arith.constant dense<0.000000e+00> : vector<16xf32>
    %260 = vector.multi_reduction <add>, %259, %cst_84 [1] : vector<16x32xf32> to vector<16xf32>
    %261 = vector.shape_cast %260 : vector<16xf32> to vector<16x1xf32>
    %cst_85 = arith.constant 3.200000e+01 : f32
    %262 = vector.broadcast %cst_85 : f32 to vector<16x1xf32>
    %263 = arith.divf %261, %262 : vector<16x1xf32>
    %264 = vector.broadcast %256 : vector<16x1xf32> to vector<16x32xf32>
    %265 = arith.subf %250, %264 : vector<16x32xf32>
    %cst_86 = arith.constant 9.99999974E-6 : f32
    %266 = vector.broadcast %cst_86 : f32 to vector<16x1xf32>
    %267 = arith.addf %263, %266 : vector<16x1xf32>
    %268 = math.rsqrt %267 : vector<16x1xf32>
    %269 = vector.broadcast %268 : vector<16x1xf32> to vector<16x32xf32>
    %270 = arith.mulf %265, %269 : vector<16x32xf32>
    %271 = vector.broadcast %251 : vector<1x32xf32> to vector<16x32xf32>
    %272 = arith.mulf %270, %271 : vector<16x32xf32>
    %273 = vector.broadcast %252 : vector<1x32xf32> to vector<16x32xf32>
    %274 = arith.addf %272, %273 : vector<16x32xf32>
    %c0_87 = arith.constant 0 : index
    %c2_88 = arith.constant 2 : index
    %c0_89 = arith.constant 0 : index
    %c0_90 = arith.constant 0 : index
    %275 = vector.load %arg4[%c0_87, %c2_88, %c0_89, %c0_90] : memref<2x3x32x64xf32, #tpu.memory_space<vmem>>, vector<1x1x32x64xf32>
    %276 = vector.shape_cast %275 : vector<1x1x32x64xf32> to vector<32x64xf32>
    %cst_91 = arith.constant dense<0.000000e+00> : vector<16x64xf32>
    %277 = tpu.matmul %274, %276, %cst_91 {dimension_numbers = #tpu.dot_dimension_numbers<[1], [0], [0], [1], [0, 0, 1, 1], [], []>} : vector<16x32xf32>, vector<32x64xf32>, vector<16x64xf32> -> vector<16x64xf32>
    %278 = vector.extract_strided_slice %4 {offsets = [2, 0], sizes = [1, 64], strides = [1, 1]} : vector<8x64xf32> to vector<1x64xf32>
    %279 = vector.broadcast %278 : vector<1x64xf32> to vector<16x64xf32>
    %280 = arith.addf %277, %279 : vector<16x64xf32>
    %cst_92 = arith.constant 0.000000e+00 : f32
    %281 = vector.broadcast %cst_92 : f32 to vector<16x64xf32>
    %282 = arith.maximumf %280, %281 : vector<16x64xf32>
    %c0_93 = arith.constant 0 : index
    %c0_94 = arith.constant 0 : index
    %c0_95 = arith.constant 0 : index
    %283 = vector.load %arg6[%c0_93, %c0_94, %c0_95] : memref<2x64x32xf32, #tpu.memory_space<vmem>>, vector<1x64x32xf32>
    %284 = vector.shape_cast %283 : vector<1x64x32xf32> to vector<64x32xf32>
    %cst_96 = arith.constant dense<0.000000e+00> : vector<16x32xf32>
    %285 = tpu.matmul %282, %284, %cst_96 {dimension_numbers = #tpu.dot_dimension_numbers<[1], [0], [0], [1], [0, 0, 1, 1], [], []>} : vector<16x64xf32>, vector<64x32xf32>, vector<16x32xf32> -> vector<16x32xf32>
    %286 = vector.extract_strided_slice %6 {offsets = [4, 0], sizes = [1, 32], strides = [1, 1]} : vector<16x32xf32> to vector<1x32xf32>
    %287 = vector.broadcast %286 : vector<1x32xf32> to vector<16x32xf32>
    %288 = arith.addf %285, %287 : vector<16x32xf32>
    %289 = arith.addf %274, %288 : vector<16x32xf32>
    %290 = vector.extract_strided_slice %6 {offsets = [9, 0], sizes = [1, 32], strides = [1, 1]} : vector<16x32xf32> to vector<1x32xf32>
    %291 = vector.extract_strided_slice %6 {offsets = [10, 0], sizes = [1, 32], strides = [1, 1]} : vector<16x32xf32> to vector<1x32xf32>
    %cst_97 = arith.constant dense<0.000000e+00> : vector<16xf32>
    %292 = vector.multi_reduction <add>, %289, %cst_97 [1] : vector<16x32xf32> to vector<16xf32>
    %293 = vector.shape_cast %292 : vector<16xf32> to vector<16x1xf32>
    %cst_98 = arith.constant 3.200000e+01 : f32
    %294 = vector.broadcast %cst_98 : f32 to vector<16x1xf32>
    %295 = arith.divf %293, %294 : vector<16x1xf32>
    %296 = vector.broadcast %295 : vector<16x1xf32> to vector<16x32xf32>
    %297 = arith.subf %289, %296 : vector<16x32xf32>
    %298 = arith.mulf %297, %297 : vector<16x32xf32>
    %cst_99 = arith.constant dense<0.000000e+00> : vector<16xf32>
    %299 = vector.multi_reduction <add>, %298, %cst_99 [1] : vector<16x32xf32> to vector<16xf32>
    %300 = vector.shape_cast %299 : vector<16xf32> to vector<16x1xf32>
    %cst_100 = arith.constant 3.200000e+01 : f32
    %301 = vector.broadcast %cst_100 : f32 to vector<16x1xf32>
    %302 = arith.divf %300, %301 : vector<16x1xf32>
    %303 = vector.broadcast %295 : vector<16x1xf32> to vector<16x32xf32>
    %304 = arith.subf %289, %303 : vector<16x32xf32>
    %cst_101 = arith.constant 9.99999974E-6 : f32
    %305 = vector.broadcast %cst_101 : f32 to vector<16x1xf32>
    %306 = arith.addf %302, %305 : vector<16x1xf32>
    %307 = math.rsqrt %306 : vector<16x1xf32>
    %308 = vector.broadcast %307 : vector<16x1xf32> to vector<16x32xf32>
    %309 = arith.mulf %304, %308 : vector<16x32xf32>
    %310 = vector.broadcast %290 : vector<1x32xf32> to vector<16x32xf32>
    %311 = arith.mulf %309, %310 : vector<16x32xf32>
    %312 = vector.broadcast %291 : vector<1x32xf32> to vector<16x32xf32>
    %313 = arith.addf %311, %312 : vector<16x32xf32>
    %c0_102 = arith.constant 0 : index
    %c0_103 = arith.constant 0 : index
    %c0_104 = arith.constant 0 : index
    %314 = vector.load %arg9[%c0_102, %c0_103, %c0_104] : memref<2x16x32xf32, #tpu.memory_space<vmem>>, vector<1x16x32xf32>
    %315 = vector.shape_cast %314 : vector<1x16x32xf32> to vector<16x32xf32>
    %316 = vector.shape_cast %313 : vector<16x32xf32> to vector<1x16x32xf32>
    tpu.vector_store %arg9[%c0_102, %c0_103, %c0_104], %316 {strides = array<i32>} : memref<2x16x32xf32, #tpu.memory_space<vmem>>, vector<1x16x32xf32>,
    %c1_105 = arith.constant 1 : index
    %c0_106 = arith.constant 0 : index
    %c0_107 = arith.constant 0 : index
    %317 = vector.load %arg7[%c1_105, %c0_106, %c0_107] : memref<2x8x64xf32, #tpu.memory_space<vmem>>, vector<1x8x64xf32>
    %318 = vector.shape_cast %317 : vector<1x8x64xf32> to vector<8x64xf32>
    %c1_108 = arith.constant 1 : index
    %c0_109 = arith.constant 0 : index
    %c0_110 = arith.constant 0 : index
    %319 = vector.load %arg8[%c1_108, %c0_109, %c0_110] : memref<2x16x32xf32, #tpu.memory_space<vmem>>, vector<1x16x32xf32>
    %320 = vector.shape_cast %319 : vector<1x16x32xf32> to vector<16x32xf32>
    %321 = arith.addf %313, %1 : vector<16x32xf32>
    %c1_111 = arith.constant 1 : index
    %c0_112 = arith.constant 0 : index
    %c0_113 = arith.constant 0 : index
    %c0_114 = arith.constant 0 : index
    %322 = vector.load %arg4[%c1_111, %c0_112, %c0_113, %c0_114] : memref<2x3x32x64xf32, #tpu.memory_space<vmem>>, vector<1x1x32x64xf32>
    %323 = vector.shape_cast %322 : vector<1x1x32x64xf32> to vector<32x64xf32>
    %cst_115 = arith.constant dense<0.000000e+00> : vector<16x64xf32>
    %324 = tpu.matmul %321, %323, %cst_115 {dimension_numbers = #tpu.dot_dimension_numbers<[1], [0], [0], [1], [0, 0, 1, 1], [], []>} : vector<16x32xf32>, vector<32x64xf32>, vector<16x64xf32> -> vector<16x64xf32>
    %325 = vector.extract_strided_slice %318 {offsets = [0, 0], sizes = [1, 64], strides = [1, 1]} : vector<8x64xf32> to vector<1x64xf32>
    %326 = vector.broadcast %325 : vector<1x64xf32> to vector<16x64xf32>
    %327 = arith.addf %324, %326 : vector<16x64xf32>
    %c1_116 = arith.constant 1 : index
    %c0_117 = arith.constant 0 : index
    %c0_118 = arith.constant 0 : index
    %c0_119 = arith.constant 0 : index
    %328 = vector.load %arg5[%c1_116, %c0_117, %c0_118, %c0_119] : memref<2x4x32x32xf32, #tpu.memory_space<vmem>>, vector<1x1x32x32xf32>
    %329 = vector.shape_cast %328 : vector<1x1x32x32xf32> to vector<32x32xf32>
    %cst_120 = arith.constant dense<0.000000e+00> : vector<16x32xf32>
    %330 = tpu.matmul %313, %329, %cst_120 {dimension_numbers = #tpu.dot_dimension_numbers<[1], [0], [0], [1], [0, 0, 1, 1], [], []>} : vector<16x32xf32>, vector<32x32xf32>, vector<16x32xf32> -> vector<16x32xf32>
    %331 = vector.extract_strided_slice %320 {offsets = [0, 0], sizes = [1, 32], strides = [1, 1]} : vector<16x32xf32> to vector<1x32xf32>
    %332 = vector.broadcast %331 : vector<1x32xf32> to vector<16x32xf32>
    %333 = arith.addf %330, %332 : vector<16x32xf32>
    %334 = vector.extract_strided_slice %327 {offsets = [0, 0], sizes = [16, 32], strides = [1, 1]} : vector<16x64xf32> to vector<16x32xf32>
    %335 = vector.extract_strided_slice %327 {offsets = [0, 32], sizes = [16, 32], strides = [1, 1]} : vector<16x64xf32> to vector<16x32xf32>
    %c1_121 = arith.constant 1 : index
    %c1_122 = arith.constant 1 : index
    %c0_123 = arith.constant 0 : index
    %c0_124 = arith.constant 0 : index
    %336 = vector.load %arg5[%c1_121, %c1_122, %c0_123, %c0_124] : memref<2x4x32x32xf32, #tpu.memory_space<vmem>>, vector<1x1x32x32xf32>
    %337 = vector.shape_cast %336 : vector<1x1x32x32xf32> to vector<32x32xf32>
    %338 = vector.extract_strided_slice %320 {offsets = [1, 0], sizes = [1, 32], strides = [1, 1]} : vector<16x32xf32> to vector<1x32xf32>
    %cst_125 = arith.constant 0.353553385 : f32
    %339 = vector.broadcast %cst_125 : f32 to vector<16x32xf32>
    %340 = arith.mulf %334, %339 : vector<16x32xf32>
    %341 = vector.extract_strided_slice %340 {offsets = [0, 0], sizes = [16, 8], strides = [1, 1]} : vector<16x32xf32> to vector<16x8xf32>
    %342 = vector.shape_cast %341 : vector<16x8xf32> to vector<2x8x8xf32>
    %343 = vector.extract_strided_slice %335 {offsets = [0, 0], sizes = [16, 8], strides = [1, 1]} : vector<16x32xf32> to vector<16x8xf32>
    %344 = vector.shape_cast %343 : vector<16x8xf32> to vector<2x8x8xf32>
    %345 = vector.extract_strided_slice %333 {offsets = [0, 0], sizes = [16, 8], strides = [1, 1]} : vector<16x32xf32> to vector<16x8xf32>
    %346 = vector.shape_cast %345 : vector<16x8xf32> to vector<2x8x8xf32>
    "tpu.trace_start"() <{level = 10 : i32, message = "bqd,bkd->bqk"}> : () -> ()
    %cst_126 = arith.constant dense<0.000000e+00> : vector<2x8x8xf32>
    %347 = tpu.matmul %342, %344, %cst_126 {dimension_numbers = #tpu.dot_dimension_numbers<[2], [2], [1], [1], [0, 0, 0, 1, 1, 1], [0], [0]>} : vector<2x8x8xf32>, vector<2x8x8xf32>, vector<2x8x8xf32> -> vector<2x8x8xf32>
    "tpu.trace_stop"() : () -> ()
    %cst_127 = arith.constant dense<0xFF800000> : vector<2x8xf32>
    %348 = vector.multi_reduction <maximumf>, %347, %cst_127 [2] : vector<2x8x8xf32> to vector<2x8xf32>
    %349 = vector.shape_cast %348 : vector<2x8xf32> to vector<2x8x1xf32>
    %350 = vector.broadcast %349 : vector<2x8x1xf32> to vector<2x8x8xf32>
    %351 = arith.subf %347, %350 : vector<2x8x8xf32>
    %352 = math.exp %351 : vector<2x8x8xf32>
    %cst_128 = arith.constant dense<0.000000e+00> : vector<2x8xf32>
    %353 = vector.multi_reduction <add>, %352, %cst_128 [2] : vector<2x8x8xf32> to vector<2x8xf32>
    %354 = vector.shape_cast %353 : vector<2x8xf32> to vector<2x8x1xf32>
    %355 = tpu.reciprocal %354 {approx = true} : vector<2x8x1xf32> -> vector<2x8x1xf32>
    %356 = vector.broadcast %355 : vector<2x8x1xf32> to vector<2x8x8xf32>
    %357 = arith.mulf %352, %356 : vector<2x8x8xf32>
    "tpu.trace_start"() <{level = 10 : i32, message = "bqk,bkd->bqd"}> : () -> ()
    %cst_129 = arith.constant dense<0.000000e+00> : vector<2x8x8xf32>
    %358 = tpu.matmul %357, %346, %cst_129 {dimension_numbers = #tpu.dot_dimension_numbers<[2], [1], [1], [2], [0, 0, 0, 1, 1, 2], [0], [0]>} : vector<2x8x8xf32>, vector<2x8x8xf32>, vector<2x8x8xf32> -> vector<2x8x8xf32>
    "tpu.trace_stop"() : () -> ()
    %359 = vector.shape_cast %358 : vector<2x8x8xf32> to vector<16x8xf32>
    %360 = vector.extract_strided_slice %337 {offsets = [0, 0], sizes = [8, 32], strides = [1, 1]} : vector<32x32xf32> to vector<8x32xf32>
    %cst_130 = arith.constant dense<0.000000e+00> : vector<16x32xf32>
    %361 = tpu.matmul %359, %360, %cst_130 {dimension_numbers = #tpu.dot_dimension_numbers<[1], [0], [0], [1], [0, 0, 1, 1], [], []>} : vector<16x8xf32>, vector<8x32xf32>, vector<16x32xf32> -> vector<16x32xf32>
    %362 = vector.broadcast %338 : vector<1x32xf32> to vector<16x32xf32>
    %363 = arith.addf %362, %361 : vector<16x32xf32>
    %364 = vector.extract_strided_slice %340 {offsets = [0, 8], sizes = [16, 8], strides = [1, 1]} : vector<16x32xf32> to vector<16x8xf32>
    %365 = vector.shape_cast %364 : vector<16x8xf32> to vector<2x8x8xf32>
    %366 = vector.extract_strided_slice %335 {offsets = [0, 8], sizes = [16, 8], strides = [1, 1]} : vector<16x32xf32> to vector<16x8xf32>
    %367 = vector.shape_cast %366 : vector<16x8xf32> to vector<2x8x8xf32>
    %368 = vector.extract_strided_slice %333 {offsets = [0, 8], sizes = [16, 8], strides = [1, 1]} : vector<16x32xf32> to vector<16x8xf32>
    %369 = vector.shape_cast %368 : vector<16x8xf32> to vector<2x8x8xf32>
    "tpu.trace_start"() <{level = 10 : i32, message = "bqd,bkd->bqk"}> : () -> ()
    %cst_131 = arith.constant dense<0.000000e+00> : vector<2x8x8xf32>
    %370 = tpu.matmul %365, %367, %cst_131 {dimension_numbers = #tpu.dot_dimension_numbers<[2], [2], [1], [1], [0, 0, 0, 1, 1, 1], [0], [0]>} : vector<2x8x8xf32>, vector<2x8x8xf32>, vector<2x8x8xf32> -> vector<2x8x8xf32>
    "tpu.trace_stop"() : () -> ()
    %cst_132 = arith.constant dense<0xFF800000> : vector<2x8xf32>
    %371 = vector.multi_reduction <maximumf>, %370, %cst_132 [2] : vector<2x8x8xf32> to vector<2x8xf32>
    %372 = vector.shape_cast %371 : vector<2x8xf32> to vector<2x8x1xf32>
    %373 = vector.broadcast %372 : vector<2x8x1xf32> to vector<2x8x8xf32>
    %374 = arith.subf %370, %373 : vector<2x8x8xf32>
    %375 = math.exp %374 : vector<2x8x8xf32>
    %cst_133 = arith.constant dense<0.000000e+00> : vector<2x8xf32>
    %376 = vector.multi_reduction <add>, %375, %cst_133 [2] : vector<2x8x8xf32> to vector<2x8xf32>
    %377 = vector.shape_cast %376 : vector<2x8xf32> to vector<2x8x1xf32>
    %378 = tpu.reciprocal %377 {approx = true} : vector<2x8x1xf32> -> vector<2x8x1xf32>
    %379 = vector.broadcast %378 : vector<2x8x1xf32> to vector<2x8x8xf32>
    %380 = arith.mulf %375, %379 : vector<2x8x8xf32>
    "tpu.trace_start"() <{level = 10 : i32, message = "bqk,bkd->bqd"}> : () -> ()
    %cst_134 = arith.constant dense<0.000000e+00> : vector<2x8x8xf32>
    %381 = tpu.matmul %380, %369, %cst_134 {dimension_numbers = #tpu.dot_dimension_numbers<[2], [1], [1], [2], [0, 0, 0, 1, 1, 2], [0], [0]>} : vector<2x8x8xf32>, vector<2x8x8xf32>, vector<2x8x8xf32> -> vector<2x8x8xf32>
    "tpu.trace_stop"() : () -> ()
    %382 = vector.shape_cast %381 : vector<2x8x8xf32> to vector<16x8xf32>
    %383 = vector.extract_strided_slice %337 {offsets = [8, 0], sizes = [8, 32], strides = [1, 1]} : vector<32x32xf32> to vector<8x32xf32>
    %cst_135 = arith.constant dense<0.000000e+00> : vector<16x32xf32>
    %384 = tpu.matmul %382, %383, %cst_135 {dimension_numbers = #tpu.dot_dimension_numbers<[1], [0], [0], [1], [0, 0, 1, 1], [], []>} : vector<16x8xf32>, vector<8x32xf32>, vector<16x32xf32> -> vector<16x32xf32>
    %385 = arith.addf %363, %384 : vector<16x32xf32>
    %386 = vector.extract_strided_slice %340 {offsets = [0, 16], sizes = [16, 8], strides = [1, 1]} : vector<16x32xf32> to vector<16x8xf32>
    %387 = vector.shape_cast %386 : vector<16x8xf32> to vector<2x8x8xf32>
    %388 = vector.extract_strided_slice %335 {offsets = [0, 16], sizes = [16, 8], strides = [1, 1]} : vector<16x32xf32> to vector<16x8xf32>
    %389 = vector.shape_cast %388 : vector<16x8xf32> to vector<2x8x8xf32>
    %390 = vector.extract_strided_slice %333 {offsets = [0, 16], sizes = [16, 8], strides = [1, 1]} : vector<16x32xf32> to vector<16x8xf32>
    %391 = vector.shape_cast %390 : vector<16x8xf32> to vector<2x8x8xf32>
    "tpu.trace_start"() <{level = 10 : i32, message = "bqd,bkd->bqk"}> : () -> ()
    %cst_136 = arith.constant dense<0.000000e+00> : vector<2x8x8xf32>
    %392 = tpu.matmul %387, %389, %cst_136 {dimension_numbers = #tpu.dot_dimension_numbers<[2], [2], [1], [1], [0, 0, 0, 1, 1, 1], [0], [0]>} : vector<2x8x8xf32>, vector<2x8x8xf32>, vector<2x8x8xf32> -> vector<2x8x8xf32>
    "tpu.trace_stop"() : () -> ()
    %cst_137 = arith.constant dense<0xFF800000> : vector<2x8xf32>
    %393 = vector.multi_reduction <maximumf>, %392, %cst_137 [2] : vector<2x8x8xf32> to vector<2x8xf32>
    %394 = vector.shape_cast %393 : vector<2x8xf32> to vector<2x8x1xf32>
    %395 = vector.broadcast %394 : vector<2x8x1xf32> to vector<2x8x8xf32>
    %396 = arith.subf %392, %395 : vector<2x8x8xf32>
    %397 = math.exp %396 : vector<2x8x8xf32>
    %cst_138 = arith.constant dense<0.000000e+00> : vector<2x8xf32>
    %398 = vector.multi_reduction <add>, %397, %cst_138 [2] : vector<2x8x8xf32> to vector<2x8xf32>
    %399 = vector.shape_cast %398 : vector<2x8xf32> to vector<2x8x1xf32>
    %400 = tpu.reciprocal %399 {approx = true} : vector<2x8x1xf32> -> vector<2x8x1xf32>
    %401 = vector.broadcast %400 : vector<2x8x1xf32> to vector<2x8x8xf32>
    %402 = arith.mulf %397, %401 : vector<2x8x8xf32>
    "tpu.trace_start"() <{level = 10 : i32, message = "bqk,bkd->bqd"}> : () -> ()
    %cst_139 = arith.constant dense<0.000000e+00> : vector<2x8x8xf32>
    %403 = tpu.matmul %402, %391, %cst_139 {dimension_numbers = #tpu.dot_dimension_numbers<[2], [1], [1], [2], [0, 0, 0, 1, 1, 2], [0], [0]>} : vector<2x8x8xf32>, vector<2x8x8xf32>, vector<2x8x8xf32> -> vector<2x8x8xf32>
    "tpu.trace_stop"() : () -> ()
    %404 = vector.shape_cast %403 : vector<2x8x8xf32> to vector<16x8xf32>
    %405 = vector.extract_strided_slice %337 {offsets = [16, 0], sizes = [8, 32], strides = [1, 1]} : vector<32x32xf32> to vector<8x32xf32>
    %cst_140 = arith.constant dense<0.000000e+00> : vector<16x32xf32>
    %406 = tpu.matmul %404, %405, %cst_140 {dimension_numbers = #tpu.dot_dimension_numbers<[1], [0], [0], [1], [0, 0, 1, 1], [], []>} : vector<16x8xf32>, vector<8x32xf32>, vector<16x32xf32> -> vector<16x32xf32>
    %407 = arith.addf %385, %406 : vector<16x32xf32>
    %408 = vector.extract_strided_slice %340 {offsets = [0, 24], sizes = [16, 8], strides = [1, 1]} : vector<16x32xf32> to vector<16x8xf32>
    %409 = vector.shape_cast %408 : vector<16x8xf32> to vector<2x8x8xf32>
    %410 = vector.extract_strided_slice %335 {offsets = [0, 24], sizes = [16, 8], strides = [1, 1]} : vector<16x32xf32> to vector<16x8xf32>
    %411 = vector.shape_cast %410 : vector<16x8xf32> to vector<2x8x8xf32>
    %412 = vector.extract_strided_slice %333 {offsets = [0, 24], sizes = [16, 8], strides = [1, 1]} : vector<16x32xf32> to vector<16x8xf32>
    %413 = vector.shape_cast %412 : vector<16x8xf32> to vector<2x8x8xf32>
    "tpu.trace_start"() <{level = 10 : i32, message = "bqd,bkd->bqk"}> : () -> ()
    %cst_141 = arith.constant dense<0.000000e+00> : vector<2x8x8xf32>
    %414 = tpu.matmul %409, %411, %cst_141 {dimension_numbers = #tpu.dot_dimension_numbers<[2], [2], [1], [1], [0, 0, 0, 1, 1, 1], [0], [0]>} : vector<2x8x8xf32>, vector<2x8x8xf32>, vector<2x8x8xf32> -> vector<2x8x8xf32>
    "tpu.trace_stop"() : () -> ()
    %cst_142 = arith.constant dense<0xFF800000> : vector<2x8xf32>
    %415 = vector.multi_reduction <maximumf>, %414, %cst_142 [2] : vector<2x8x8xf32> to vector<2x8xf32>
    %416 = vector.shape_cast %415 : vector<2x8xf32> to vector<2x8x1xf32>
    %417 = vector.broadcast %416 : vector<2x8x1xf32> to vector<2x8x8xf32>
    %418 = arith.subf %414, %417 : vector<2x8x8xf32>
    %419 = math.exp %418 : vector<2x8x8xf32>
    %cst_143 = arith.constant dense<0.000000e+00> : vector<2x8xf32>
    %420 = vector.multi_reduction <add>, %419, %cst_143 [2] : vector<2x8x8xf32> to vector<2x8xf32>
    %421 = vector.shape_cast %420 : vector<2x8xf32> to vector<2x8x1xf32>
    %422 = tpu.reciprocal %421 {approx = true} : vector<2x8x1xf32> -> vector<2x8x1xf32>
    %423 = vector.broadcast %422 : vector<2x8x1xf32> to vector<2x8x8xf32>
    %424 = arith.mulf %419, %423 : vector<2x8x8xf32>
    "tpu.trace_start"() <{level = 10 : i32, message = "bqk,bkd->bqd"}> : () -> ()
    %cst_144 = arith.constant dense<0.000000e+00> : vector<2x8x8xf32>
    %425 = tpu.matmul %424, %413, %cst_144 {dimension_numbers = #tpu.dot_dimension_numbers<[2], [1], [1], [2], [0, 0, 0, 1, 1, 2], [0], [0]>} : vector<2x8x8xf32>, vector<2x8x8xf32>, vector<2x8x8xf32> -> vector<2x8x8xf32>
    "tpu.trace_stop"() : () -> ()
    %426 = vector.shape_cast %425 : vector<2x8x8xf32> to vector<16x8xf32>
    %427 = vector.extract_strided_slice %337 {offsets = [24, 0], sizes = [8, 32], strides = [1, 1]} : vector<32x32xf32> to vector<8x32xf32>
    %cst_145 = arith.constant dense<0.000000e+00> : vector<16x32xf32>
    %428 = tpu.matmul %426, %427, %cst_145 {dimension_numbers = #tpu.dot_dimension_numbers<[1], [0], [0], [1], [0, 0, 1, 1], [], []>} : vector<16x8xf32>, vector<8x32xf32>, vector<16x32xf32> -> vector<16x32xf32>
    %429 = arith.addf %407, %428 : vector<16x32xf32>
    %430 = arith.addf %313, %429 : vector<16x32xf32>
    %431 = vector.extract_strided_slice %320 {offsets = [5, 0], sizes = [1, 32], strides = [1, 1]} : vector<16x32xf32> to vector<1x32xf32>
    %432 = vector.extract_strided_slice %320 {offsets = [6, 0], sizes = [1, 32], strides = [1, 1]} : vector<16x32xf32> to vector<1x32xf32>
    %cst_146 = arith.constant dense<0.000000e+00> : vector<16xf32>
    %433 = vector.multi_reduction <add>, %430, %cst_146 [1] : vector<16x32xf32> to vector<16xf32>
    %434 = vector.shape_cast %433 : vector<16xf32> to vector<16x1xf32>
    %cst_147 = arith.constant 3.200000e+01 : f32
    %435 = vector.broadcast %cst_147 : f32 to vector<16x1xf32>
    %436 = arith.divf %434, %435 : vector<16x1xf32>
    %437 = vector.broadcast %436 : vector<16x1xf32> to vector<16x32xf32>
    %438 = arith.subf %430, %437 : vector<16x32xf32>
    %439 = arith.mulf %438, %438 : vector<16x32xf32>
    %cst_148 = arith.constant dense<0.000000e+00> : vector<16xf32>
    %440 = vector.multi_reduction <add>, %439, %cst_148 [1] : vector<16x32xf32> to vector<16xf32>
    %441 = vector.shape_cast %440 : vector<16xf32> to vector<16x1xf32>
    %cst_149 = arith.constant 3.200000e+01 : f32
    %442 = vector.broadcast %cst_149 : f32 to vector<16x1xf32>
    %443 = arith.divf %441, %442 : vector<16x1xf32>
    %444 = vector.broadcast %436 : vector<16x1xf32> to vector<16x32xf32>
    %445 = arith.subf %430, %444 : vector<16x32xf32>
    %cst_150 = arith.constant 9.99999974E-6 : f32
    %446 = vector.broadcast %cst_150 : f32 to vector<16x1xf32>
    %447 = arith.addf %443, %446 : vector<16x1xf32>
    %448 = math.rsqrt %447 : vector<16x1xf32>
    %449 = vector.broadcast %448 : vector<16x1xf32> to vector<16x32xf32>
    %450 = arith.mulf %445, %449 : vector<16x32xf32>
    %451 = vector.broadcast %431 : vector<1x32xf32> to vector<16x32xf32>
    %452 = arith.mulf %450, %451 : vector<16x32xf32>
    %453 = vector.broadcast %432 : vector<1x32xf32> to vector<16x32xf32>
    %454 = arith.addf %452, %453 : vector<16x32xf32>
    %455 = arith.addf %454, %1 : vector<16x32xf32>
    %c1_151 = arith.constant 1 : index
    %c2_152 = arith.constant 2 : index
    %c0_153 = arith.constant 0 : index
    %c0_154 = arith.constant 0 : index
    %456 = vector.load %arg5[%c1_151, %c2_152, %c0_153, %c0_154] : memref<2x4x32x32xf32, #tpu.memory_space<vmem>>, vector<1x1x32x32xf32>
    %457 = vector.shape_cast %456 : vector<1x1x32x32xf32> to vector<32x32xf32>
    %cst_155 = arith.constant dense<0.000000e+00> : vector<16x32xf32>
    %458 = tpu.matmul %455, %457, %cst_155 {dimension_numbers = #tpu.dot_dimension_numbers<[1], [0], [0], [1], [0, 0, 1, 1], [], []>} : vector<16x32xf32>, vector<32x32xf32>, vector<16x32xf32> -> vector<16x32xf32>
    %459 = vector.extract_strided_slice %320 {offsets = [2, 0], sizes = [1, 32], strides = [1, 1]} : vector<16x32xf32> to vector<1x32xf32>
    %460 = vector.broadcast %459 : vector<1x32xf32> to vector<16x32xf32>
    %461 = arith.addf %458, %460 : vector<16x32xf32>
    %c1_156 = arith.constant 1 : index
    %c1_157 = arith.constant 1 : index
    %c0_158 = arith.constant 0 : index
    %c0_159 = arith.constant 0 : index
    %462 = vector.load %arg4[%c1_156, %c1_157, %c0_158, %c0_159] : memref<2x3x32x64xf32, #tpu.memory_space<vmem>>, vector<1x1x32x64xf32>
    %463 = vector.shape_cast %462 : vector<1x1x32x64xf32> to vector<32x64xf32>
    %cst_160 = arith.constant dense<0.000000e+00> : vector<32x64xf32>
    %464 = tpu.matmul %2, %463, %cst_160 {dimension_numbers = #tpu.dot_dimension_numbers<[1], [0], [0], [1], [0, 0, 1, 1], [], []>} : vector<32x32xf32>, vector<32x64xf32>, vector<32x64xf32> -> vector<32x64xf32>
    %465 = vector.extract_strided_slice %318 {offsets = [1, 0], sizes = [1, 64], strides = [1, 1]} : vector<8x64xf32> to vector<1x64xf32>
    %466 = vector.broadcast %465 : vector<1x64xf32> to vector<32x64xf32>
    %467 = arith.addf %464, %466 : vector<32x64xf32>
    %468 = vector.extract_strided_slice %467 {offsets = [0, 0], sizes = [32, 32], strides = [1, 1]} : vector<32x64xf32> to vector<32x32xf32>
    %469 = vector.extract_strided_slice %467 {offsets = [0, 32], sizes = [32, 32], strides = [1, 1]} : vector<32x64xf32> to vector<32x32xf32>
    %c1_161 = arith.constant 1 : index
    %c3_162 = arith.constant 3 : index
    %c0_163 = arith.constant 0 : index
    %c0_164 = arith.constant 0 : index
    %470 = vector.load %arg5[%c1_161, %c3_162, %c0_163, %c0_164] : memref<2x4x32x32xf32, #tpu.memory_space<vmem>>, vector<1x1x32x32xf32>
    %471 = vector.shape_cast %470 : vector<1x1x32x32xf32> to vector<32x32xf32>
    %472 = vector.extract_strided_slice %320 {offsets = [3, 0], sizes = [1, 32], strides = [1, 1]} : vector<16x32xf32> to vector<1x32xf32>
    %cst_165 = arith.constant 0.353553385 : f32
    %473 = vector.broadcast %cst_165 : f32 to vector<16x32xf32>
    %474 = arith.mulf %461, %473 : vector<16x32xf32>
    %475 = vector.extract_strided_slice %474 {offsets = [0, 0], sizes = [16, 8], strides = [1, 1]} : vector<16x32xf32> to vector<16x8xf32>
    %476 = vector.shape_cast %475 : vector<16x8xf32> to vector<2x8x8xf32>
    %477 = vector.extract_strided_slice %468 {offsets = [0, 0], sizes = [32, 8], strides = [1, 1]} : vector<32x32xf32> to vector<32x8xf32>
    %478 = vector.shape_cast %477 : vector<32x8xf32> to vector<2x16x8xf32>
    %479 = vector.extract_strided_slice %469 {offsets = [0, 0], sizes = [32, 8], strides = [1, 1]} : vector<32x32xf32> to vector<32x8xf32>
    %480 = vector.shape_cast %479 : vector<32x8xf32> to vector<2x16x8xf32>
    "tpu.trace_start"() <{level = 10 : i32, message = "bqd,bkd->bqk"}> : () -> ()
    %cst_166 = arith.constant dense<0.000000e+00> : vector<2x8x16xf32>
    %481 = tpu.matmul %476, %478, %cst_166 {dimension_numbers = #tpu.dot_dimension_numbers<[2], [2], [1], [1], [0, 0, 0, 1, 1, 1], [0], [0]>} : vector<2x8x8xf32>, vector<2x16x8xf32>, vector<2x8x16xf32> -> vector<2x8x16xf32>
    "tpu.trace_stop"() : () -> ()
    %cst_167 = arith.constant dense<0xFF800000> : vector<2x8xf32>
    %482 = vector.multi_reduction <maximumf>, %481, %cst_167 [2] : vector<2x8x16xf32> to vector<2x8xf32>
    %483 = vector.shape_cast %482 : vector<2x8xf32> to vector<2x8x1xf32>
    %484 = vector.broadcast %483 : vector<2x8x1xf32> to vector<2x8x16xf32>
    %485 = arith.subf %481, %484 : vector<2x8x16xf32>
    %486 = math.exp %485 : vector<2x8x16xf32>
    %cst_168 = arith.constant dense<0.000000e+00> : vector<2x8xf32>
    %487 = vector.multi_reduction <add>, %486, %cst_168 [2] : vector<2x8x16xf32> to vector<2x8xf32>
    %488 = vector.shape_cast %487 : vector<2x8xf32> to vector<2x8x1xf32>
    %489 = tpu.reciprocal %488 {approx = true} : vector<2x8x1xf32> -> vector<2x8x1xf32>
    %490 = vector.broadcast %489 : vector<2x8x1xf32> to vector<2x8x16xf32>
    %491 = arith.mulf %486, %490 : vector<2x8x16xf32>
    "tpu.trace_start"() <{level = 10 : i32, message = "bqk,bkd->bqd"}> : () -> ()
    %cst_169 = arith.constant dense<0.000000e+00> : vector<2x8x8xf32>
    %492 = tpu.matmul %491, %480, %cst_169 {dimension_numbers = #tpu.dot_dimension_numbers<[2], [1], [1], [2], [0, 0, 0, 1, 1, 2], [0], [0]>} : vector<2x8x16xf32>, vector<2x16x8xf32>, vector<2x8x8xf32> -> vector<2x8x8xf32>
    "tpu.trace_stop"() : () -> ()
    %493 = vector.shape_cast %492 : vector<2x8x8xf32> to vector<16x8xf32>
    %494 = vector.extract_strided_slice %471 {offsets = [0, 0], sizes = [8, 32], strides = [1, 1]} : vector<32x32xf32> to vector<8x32xf32>
    %cst_170 = arith.constant dense<0.000000e+00> : vector<16x32xf32>
    %495 = tpu.matmul %493, %494, %cst_170 {dimension_numbers = #tpu.dot_dimension_numbers<[1], [0], [0], [1], [0, 0, 1, 1], [], []>} : vector<16x8xf32>, vector<8x32xf32>, vector<16x32xf32> -> vector<16x32xf32>
    %496 = vector.broadcast %472 : vector<1x32xf32> to vector<16x32xf32>
    %497 = arith.addf %496, %495 : vector<16x32xf32>
    %498 = vector.extract_strided_slice %474 {offsets = [0, 8], sizes = [16, 8], strides = [1, 1]} : vector<16x32xf32> to vector<16x8xf32>
    %499 = vector.shape_cast %498 : vector<16x8xf32> to vector<2x8x8xf32>
    %500 = vector.extract_strided_slice %468 {offsets = [0, 8], sizes = [32, 8], strides = [1, 1]} : vector<32x32xf32> to vector<32x8xf32>
    %501 = vector.shape_cast %500 : vector<32x8xf32> to vector<2x16x8xf32>
    %502 = vector.extract_strided_slice %469 {offsets = [0, 8], sizes = [32, 8], strides = [1, 1]} : vector<32x32xf32> to vector<32x8xf32>
    %503 = vector.shape_cast %502 : vector<32x8xf32> to vector<2x16x8xf32>
    "tpu.trace_start"() <{level = 10 : i32, message = "bqd,bkd->bqk"}> : () -> ()
    %cst_171 = arith.constant dense<0.000000e+00> : vector<2x8x16xf32>
    %504 = tpu.matmul %499, %501, %cst_171 {dimension_numbers = #tpu.dot_dimension_numbers<[2], [2], [1], [1], [0, 0, 0, 1, 1, 1], [0], [0]>} : vector<2x8x8xf32>, vector<2x16x8xf32>, vector<2x8x16xf32> -> vector<2x8x16xf32>
    "tpu.trace_stop"() : () -> ()
    %cst_172 = arith.constant dense<0xFF800000> : vector<2x8xf32>
    %505 = vector.multi_reduction <maximumf>, %504, %cst_172 [2] : vector<2x8x16xf32> to vector<2x8xf32>
    %506 = vector.shape_cast %505 : vector<2x8xf32> to vector<2x8x1xf32>
    %507 = vector.broadcast %506 : vector<2x8x1xf32> to vector<2x8x16xf32>
    %508 = arith.subf %504, %507 : vector<2x8x16xf32>
    %509 = math.exp %508 : vector<2x8x16xf32>
    %cst_173 = arith.constant dense<0.000000e+00> : vector<2x8xf32>
    %510 = vector.multi_reduction <add>, %509, %cst_173 [2] : vector<2x8x16xf32> to vector<2x8xf32>
    %511 = vector.shape_cast %510 : vector<2x8xf32> to vector<2x8x1xf32>
    %512 = tpu.reciprocal %511 {approx = true} : vector<2x8x1xf32> -> vector<2x8x1xf32>
    %513 = vector.broadcast %512 : vector<2x8x1xf32> to vector<2x8x16xf32>
    %514 = arith.mulf %509, %513 : vector<2x8x16xf32>
    "tpu.trace_start"() <{level = 10 : i32, message = "bqk,bkd->bqd"}> : () -> ()
    %cst_174 = arith.constant dense<0.000000e+00> : vector<2x8x8xf32>
    %515 = tpu.matmul %514, %503, %cst_174 {dimension_numbers = #tpu.dot_dimension_numbers<[2], [1], [1], [2], [0, 0, 0, 1, 1, 2], [0], [0]>} : vector<2x8x16xf32>, vector<2x16x8xf32>, vector<2x8x8xf32> -> vector<2x8x8xf32>
    "tpu.trace_stop"() : () -> ()
    %516 = vector.shape_cast %515 : vector<2x8x8xf32> to vector<16x8xf32>
    %517 = vector.extract_strided_slice %471 {offsets = [8, 0], sizes = [8, 32], strides = [1, 1]} : vector<32x32xf32> to vector<8x32xf32>
    %cst_175 = arith.constant dense<0.000000e+00> : vector<16x32xf32>
    %518 = tpu.matmul %516, %517, %cst_175 {dimension_numbers = #tpu.dot_dimension_numbers<[1], [0], [0], [1], [0, 0, 1, 1], [], []>} : vector<16x8xf32>, vector<8x32xf32>, vector<16x32xf32> -> vector<16x32xf32>
    %519 = arith.addf %497, %518 : vector<16x32xf32>
    %520 = vector.extract_strided_slice %474 {offsets = [0, 16], sizes = [16, 8], strides = [1, 1]} : vector<16x32xf32> to vector<16x8xf32>
    %521 = vector.shape_cast %520 : vector<16x8xf32> to vector<2x8x8xf32>
    %522 = vector.extract_strided_slice %468 {offsets = [0, 16], sizes = [32, 8], strides = [1, 1]} : vector<32x32xf32> to vector<32x8xf32>
    %523 = vector.shape_cast %522 : vector<32x8xf32> to vector<2x16x8xf32>
    %524 = vector.extract_strided_slice %469 {offsets = [0, 16], sizes = [32, 8], strides = [1, 1]} : vector<32x32xf32> to vector<32x8xf32>
    %525 = vector.shape_cast %524 : vector<32x8xf32> to vector<2x16x8xf32>
    "tpu.trace_start"() <{level = 10 : i32, message = "bqd,bkd->bqk"}> : () -> ()
    %cst_176 = arith.constant dense<0.000000e+00> : vector<2x8x16xf32>
    %526 = tpu.matmul %521, %523, %cst_176 {dimension_numbers = #tpu.dot_dimension_numbers<[2], [2], [1], [1], [0, 0, 0, 1, 1, 1], [0], [0]>} : vector<2x8x8xf32>, vector<2x16x8xf32>, vector<2x8x16xf32> -> vector<2x8x16xf32>
    "tpu.trace_stop"() : () -> ()
    %cst_177 = arith.constant dense<0xFF800000> : vector<2x8xf32>
    %527 = vector.multi_reduction <maximumf>, %526, %cst_177 [2] : vector<2x8x16xf32> to vector<2x8xf32>
    %528 = vector.shape_cast %527 : vector<2x8xf32> to vector<2x8x1xf32>
    %529 = vector.broadcast %528 : vector<2x8x1xf32> to vector<2x8x16xf32>
    %530 = arith.subf %526, %529 : vector<2x8x16xf32>
    %531 = math.exp %530 : vector<2x8x16xf32>
    %cst_178 = arith.constant dense<0.000000e+00> : vector<2x8xf32>
    %532 = vector.multi_reduction <add>, %531, %cst_178 [2] : vector<2x8x16xf32> to vector<2x8xf32>
    %533 = vector.shape_cast %532 : vector<2x8xf32> to vector<2x8x1xf32>
    %534 = tpu.reciprocal %533 {approx = true} : vector<2x8x1xf32> -> vector<2x8x1xf32>
    %535 = vector.broadcast %534 : vector<2x8x1xf32> to vector<2x8x16xf32>
    %536 = arith.mulf %531, %535 : vector<2x8x16xf32>
    "tpu.trace_start"() <{level = 10 : i32, message = "bqk,bkd->bqd"}> : () -> ()
    %cst_179 = arith.constant dense<0.000000e+00> : vector<2x8x8xf32>
    %537 = tpu.matmul %536, %525, %cst_179 {dimension_numbers = #tpu.dot_dimension_numbers<[2], [1], [1], [2], [0, 0, 0, 1, 1, 2], [0], [0]>} : vector<2x8x16xf32>, vector<2x16x8xf32>, vector<2x8x8xf32> -> vector<2x8x8xf32>
    "tpu.trace_stop"() : () -> ()
    %538 = vector.shape_cast %537 : vector<2x8x8xf32> to vector<16x8xf32>
    %539 = vector.extract_strided_slice %471 {offsets = [16, 0], sizes = [8, 32], strides = [1, 1]} : vector<32x32xf32> to vector<8x32xf32>
    %cst_180 = arith.constant dense<0.000000e+00> : vector<16x32xf32>
    %540 = tpu.matmul %538, %539, %cst_180 {dimension_numbers = #tpu.dot_dimension_numbers<[1], [0], [0], [1], [0, 0, 1, 1], [], []>} : vector<16x8xf32>, vector<8x32xf32>, vector<16x32xf32> -> vector<16x32xf32>
    %541 = arith.addf %519, %540 : vector<16x32xf32>
    %542 = vector.extract_strided_slice %474 {offsets = [0, 24], sizes = [16, 8], strides = [1, 1]} : vector<16x32xf32> to vector<16x8xf32>
    %543 = vector.shape_cast %542 : vector<16x8xf32> to vector<2x8x8xf32>
    %544 = vector.extract_strided_slice %468 {offsets = [0, 24], sizes = [32, 8], strides = [1, 1]} : vector<32x32xf32> to vector<32x8xf32>
    %545 = vector.shape_cast %544 : vector<32x8xf32> to vector<2x16x8xf32>
    %546 = vector.extract_strided_slice %469 {offsets = [0, 24], sizes = [32, 8], strides = [1, 1]} : vector<32x32xf32> to vector<32x8xf32>
    %547 = vector.shape_cast %546 : vector<32x8xf32> to vector<2x16x8xf32>
    "tpu.trace_start"() <{level = 10 : i32, message = "bqd,bkd->bqk"}> : () -> ()
    %cst_181 = arith.constant dense<0.000000e+00> : vector<2x8x16xf32>
    %548 = tpu.matmul %543, %545, %cst_181 {dimension_numbers = #tpu.dot_dimension_numbers<[2], [2], [1], [1], [0, 0, 0, 1, 1, 1], [0], [0]>} : vector<2x8x8xf32>, vector<2x16x8xf32>, vector<2x8x16xf32> -> vector<2x8x16xf32>
    "tpu.trace_stop"() : () -> ()
    %cst_182 = arith.constant dense<0xFF800000> : vector<2x8xf32>
    %549 = vector.multi_reduction <maximumf>, %548, %cst_182 [2] : vector<2x8x16xf32> to vector<2x8xf32>
    %550 = vector.shape_cast %549 : vector<2x8xf32> to vector<2x8x1xf32>
    %551 = vector.broadcast %550 : vector<2x8x1xf32> to vector<2x8x16xf32>
    %552 = arith.subf %548, %551 : vector<2x8x16xf32>
    %553 = math.exp %552 : vector<2x8x16xf32>
    %cst_183 = arith.constant dense<0.000000e+00> : vector<2x8xf32>
    %554 = vector.multi_reduction <add>, %553, %cst_183 [2] : vector<2x8x16xf32> to vector<2x8xf32>
    %555 = vector.shape_cast %554 : vector<2x8xf32> to vector<2x8x1xf32>
    %556 = tpu.reciprocal %555 {approx = true} : vector<2x8x1xf32> -> vector<2x8x1xf32>
    %557 = vector.broadcast %556 : vector<2x8x1xf32> to vector<2x8x16xf32>
    %558 = arith.mulf %553, %557 : vector<2x8x16xf32>
    "tpu.trace_start"() <{level = 10 : i32, message = "bqk,bkd->bqd"}> : () -> ()
    %cst_184 = arith.constant dense<0.000000e+00> : vector<2x8x8xf32>
    %559 = tpu.matmul %558, %547, %cst_184 {dimension_numbers = #tpu.dot_dimension_numbers<[2], [1], [1], [2], [0, 0, 0, 1, 1, 2], [0], [0]>} : vector<2x8x16xf32>, vector<2x16x8xf32>, vector<2x8x8xf32> -> vector<2x8x8xf32>
    "tpu.trace_stop"() : () -> ()
    %560 = vector.shape_cast %559 : vector<2x8x8xf32> to vector<16x8xf32>
    %561 = vector.extract_strided_slice %471 {offsets = [24, 0], sizes = [8, 32], strides = [1, 1]} : vector<32x32xf32> to vector<8x32xf32>
    %cst_185 = arith.constant dense<0.000000e+00> : vector<16x32xf32>
    %562 = tpu.matmul %560, %561, %cst_185 {dimension_numbers = #tpu.dot_dimension_numbers<[1], [0], [0], [1], [0, 0, 1, 1], [], []>} : vector<16x8xf32>, vector<8x32xf32>, vector<16x32xf32> -> vector<16x32xf32>
    %563 = arith.addf %541, %562 : vector<16x32xf32>
    %564 = arith.addf %454, %563 : vector<16x32xf32>
    %565 = vector.extract_strided_slice %320 {offsets = [7, 0], sizes = [1, 32], strides = [1, 1]} : vector<16x32xf32> to vector<1x32xf32>
    %566 = vector.extract_strided_slice %320 {offsets = [8, 0], sizes = [1, 32], strides = [1, 1]} : vector<16x32xf32> to vector<1x32xf32>
    %cst_186 = arith.constant dense<0.000000e+00> : vector<16xf32>
    %567 = vector.multi_reduction <add>, %564, %cst_186 [1] : vector<16x32xf32> to vector<16xf32>
    %568 = vector.shape_cast %567 : vector<16xf32> to vector<16x1xf32>
    %cst_187 = arith.constant 3.200000e+01 : f32
    %569 = vector.broadcast %cst_187 : f32 to vector<16x1xf32>
    %570 = arith.divf %568, %569 : vector<16x1xf32>
    %571 = vector.broadcast %570 : vector<16x1xf32> to vector<16x32xf32>
    %572 = arith.subf %564, %571 : vector<16x32xf32>
    %573 = arith.mulf %572, %572 : vector<16x32xf32>
    %cst_188 = arith.constant dense<0.000000e+00> : vector<16xf32>
    %574 = vector.multi_reduction <add>, %573, %cst_188 [1] : vector<16x32xf32> to vector<16xf32>
    %575 = vector.shape_cast %574 : vector<16xf32> to vector<16x1xf32>
    %cst_189 = arith.constant 3.200000e+01 : f32
    %576 = vector.broadcast %cst_189 : f32 to vector<16x1xf32>
    %577 = arith.divf %575, %576 : vector<16x1xf32>
    %578 = vector.broadcast %570 : vector<16x1xf32> to vector<16x32xf32>
    %579 = arith.subf %564, %578 : vector<16x32xf32>
    %cst_190 = arith.constant 9.99999974E-6 : f32
    %580 = vector.broadcast %cst_190 : f32 to vector<16x1xf32>
    %581 = arith.addf %577, %580 : vector<16x1xf32>
    %582 = math.rsqrt %581 : vector<16x1xf32>
    %583 = vector.broadcast %582 : vector<16x1xf32> to vector<16x32xf32>
    %584 = arith.mulf %579, %583 : vector<16x32xf32>
    %585 = vector.broadcast %565 : vector<1x32xf32> to vector<16x32xf32>
    %586 = arith.mulf %584, %585 : vector<16x32xf32>
    %587 = vector.broadcast %566 : vector<1x32xf32> to vector<16x32xf32>
    %588 = arith.addf %586, %587 : vector<16x32xf32>
    %c1_191 = arith.constant 1 : index
    %c2_192 = arith.constant 2 : index
    %c0_193 = arith.constant 0 : index
    %c0_194 = arith.constant 0 : index
    %589 = vector.load %arg4[%c1_191, %c2_192, %c0_193, %c0_194] : memref<2x3x32x64xf32, #tpu.memory_space<vmem>>, vector<1x1x32x64xf32>
    %590 = vector.shape_cast %589 : vector<1x1x32x64xf32> to vector<32x64xf32>
    %cst_195 = arith.constant dense<0.000000e+00> : vector<16x64xf32>
    %591 = tpu.matmul %588, %590, %cst_195 {dimension_numbers = #tpu.dot_dimension_numbers<[1], [0], [0], [1], [0, 0, 1, 1], [], []>} : vector<16x32xf32>, vector<32x64xf32>, vector<16x64xf32> -> vector<16x64xf32>
    %592 = vector.extract_strided_slice %318 {offsets = [2, 0], sizes = [1, 64], strides = [1, 1]} : vector<8x64xf32> to vector<1x64xf32>
    %593 = vector.broadcast %592 : vector<1x64xf32> to vector<16x64xf32>
    %594 = arith.addf %591, %593 : vector<16x64xf32>
    %cst_196 = arith.constant 0.000000e+00 : f32
    %595 = vector.broadcast %cst_196 : f32 to vector<16x64xf32>
    %596 = arith.maximumf %594, %595 : vector<16x64xf32>
    %c1_197 = arith.constant 1 : index
    %c0_198 = arith.constant 0 : index
    %c0_199 = arith.constant 0 : index
    %597 = vector.load %arg6[%c1_197, %c0_198, %c0_199] : memref<2x64x32xf32, #tpu.memory_space<vmem>>, vector<1x64x32xf32>
    %598 = vector.shape_cast %597 : vector<1x64x32xf32> to vector<64x32xf32>
    %cst_200 = arith.constant dense<0.000000e+00> : vector<16x32xf32>
    %599 = tpu.matmul %596, %598, %cst_200 {dimension_numbers = #tpu.dot_dimension_numbers<[1], [0], [0], [1], [0, 0, 1, 1], [], []>} : vector<16x64xf32>, vector<64x32xf32>, vector<16x32xf32> -> vector<16x32xf32>
    %600 = vector.extract_strided_slice %320 {offsets = [4, 0], sizes = [1, 32], strides = [1, 1]} : vector<16x32xf32> to vector<1x32xf32>
    %601 = vector.broadcast %600 : vector<1x32xf32> to vector<16x32xf32>
    %602 = arith.addf %599, %601 : vector<16x32xf32>
    %603 = arith.addf %588, %602 : vector<16x32xf32>
    %604 = vector.extract_strided_slice %320 {offsets = [9, 0], sizes = [1, 32], strides = [1, 1]} : vector<16x32xf32> to vector<1x32xf32>
    %605 = vector.extract_strided_slice %320 {offsets = [10, 0], sizes = [1, 32], strides = [1, 1]} : vector<16x32xf32> to vector<1x32xf32>
    %cst_201 = arith.constant dense<0.000000e+00> : vector<16xf32>
    %606 = vector.multi_reduction <add>, %603, %cst_201 [1] : vector<16x32xf32> to vector<16xf32>
    %607 = vector.shape_cast %606 : vector<16xf32> to vector<16x1xf32>
    %cst_202 = arith.constant 3.200000e+01 : f32
    %608 = vector.broadcast %cst_202 : f32 to vector<16x1xf32>
    %609 = arith.divf %607, %608 : vector<16x1xf32>
    %610 = vector.broadcast %609 : vector<16x1xf32> to vector<16x32xf32>
    %611 = arith.subf %603, %610 : vector<16x32xf32>
    %612 = arith.mulf %611, %611 : vector<16x32xf32>
    %cst_203 = arith.constant dense<0.000000e+00> : vector<16xf32>
    %613 = vector.multi_reduction <add>, %612, %cst_203 [1] : vector<16x32xf32> to vector<16xf32>
    %614 = vector.shape_cast %613 : vector<16xf32> to vector<16x1xf32>
    %cst_204 = arith.constant 3.200000e+01 : f32
    %615 = vector.broadcast %cst_204 : f32 to vector<16x1xf32>
    %616 = arith.divf %614, %615 : vector<16x1xf32>
    %617 = vector.broadcast %609 : vector<16x1xf32> to vector<16x32xf32>
    %618 = arith.subf %603, %617 : vector<16x32xf32>
    %cst_205 = arith.constant 9.99999974E-6 : f32
    %619 = vector.broadcast %cst_205 : f32 to vector<16x1xf32>
    %620 = arith.addf %616, %619 : vector<16x1xf32>
    %621 = math.rsqrt %620 : vector<16x1xf32>
    %622 = vector.broadcast %621 : vector<16x1xf32> to vector<16x32xf32>
    %623 = arith.mulf %618, %622 : vector<16x32xf32>
    %624 = vector.broadcast %604 : vector<1x32xf32> to vector<16x32xf32>
    %625 = arith.mulf %623, %624 : vector<16x32xf32>
    %626 = vector.broadcast %605 : vector<1x32xf32> to vector<16x32xf32>
    %627 = arith.addf %625, %626 : vector<16x32xf32>
    %c1_206 = arith.constant 1 : index
    %c0_207 = arith.constant 0 : index
    %c0_208 = arith.constant 0 : index
    %628 = vector.load %arg9[%c1_206, %c0_207, %c0_208] : memref<2x16x32xf32, #tpu.memory_space<vmem>>, vector<1x16x32xf32>
    %629 = vector.shape_cast %628 : vector<1x16x32xf32> to vector<16x32xf32>
    %630 = vector.shape_cast %627 : vector<16x32xf32> to vector<1x16x32xf32>
    tpu.vector_store %arg9[%c1_206, %c0_207, %c0_208], %630 {strides = array<i32>} : memref<2x16x32xf32, #tpu.memory_space<vmem>>, vector<1x16x32xf32>,
    return
  }
  func.func @transform_0(%arg0: i32) -> (i32, i32) {
    %c0_i32 = arith.constant 0 : i32
    %c0_i32_0 = arith.constant 0 : i32
    %c0_i32_1 = arith.constant 0 : i32
    return %c0_i32, %c0_i32_0 : i32, i32
  }
  func.func @transform_1(%arg0: i32) -> (i32, i32) {
    %c0_i32 = arith.constant 0 : i32
    %c0_i32_0 = arith.constant 0 : i32
    %c0_i32_1 = arith.constant 0 : i32
    return %c0_i32, %c0_i32_0 : i32, i32
  }
  func.func @transform_2(%arg0: i32) -> (i32, i32) {
    %c0_i32 = arith.constant 0 : i32
    %c0_i32_0 = arith.constant 0 : i32
    %c0_i32_1 = arith.constant 0 : i32
    return %c0_i32, %c0_i32_0 : i32, i32
  }
  func.func @transform_3(%arg0: i32) -> (i32, i32, i32, i32) {
    %c0_i32 = arith.constant 0 : i32
    %c0_i32_0 = arith.constant 0 : i32
    %c0_i32_1 = arith.constant 0 : i32
    %c0_i32_2 = arith.constant 0 : i32
    %c0_i32_3 = arith.constant 0 : i32
    return %c0_i32, %c0_i32_0, %c0_i32_1, %c0_i32_2 : i32, i32, i32, i32
  }
  func.func @transform_4(%arg0: i32) -> (i32, i32, i32, i32) {
    %c0_i32 = arith.constant 0 : i32
    %c0_i32_0 = arith.constant 0 : i32
    %c0_i32_1 = arith.constant 0 : i32
    %c0_i32_2 = arith.constant 0 : i32
    %c0_i32_3 = arith.constant 0 : i32
    return %c0_i32, %c0_i32_0, %c0_i32_1, %c0_i32_2 : i32, i32, i32, i32
  }
  func.func @transform_5(%arg0: i32) -> (i32, i32, i32) {
    %c0_i32 = arith.constant 0 : i32
    %c0_i32_0 = arith.constant 0 : i32
    %c0_i32_1 = arith.constant 0 : i32
    %c0_i32_2 = arith.constant 0 : i32
    return %c0_i32, %c0_i32_0, %c0_i32_1 : i32, i32, i32
  }
  func.func @transform_6(%arg0: i32) -> (i32, i32, i32) {
    %c0_i32 = arith.constant 0 : i32
    %c0_i32_0 = arith.constant 0 : i32
    %c0_i32_1 = arith.constant 0 : i32
    %c0_i32_2 = arith.constant 0 : i32
    return %c0_i32, %c0_i32_0, %c0_i32_1 : i32, i32, i32
  }
  func.func @transform_7(%arg0: i32) -> (i32, i32, i32) {
    %c0_i32 = arith.constant 0 : i32
    %c0_i32_0 = arith.constant 0 : i32
    %c0_i32_1 = arith.constant 0 : i32
    %c0_i32_2 = arith.constant 0 : i32
    return %c0_i32, %c0_i32_0, %c0_i32_1 : i32, i32, i32
  }
  func.func @transform_8(%arg0: i32) -> (i32, i32, i32) {
    %c0_i32 = arith.constant 0 : i32
    %c0_i32_0 = arith.constant 0 : i32
    %c0_i32_1 = arith.constant 0 : i32
    %c0_i32_2 = arith.constant 0 : i32
    return %c0_i32, %c0_i32_0, %c0_i32_1 : i32, i32, i32
  }
}

</mosaic_0001>

<bundles_post_ra>
// kernel: tpu_custom_call.1
= control target key start
LH: loop header
LB: loop body
LE: loop exit
PB: predicated region body
PF: predicated region fallthrough
CT: control target
= control target key end

     0   :  { %13 = vsyncpa [#allocation3], 0  ;;  %s11193_s0 = inlined_call_operand.hbm [shape: f32[16,32], index: 0, kind: input, shape index: {}]   ;;  %s11194_s1 = inlined_call_operand.hbm [shape: f32[16,32], index: 1, kind: input, shape index: {}]   ;;  %s11195_s2 = inlined_call_operand.hbm [shape: f32[32,32], index: 2, kind: input, shape index: {}]   ;;  %s11196_s3 = inlined_call_operand.vmem [shape: f32[2,3,32,64], index: 3, kind: input, shape index: {}]   ;;  %s11197_s4 = inlined_call_operand.hbm [shape: f32[2,4,32,32], index: 4, kind: input, shape index: {}]   ;;  %s11198_s5 = inlined_call_operand.vmem [shape: f32[2,64,32], index: 5, kind: input, shape index: {}]   ;;  %s11199_s6 = inlined_call_operand.vmem [shape: f32[2,8,64], index: 6, kind: input, shape index: {}]   ;;  %s11200_s7 = inlined_call_operand.hbm [shape: f32[2,16,32], index: 7, kind: input, shape index: {}]   ;;  %s11201_s8 = inlined_call_operand.hbm [shape: f32[2,16,32], index: 8, kind: output, shape index: {}]  }
   0x1   :  { %14 = vsyncpa [#allocation6], 0 }
   0x2   :  { %15 = vsyncpa [#allocation9], 0 }
   0x3   :  { %16 = vsyncpa [#allocation4], 0  ;;  %s10071_s27 = smov [#allocation5]   ;;  %s10072_s29 = smov [#allocation8]  }
   0x4   :  { %s34_s28 = sshll.u32 %s10071_s27, 4  ;;  %s60_s30 = sshll.u32 %s10072_s29, 4  ;;  %s35_s28 = int_to_ptr.vmem [resolvable:$true] %s34_s28  ;;  %s10134_s30 = int_to_ptr.vmem [resolvable:$true] %s60_s30 }
   0x5   :  { %s9931_s11 = scalar_lea.hbm %s11194_s1, 256 }
   0x6   :  { %p9932_p0 = scmp.ne.s32.totalorder %s11194_s1, %s9931_s11  ;;  %p9935_p1 = scmp.lt.u32.totalorder %s9931_s11, %s11194_s1 }
   0x8   :  { %p9937_p2 = pnand %p9935_p1, %p9932_p0 }
   0xa   :  { %9940 = shalt.err (!%p9937_p2)
}
   0xb   :  { %s9941_s16 = scalar_lea.vmem %s35_s28, 256  ;;  %p9946_p4 = scmp.lt.s32.totalorder %s35_s28, %s35_s28 }
   0xc   :  { %p9942_p3 = scmp.ne.s32.totalorder %s35_s28, %s9941_s16  ;;  %p9947_p5 = scmp.lt.s32.totalorder %s9941_s16, %s9941_s16 }
   0xe   :  { %p9948_p6 = por %p9947_p5, %p9946_p4 }
  0x10   :  { %p9949_p7 = pnand %p9948_p6, %p9942_p3 }
  0x12   :  { %9952 = shalt.err (!%p9949_p7)
}
  0x13   :  { %s10073_s17 = smov 128   ;;  %s10074_s18 = smov 8  }
  0x14   :  { %40 = dma.hbm_to_vmem [thread:$0]  %s11194_s1, 256, %s35_s28, [#allocation6], %s10073_s17, %s10073_s17, %s10074_s18  }
  0x15   :  { %s9953_s23 = scalar_lea.hbm %s11197_s4, 4096 }
  0x16   :  { %p9954_p8 = scmp.ne.s32.totalorder %s11197_s4, %s9953_s23  ;;  %p9957_p9 = scmp.lt.u32.totalorder %s9953_s23, %s11197_s4 }
  0x18   :  { %p9959_p10 = pnand %p9957_p9, %p9954_p8 }
  0x1a   :  { %9962 = shalt.err (!%p9959_p10)
}
  0x1b   :  { %s9963_s29 = scalar_lea.vmem %s10134_s30, 4096  ;;  %p9968_p12 = scmp.lt.s32.totalorder %s10134_s30, %s10134_s30 }
  0x1c   :  { %p9964_p11 = scmp.ne.s32.totalorder %s10134_s30, %s9963_s29  ;;  %p9969_p13 = scmp.lt.s32.totalorder %s9963_s29, %s9963_s29 }
  0x1e   :  { %p9970_p0 = por %p9969_p13, %p9968_p12 }
  0x20   :  { %p9971_p1 = pnand %p9970_p0, %p9964_p11 }
  0x22   :  { %9974 = shalt.err (!%p9971_p1)
}
  0x23   :  { %66 = dma.hbm_to_vmem [thread:$0]  %s11197_s4, 4096, %s10134_s30, [#allocation9], %s10073_s17, %s10073_s17, %s10074_s18  }
  0x24   :  { %s10075_s9 = smov [#allocation2]   ;;  %s10076_s11 = smov [#allocation7]  }
  0x25   :  { %s22_s10 = sshll.u32 %s10075_s9, 4  ;;  %s46_s12 = sshll.u32 %s10076_s11, 4  ;;  %s23_s10 = int_to_ptr.vmem [resolvable:$true] %s22_s10  ;;  %s10171_s12 = int_to_ptr.vmem [resolvable:$true] %s46_s12 }
  0x26   :  { %s9975_s15 = scalar_lea.hbm %s11193_s0, 256 }
  0x27   :  { %p9976_p2 = scmp.ne.s32.totalorder %s11193_s0, %s9975_s15  ;;  %p9979_p3 = scmp.lt.u32.totalorder %s9975_s15, %s11193_s0 }
  0x29   :  { %p9981_p4 = pnand %p9979_p3, %p9976_p2 }
  0x2b   :  { %9984 = shalt.err (!%p9981_p4)
}
  0x2c   :  { %s9985_s4 = scalar_lea.vmem %s23_s10, 256  ;;  %p9990_p6 = scmp.lt.s32.totalorder %s23_s10, %s23_s10 }
  0x2d   :  { %p9986_p5 = scmp.ne.s32.totalorder %s23_s10, %s9985_s4  ;;  %p9991_p7 = scmp.lt.s32.totalorder %s9985_s4, %s9985_s4 }
  0x2f   :  { %p9992_p8 = por %p9991_p7, %p9990_p6 }
  0x31   :  { %p9993_p9 = pnand %p9992_p8, %p9986_p5 }
  0x33   :  { %9996 = shalt.err (!%p9993_p9)
}
  0x34   :  { %28 = dma.hbm_to_vmem [thread:$0]  %s11193_s0, 256, %s23_s10, [#allocation3], %s10073_s17, %s10073_s17, %s10074_s18  }
  0x35   :  { %s9997_s25 = scalar_lea.hbm %s11195_s2, 512 }
  0x36   :  { %p9998_p10 = scmp.ne.s32.totalorder %s11195_s2, %s9997_s25  ;;  %p10001_p11 = scmp.lt.u32.totalorder %s9997_s25, %s11195_s2 }
  0x38   :  { %p10003_p12 = pnand %p10001_p11, %p9998_p10 }
  0x3a   :  { %10006 = shalt.err (!%p10003_p12)
}
  0x3b   :  { %s10007_s28 = scalar_lea.vmem %s10171_s12, 512  ;;  %p10012_p0 = scmp.lt.s32.totalorder %s10171_s12, %s10171_s12 }
  0x3c   :  { %p10008_p13 = scmp.ne.s32.totalorder %s10171_s12, %s10007_s28  ;;  %p10013_p1 = scmp.lt.s32.totalorder %s10007_s28, %s10007_s28 }
  0x3e   :  { %p10014_p2 = por %p10013_p1, %p10012_p0 }
  0x40   :  { %p10015_p3 = pnand %p10014_p2, %p10008_p13 }
  0x42   :  { %10018 = shalt.err (!%p10015_p3)
}
  0x43   :  { %52 = dma.hbm_to_vmem [thread:$0]  %s11195_s2, 512, %s10171_s12, [#allocation6], %s10073_s17, %s10073_s17, %s10074_s18  }
  0x44   :  { %s10077_s10 = smov [#allocation10]   ;;  %s10019_s15 = scalar_lea.hbm %s11200_s7, 512 }
  0x45   :  { %s76_s11 = sshll.u32 %s10077_s10, 4  ;;  %p10020_p4 = scmp.ne.s32.totalorder %s11200_s7, %s10019_s15  ;;  %s77_s11 = int_to_ptr.vmem [resolvable:$true] %s76_s11 }
  0x46   :  { %p10023_p5 = scmp.lt.u32.totalorder %s10019_s15, %s11200_s7 }
  0x48   :  { %p10025_p6 = pnand %p10023_p5, %p10020_p4 }
  0x4a   :  { %10028 = shalt.err (!%p10025_p6)
}
  0x4b   :  { %s10029_s4 = scalar_lea.vmem %s77_s11, 512  ;;  %p10034_p8 = scmp.lt.s32.totalorder %s77_s11, %s77_s11 }
  0x4c   :  { %p10030_p7 = scmp.ne.s32.totalorder %s77_s11, %s10029_s4  ;;  %p10035_p9 = scmp.lt.s32.totalorder %s10029_s4, %s10029_s4 }
  0x4e   :  { %p10036_p10 = por %p10035_p9, %p10034_p8 }
  0x50   :  { %p10037_p11 = pnand %p10036_p10, %p10030_p7 }
  0x52   :  { %10040 = shalt.err (!%p10037_p11)
}
  0x53   :  { %82 = dma.hbm_to_vmem [thread:$0]  %s11200_s7, 512, %s77_s11, [#allocation9], %s10073_s17, %s10073_s17, %s10074_s18  }
  0x54   :  { %10063 = dma.done.wait [#allocation3], 256  }
  0x55   :  { %10064 = vsyncadd [#allocation3], 4294967040 }
  0x56   :  { %10065 = dma.done.wait [#allocation6], 768  }
  0x57   :  { %10066 = vsyncadd [#allocation6], 4294966528 }
  0x58   :  { %10067 = dma.done.wait [#allocation9], 4608  }
  0x59   :  { %10068 = vsyncadd [#allocation9], 4294962688  ;;  %v111_v0 = vld [vmem:[%s11196_s3] sm:$0xff]  ;;  %v112_v1 = vld [vmem:[%s11196_s3 + $0x8] sm:$0xff]  ;;  %vm119_vm0 = vcmask 261120   ;;  %v10078_v17 = vmov 0.0   ;;  %v115_v19 = vlaneseq }
  0x5a   :  { %v113_v2 = vld [vmem:[%s11196_s3 + $0x10] sm:$0xff]  ;;  %v9355_v3 = vpack.c.bf16 %v112_v1, %v111_v0  ;;  %v114_v4 = vld [vmem:[%s11196_s3 + $0x18] sm:$0xff]  ;;  %v10235_v5 = vld [vmem:[#allocation2] sm:$0xff]  ;;  %8759 = vmatprep.subr.mxu0 %v10078_v17  ;;  %vm10079_vm1 = vmmov 0   ;;  %s10080_s28 = smov 96   ;;  %vm300_vm2 = vcmask 64512  }
  0x5b   :  { %v10237_v6 = vld [vmem:[#allocation5] sm:$0xff]  ;;  %v9359_v7 = vpack.c.bf16 %v114_v4, %v113_v2  ;;  %v10242_v9 = vld [vmem:[#allocation2 + $0x8] sm:$0xff]  ;;  %v10244_v10 = vld [vmem:[#allocation5 + $0x8] sm:$0xff]  ;;  %v10255_v20 = vshrl.u32 %v115_v19, 7  ;;  %8761 = vmatprep.mubr.msk.f32.mxu0 %vm10079_vm1, %v10078_v17  ;;  %s10081_s0 = smov 88   ;;  %s10082_s9 = smov 120  }
  0x5c   :  { %v109_v8 = vadd.f32 %v10237_v6, %v10235_v5  ;;  %9356 = vmatprep.subr.bf16.mxu1 %v9355_v3  ;;  %v110_v11 = vadd.f32 %v10244_v10, %v10242_v9  ;;  %v201_v12 = vld [vmem:[#allocation8] sm:$0xff]  ;;  %v202_v13 = vld [vmem:[#allocation8 + $0x8] sm:$0xff]  ;;  %v203_v14 = vld [vmem:[#allocation8 + $0x10] sm:$0xff]  ;;  %s10083_s10 = smov 80   ;;  %s10084_s11 = smov 112   ;;  %vm2354_vm4 = vcmask 130048  }
  0x5d   :  { %9358 = vmatpush3.bf16.msra.mxu1 %v9355_v3  ;;  %v9363_v15 = vpack.c.bf16 %v202_v13, %v201_v12  ;;  %v204_v16 = vld [vmem:[#allocation8 + $0x18] sm:$0xff]  ;;  %v10262_v21 = vsub.s32 0, %v10255_v20  ;;  %v10267_v22 = vld [vmem:[%s11199_s6] sm:$0xff]  ;;  %s10085_s13 = smov 104   ;;  %s10086_s14 = smov 72   ;;  %vm10478_vm3 = vmpackc.low %vm300_vm2, %vm300_vm2  ;;  %vm4047_vm5 = vcmask 523264  }
  0x5e   :  { %8745 = vmatprep.mubr.msk.f32.mxu1 %vm119_vm0, %v109_v8  ;;  %9360 = vmatprep.subr.bf16.mxu1 %v9359_v7  ;;  %v9367_v18 = vpack.c.bf16 %v204_v16, %v203_v14  ;;  %v10279_v30 = vld [vmem:[#allocation10] sm:$0xff] }
  0x5f   :  { %v118_v23 = vrot.slane %v10267_v22, %v10262_v21  ;;  %v208_v31 = vrot.slane %v10279_v30, %v10262_v21  ;;  %v291_v54 = vld [vmem:[#allocation8 + $0x20] sm:$0xff] }
  0x61   :  { %9362 = vmatpush3.bf16.msra.mxu1 %v9359_v7 }
  0x62   :  { %9364 = vmatprep.subr.bf16.mxu1 %v9363_v15 }
  0x64   :  { %8746 = vmatmul.mubr.msk.f32.vlgmr.msra.gmra.mrb[0].mxu1 %vm119_vm0, %v110_v11 }
  0x65   :  { %8756 = vmatprep.mubr.msk.f32.mxu1 %vm119_vm0, %v10235_v5  ;;  %9366 = vmatpush3.bf16.msra.mxu1 %v9363_v15 }
  0x66   :  { %9368 = vmatprep.subr.bf16.mxu1 %v9367_v18 }
  0x69   :  { %9370 = vmatpush3.bf16.msra.mxu1 %v9367_v18 }
  0x6a   :  { %8764 = vmatprep.subr.mxu1 %v10078_v17 }
  0x6c   :  { %8757 = vmatmul.mubr.msk.f32.vlgmr.msra.gmra.mrb[2].mxu1 %vm119_vm0, %v10242_v9 }
  0x6d   :  { %8766 = vmatprep.mubr.msk.f32.mxu1 %vm10079_vm1, %v10078_v17 }
 0x137   :  { %v8747_v24 = vpop.f32.mrb[0].mxu1 }
 0x138   :  { %v192_v25 = vpop.f32.mrb[1].mxu1  ;;  %v10275_v27 = vadd.f32 %v8747_v24, %v118_v23 }
 0x139   :  { %v10271_v26 = vadd.f32 %v192_v25, %v118_v23 }
 0x13a   :  { %v10297_v37 = vmul.f32 0.35355338, %v10275_v27 }
 0x13b   :  { %298 = vrot.lane.b32.xlu0 %v10271_v26, %s10080_s28  ;;  %v10287_v34 = vmul.f32 0.35355338, %v10271_v26 }
 0x13f   :  { %377 = vrot.lane.b32.xlu0 %v10275_v27, %s10080_s28  ;;  %v8758_v28 = vpop.f32.mrb[2].mxu1 }
 0x140   :  { %v281_v29 = vpop.f32.mrb[3].mxu1  ;;  %v10293_v36 = vadd.f32 %v8758_v28, %v208_v31 }
 0x141   :  { %v10284_v33 = vadd.f32 %v281_v29, %v208_v31 }
 0x1ad   :  { %v299_v32 = vpop.permute.xlu0 %298 }
 0x1ae   :  { %8760 = vmatpush3.xpose.msk.msra.mxu0 %vm300_vm2, %v299_v32 }
 0x1af   :  { %8769 = vmatprep.subr.mxu0 %v10078_v17 }
 0x1b1   :  { %v378_v35 = vpop.permute.xlu0 %377  ;;  %8762 = vmatmul.mubr.msk.f32.vlgmr.msra.gmra.mrb[0].mxu0 %vm300_vm2, %v10287_v34 }
 0x1b2   :  { %8765 = vmatpush3.xpose.msk.msra.mxu1 %vm300_vm2, %v378_v35  ;;  %8770 = vmatpush3.msra.mxu0 %v10284_v33 }
 0x1b3   :  { %8774 = vmatprep.subr.mxu1 %v10078_v17  ;;  %8771 = vmatprep.mubr.msk.f32.mxu0 %vm10079_vm1, %v10078_v17 }
 0x1b4   :  { %8779 = vmatprep.subr.mxu0 %v291_v54 }
 0x1b5   :  { %8767 = vmatmul.mubr.msk.f32.vlgmr.msra.gmra.mrb[4].mxu1 %vm300_vm2, %v10297_v37 }
 0x1b6   :  { %8775 = vmatpush3.msra.mxu1 %v10293_v36  ;;  %8776 = vmatprep.mubr.msk.f32.mxu1 %vm10079_vm1, %v10078_v17 }
 0x1b7   :  { %8784 = vmatprep.subr.mxu1 %v10078_v17 }
 0x284   :  { %v372_v38 = vpop.f32.mrb[0].mxu0 }
 0x285   :  { %v8763_v39 = vpop.f32.mrb[1].mxu0  ;;  %v454_v40 = vsel %vm300_vm2, %v372_v38, -inf }
 0x286   :  { %455 = vmax.xlane.f32.xlu1 %v454_v40 }
 0x288   :  { %v450_v41 = vpop.f32.mrb[4].mxu1 }
 0x289   :  { %v8768_v42 = vpop.f32.mrb[5].mxu1  ;;  %v457_v43 = vsel %vm300_vm2, %v450_v41, -inf }
 0x28a   :  { %458 = vmax.xlane.f32.xlu1 %v457_v43 }
 0x313   :  { %v456_v44 = vpop.xlane.xlu1 %455 }
 0x314   :  { %v460_v45 = vsub.f32 %v372_v38, %v456_v44 }
 0x316   :  { %v462_v46 = vmul.f32 1.442695, %v460_v45 }
 0x317   :  { %v459_v47 = vpop.xlane.xlu1 %458 }
 0x318   :  { %9769 = vpow2.f32 %v462_v46  ;;  %v461_v48 = vsub.f32 %v450_v41, %v459_v47 }
 0x31a   :  { %v464_v49 = vmul.f32 1.442695, %v461_v48 }
 0x31c   :  { %9771 = vpow2.f32 %v464_v49 }
 0x322   :  { %v9770_v50 = vpop.eup %9769 }
 0x323   :  { %v466_v51 = vsel %vm300_vm2, %v9770_v50, 0.0 }
 0x324   :  { %467 = vadd.xlane.f32.xlu0 %v466_v51 }
 0x326   :  { %v9772_v52 = vpop.eup %9771 }
 0x327   :  { %v469_v53 = vsel %vm300_vm2, %v9772_v52, 0.0 }
 0x328   :  { %470 = vadd.xlane.f32.xlu1 %v469_v53 }
 0x339   :  { %711 = vrot.lane.b32.xlu1 %v10271_v26, %s10081_s0 }
 0x33d   :  { %709 = vrot.lane.b32.xlu1 %v10287_v34, %s10082_s9 }
 0x341   :  { %789 = vrot.lane.b32.xlu1 %v10275_v27, %s10081_s0 }
 0x345   :  { %787 = vrot.lane.b32.xlu1 %v10297_v37, %s10082_s9 }
 0x3b1   :  { %v468_v55 = vpop.xlane.xlu0 %467 }
 0x3b2   :  { %9773 = vrcp.f32 %v468_v55 }
 0x3b5   :  { %v471_v56 = vpop.xlane.xlu1 %470 }
 0x3b6   :  { %9775 = vrcp.f32 %v471_v56  ;;  %v292_v56 = vld [vmem:[#allocation8 + $0x28] sm:$0xff] }
 0x3b9   :  { %v712_v60 = vpop.permute.xlu1 %711 }
 0x3bc   :  { %v9774_v57 = vpop.eup %9773 }
 0x3bd   :  { %v474_v58 = vmul.f32 %v9774_v57, %v9770_v50  ;;  %v710_v62 = vpop.permute.xlu1 %709 }
 0x3bf   :  { %8772 = vmatmul.mubr.msk.f32.vlgmr.msra.gmra.mrb[2].mxu0 %vm300_vm2, %v474_v58 }
 0x3c0   :  { %v9776_v59 = vpop.eup %9775  ;;  %8780 = vmatpush3.msra.mxu0 %v291_v54 }
 0x3c1   :  { %v475_v61 = vmul.f32 %v9776_v59, %v9772_v52  ;;  %8789 = vmatprep.subr.mxu0 %v10078_v17  ;;  %v790_v1 = vpop.permute.xlu1 %789 }
 0x3c3   :  { %8777 = vmatmul.mubr.msk.f32.vlgmr.msra.gmra.mrb[6].mxu1 %vm300_vm2, %v475_v61 }
 0x3c4   :  { %8785 = vmatpush3.xpose.msk.msra.mxu1 %vm300_vm2, %v712_v60  ;;  %8786 = vmatprep.mubr.msk.f32.mxu1 %vm10079_vm1, %v10078_v17 }
 0x3c5   :  { %8794 = vmatprep.subr.mxu1 %v10078_v17  ;;  %v788_v4 = vpop.permute.xlu1 %787 }
 0x3c7   :  { %8787 = vmatmul.mubr.msk.f32.vlgmr.msra.gmra.mrb[8].mxu1 %vm300_vm2, %v710_v62 }
 0x3c8   :  { %8796 = vmatprep.mubr.msk.f32.mxu1 %vm10079_vm1, %v10078_v17 }
 0x492   :  { %v545_v63 = vpop.f32.mrb[2].mxu0 }
 0x493   :  { %v8773_v0 = vpop.f32.mrb[3].mxu0  ;;  %8781 = vmatprep.mubr.msk.f32.mxu0 %vm300_vm2, %v545_v63 }
 0x496   :  { %v618_v2 = vpop.f32.mrb[6].mxu1 }
 0x497   :  { %v8778_v3 = vpop.f32.mrb[7].mxu1  ;;  %8782 = vmatmul.mubr.msk.f32.vlgmr.msra.gmra.mrb[4].mxu0 %vm300_vm2, %v618_v2 }
 0x498   :  { %8790 = vmatpush3.xpose.msk.msra.mxu0 %vm300_vm2, %v790_v1  ;;  %8791 = vmatprep.mubr.msk.f32.mxu0 %vm10079_vm1, %v10078_v17 }
 0x499   :  { %8799 = vmatprep.subr.mxu0 %v10078_v17 }
 0x49a   :  { %v783_v7 = vpop.f32.mrb[8].mxu1 }
 0x49b   :  { %v8788_v8 = vpop.f32.mrb[9].mxu1  ;;  %8792 = vmatmul.mubr.msk.f32.vlgmr.msra.gmra.mrb[6].mxu0 %vm300_vm2, %v788_v4  ;;  %v865_v11 = vsel %vm300_vm2, %v783_v7, -inf }
 0x49c   :  { %866 = vmax.xlane.f32.xlu0 %v865_v11  ;;  %8801 = vmatprep.mubr.msk.f32.mxu0 %vm10079_vm1, %v10078_v17  ;;  %v293_v11 = vld [vmem:[#allocation8 + $0x30] sm:$0xff] }
 0x4b2   :  { %888 = vrot.lane.b32.xlu0 %v10284_v33, %s10082_s9 }
 0x4b6   :  { %1126 = vrot.lane.b32.xlu0 %v10271_v26, %s10083_s10 }
 0x4ba   :  { %1124 = vrot.lane.b32.xlu0 %v10287_v34, %s10084_s11 }
 0x4be   :  { %1204 = vrot.lane.b32.xlu0 %v10275_v27, %s10083_s10 }
 0x4c2   :  { %1202 = vrot.lane.b32.xlu0 %v10297_v37, %s10084_s11 }
 0x529   :  { %v867_v12 = vpop.xlane.xlu0 %866 }
 0x52a   :  { %v871_v13 = vsub.f32 %v783_v7, %v867_v12 }
 0x52c   :  { %v873_v14 = vmul.f32 1.442695, %v871_v13 }
 0x52d   :  { %v889_v15 = vpop.permute.xlu0 %888 }
 0x52e   :  { %9777 = vpow2.f32 %v873_v14  ;;  %8795 = vmatpush3.msra.mxu1 %v889_v15 }
 0x52f   :  { %8809 = vmatprep.subr.mxu1 %v10078_v17 }
 0x531   :  { %v1127_v28 = vpop.permute.xlu0 %1126 }
 0x535   :  { %v1125_v29 = vpop.permute.xlu0 %1124 }
 0x538   :  { %v9778_v16 = vpop.eup %9777 }
 0x539   :  { %v877_v18 = vsel %vm300_vm2, %v9778_v16, 0.0  ;;  %v1205_v35 = vpop.permute.xlu0 %1204 }
 0x53a   :  { %878 = vadd.xlane.f32.xlu1 %v877_v18 }
 0x53d   :  { %v1203_v38 = vpop.permute.xlu0 %1202 }
 0x56e   :  { %v861_v19 = vpop.f32.mrb[6].mxu0 }
 0x56f   :  { %v8793_v23 = vpop.f32.mrb[7].mxu0  ;;  %v868_v24 = vsel %vm300_vm2, %v861_v19, -inf }
 0x570   :  { %869 = vmax.xlane.f32.xlu1 %v868_v24 }
 0x581   :  { %965 = vrot.lane.b32.xlu1 %v10293_v36, %s10082_s9 }
 0x5c7   :  { %v879_v25 = vpop.xlane.xlu1 %878 }
 0x5c8   :  { %9779 = vrcp.f32 %v879_v25 }
 0x5d2   :  { %v9780_v31 = vpop.eup %9779 }
 0x5d3   :  { %v885_v32 = vmul.f32 %v9780_v31, %v9778_v16 }
 0x5d5   :  { %8797 = vmatmul.mubr.msk.f32.vlgmr.msra.gmra.mrb[10].mxu1 %vm300_vm2, %v885_v32 }
 0x5d6   :  { %8810 = vmatpush3.xpose.msk.msra.mxu1 %vm300_vm2, %v1127_v28  ;;  %8811 = vmatprep.mubr.msk.f32.mxu1 %vm10079_vm1, %v10078_v17 }
 0x5d7   :  { %8814 = vmatprep.subr.mxu1 %v10078_v17 }
 0x5d9   :  { %8812 = vmatmul.mubr.msk.f32.vlgmr.msra.gmra.mrb[12].mxu1 %vm300_vm2, %v1125_v29 }
 0x5da   :  { %8815 = vmatpush3.xpose.msk.msra.mxu1 %vm300_vm2, %v1205_v35  ;;  %8816 = vmatprep.mubr.msk.f32.mxu1 %vm10079_vm1, %v10078_v17 }
 0x5db   :  { %8824 = vmatprep.subr.mxu1 %v10078_v17 }
 0x5dd   :  { %8817 = vmatmul.mubr.msk.f32.vlgmr.msra.gmra.mrb[14].mxu1 %vm300_vm2, %v1203_v38 }
 0x5de   :  { %8826 = vmatprep.mubr.msk.f32.mxu1 %vm10079_vm1, %v10078_v17 }
 0x5fd   :  { %v870_v39 = vpop.xlane.xlu1 %869 }
 0x5fe   :  { %v872_v40 = vsub.f32 %v861_v19, %v870_v39 }
 0x600   :  { %v875_v41 = vmul.f32 1.442695, %v872_v40 }
 0x601   :  { %v966_v42 = vpop.permute.xlu1 %965 }
 0x602   :  { %9781 = vpow2.f32 %v875_v41  ;;  %8800 = vmatpush3.msra.mxu0 %v966_v42 }
 0x603   :  { %8804 = vmatprep.subr.mxu0 %v292_v56 }
 0x60c   :  { %v9782_v43 = vpop.eup %9781 }
 0x60d   :  { %v880_v44 = vsel %vm300_vm2, %v9782_v43, 0.0 }
 0x60e   :  { %881 = vadd.xlane.f32.xlu0 %v880_v44 }
 0x69b   :  { %v882_v45 = vpop.xlane.xlu0 %881 }
 0x69c   :  { %9783 = vrcp.f32 %v882_v45 }
 0x6a6   :  { %v9784_v46 = vpop.eup %9783 }
 0x6a7   :  { %v886_v47 = vmul.f32 %v9784_v46, %v9782_v43 }
 0x6a8   :  { %v960_v48 = vpop.f32.mrb[10].mxu1 }
 0x6a9   :  { %v8798_v49 = vpop.f32.mrb[11].mxu1  ;;  %8802 = vmatmul.mubr.msk.f32.vlgmr.msra.gmra.mrb[8].mxu0 %vm300_vm2, %v886_v47 }
 0x6aa   :  { %8806 = vmatprep.mubr.msk.f32.mxu0 %vm300_vm2, %v960_v48  ;;  %8805 = vmatpush3.msra.mxu0 %v292_v56 }
 0x6ab   :  { %8819 = vmatprep.subr.mxu0 %v10078_v17 }
 0x6ac   :  { %v1198_v50 = vpop.f32.mrb[12].mxu1 }
 0x6ad   :  { %v8813_v51 = vpop.f32.mrb[13].mxu1  ;;  %v1280_v52 = vsel %vm300_vm2, %v1198_v50, -inf }
 0x6ae   :  { %1281 = vmax.xlane.f32.xlu1 %v1280_v52 }
 0x6b0   :  { %v1276_v53 = vpop.f32.mrb[14].mxu1 }
 0x6b1   :  { %v8818_v54 = vpop.f32.mrb[15].mxu1  ;;  %v1283_v55 = vsel %vm300_vm2, %v1276_v53, -inf }
 0x6b2   :  { %1284 = vmax.xlane.f32.xlu0 %v1283_v55 }
 0x6bf   :  { %1378 = vrot.lane.b32.xlu1 %v10293_v36, %s10084_s11 }
 0x6c3   :  { %1537 = vrot.lane.b32.xlu1 %v10287_v34, %s10085_s13 }
 0x73b   :  { %v1282_v57 = vpop.xlane.xlu1 %1281 }
 0x73c   :  { %v1286_v58 = vsub.f32 %v1198_v50, %v1282_v57 }
 0x73e   :  { %v1288_v59 = vmul.f32 1.442695, %v1286_v58 }
 0x73f   :  { %v1285_v60 = vpop.xlane.xlu0 %1284  ;;  %v1379_v61 = vpop.permute.xlu1 %1378 }
 0x740   :  { %9785 = vpow2.f32 %v1288_v59  ;;  %v1287_v62 = vsub.f32 %v1276_v53, %v1285_v60  ;;  %8825 = vmatpush3.msra.mxu1 %v1379_v61  ;;  %v294_v53 = vld [vmem:[#allocation8 + $0x38] sm:$0xff] }
 0x741   :  { %8834 = vmatprep.subr.mxu1 %v10078_v17 }
 0x742   :  { %v1290_v63 = vmul.f32 1.442695, %v1287_v62 }
 0x743   :  { %v1538_v15 = vpop.permute.xlu1 %1537 }
 0x744   :  { %9787 = vpow2.f32 %v1290_v63 }
 0x74a   :  { %v9786_v0 = vpop.eup %9785 }
 0x74b   :  { %v1292_v34 = vsel %vm300_vm2, %v9786_v0, 0.0 }
 0x74c   :  { %1293 = vadd.xlane.f32.xlu0 %v1292_v34 }
 0x74e   :  { %v9788_v1 = vpop.eup %9787 }
 0x74f   :  { %v1295_v2 = vsel %vm300_vm2, %v9788_v1, 0.0 }
 0x750   :  { %1296 = vadd.xlane.f32.xlu0 %v1295_v2 }
 0x766   :  { %1302 = vrot.lane.b32.xlu0 %v10284_v33, %s10084_s11 }
 0x76a   :  { %1539 = vrot.lane.b32.xlu0 %v10271_v26, %s10086_s14 }
 0x76e   :  { %1617 = vrot.lane.b32.xlu0 %v10275_v27, %s10086_s14 }
 0x772   :  { %1615 = vrot.lane.b32.xlu0 %v10297_v37, %s10085_s13 }
 0x77c   :  { %v1037_v3 = vpop.f32.mrb[8].mxu0 }
 0x77d   :  { %v8803_v4 = vpop.f32.mrb[9].mxu0  ;;  %8807 = vmatmul.mubr.msk.f32.vlgmr.msra.gmra.mrb[4].mxu0 %vm300_vm2, %v1037_v3 }
 0x77e   :  { %8821 = vmatprep.mubr.msk.f32.mxu0 %vm10079_vm1, %v10078_v17 }
 0x7d9   :  { %v1294_v7 = vpop.xlane.xlu0 %1293 }
 0x7da   :  { %9789 = vrcp.f32 %v1294_v7 }
 0x7dd   :  { %v1297_v8 = vpop.xlane.xlu0 %1296 }
 0x7de   :  { %9791 = vrcp.f32 %v1297_v8 }
 0x7e1   :  { %v1303_v12 = vpop.permute.xlu0 %1302 }
 0x7e2   :  { %8820 = vmatpush3.msra.mxu0 %v1303_v12 }
 0x7e3   :  { %8829 = vmatprep.subr.mxu0 %v293_v11 }
 0x7e4   :  { %v9790_v26 = vpop.eup %9789 }
 0x7e5   :  { %v1300_v27 = vmul.f32 %v9790_v26, %v9786_v0  ;;  %v1540_v14 = vpop.permute.xlu0 %1539 }
 0x7e7   :  { %8822 = vmatmul.mubr.msk.f32.vlgmr.msra.gmra.mrb[10].mxu0 %vm300_vm2, %v1300_v27 }
 0x7e8   :  { %v9792_v37 = vpop.eup %9791  ;;  %8830 = vmatpush3.msra.mxu0 %v293_v11 }
 0x7e9   :  { %v1301_v13 = vmul.f32 %v9792_v37, %v9788_v1  ;;  %8839 = vmatprep.subr.mxu0 %v10078_v17  ;;  %v1618_v19 = vpop.permute.xlu0 %1617 }
 0x7eb   :  { %8827 = vmatmul.mubr.msk.f32.vlgmr.msra.gmra.mrb[16].mxu1 %vm300_vm2, %v1301_v13 }
 0x7ec   :  { %8835 = vmatpush3.xpose.msk.msra.mxu1 %vm300_vm2, %v1540_v14  ;;  %8836 = vmatprep.mubr.msk.f32.mxu1 %vm10079_vm1, %v10078_v17 }
 0x7ed   :  { %8844 = vmatprep.subr.mxu1 %v10078_v17  ;;  %v1616_v25 = vpop.permute.xlu0 %1615 }
 0x7ef   :  { %8837 = vmatmul.mubr.msk.f32.vlgmr.msra.gmra.mrb[18].mxu1 %vm300_vm2, %v1538_v15  ;;  %v8283_v15 = vld [vmem:[%s11196_s3 + $0x28] sm:$0xff] }
 0x7f0   :  { %8846 = vmatprep.mubr.msk.f32.mxu1 %vm10079_vm1, %v10078_v17 }
 0x8ba   :  { %v1374_v16 = vpop.f32.mrb[10].mxu0 }
 0x8bb   :  { %v8823_v18 = vpop.f32.mrb[11].mxu0  ;;  %8831 = vmatprep.mubr.msk.f32.mxu0 %vm300_vm2, %v1374_v16 }
 0x8bc   :  { %v8284_v18 = vld [vmem:[%s11196_s3 + $0x30] sm:$0xff] }
 0x8be   :  { %v1450_v23 = vpop.f32.mrb[16].mxu1 }
 0x8bf   :  { %v8828_v24 = vpop.f32.mrb[17].mxu1  ;;  %8832 = vmatmul.mubr.msk.f32.vlgmr.msra.gmra.mrb[4].mxu0 %vm300_vm2, %v1450_v23 }
 0x8c0   :  { %8840 = vmatpush3.xpose.msk.msra.mxu0 %vm300_vm2, %v1618_v19  ;;  %8841 = vmatprep.mubr.msk.f32.mxu0 %vm10079_vm1, %v10078_v17  ;;  %v8285_v19 = vld [vmem:[%s11196_s3 + $0x38] sm:$0xff]  ;;  %v102_v24 = vld [vmem:[#allocation7] sm:$0xff] }
 0x8c1   :  { %8849 = vmatprep.subr.mxu0 %v10078_v17  ;;  %v9383_v23 = vpack.c.bf16 %v8285_v19, %v8284_v18 }
 0x8c2   :  { %v1611_v28 = vpop.f32.mrb[18].mxu1 }
 0x8c3   :  { %v8838_v29 = vpop.f32.mrb[19].mxu1  ;;  %8842 = vmatmul.mubr.msk.f32.vlgmr.msra.gmra.mrb[12].mxu0 %vm300_vm2, %v1616_v25  ;;  %v1693_v31 = vsel %vm300_vm2, %v1611_v28, -inf  ;;  %v103_v25 = vld [vmem:[#allocation7 + $0x8] sm:$0xff] }
 0x8c4   :  { %1694 = vmax.xlane.f32.xlu1 %v1693_v31  ;;  %8851 = vmatprep.mubr.msk.f32.mxu0 %vm10079_vm1, %v10078_v17  ;;  %v1994_v29 = vld [vmem:[#allocation8 + $0x40] sm:$0xff]  ;;  %v1995_v31 = vld [vmem:[#allocation8 + $0x48] sm:$0xff] }
 0x951   :  { %v1695_v32 = vpop.xlane.xlu1 %1694 }
 0x952   :  { %v1699_v35 = vsub.f32 %v1611_v28, %v1695_v32  ;;  %v104_v28 = vld [vmem:[#allocation7 + $0x10] sm:$0xff]  ;;  %v9371_v32 = vpack.c.bf16 %v1995_v31, %v1994_v29 }
 0x954   :  { %v1701_v38 = vmul.f32 1.442695, %v1699_v35  ;;  %v105_v35 = vld [vmem:[#allocation7 + $0x18] sm:$0xff] }
 0x956   :  { %9793 = vpow2.f32 %v1701_v38  ;;  %v1996_v38 = vld [vmem:[#allocation8 + $0x50] sm:$0xff] }
 0x960   :  { %v9794_v42 = vpop.eup %9793 }
 0x961   :  { %v1705_v43 = vsel %vm300_vm2, %v9794_v42, 0.0 }
 0x996   :  { %v1689_v39 = vpop.f32.mrb[12].mxu0 }
 0x997   :  { %v8843_v40 = vpop.f32.mrb[13].mxu0  ;;  %v1696_v41 = vsel %vm300_vm2, %v1689_v39, -inf }
 0x998   :  { %1697 = vmax.xlane.f32.xlu0 %v1696_v41  ;;  %v10087_v41 = vmov 0.0|0.0  }
 0x99c   :  { %1706 = vadd.xlane.f32.xlu0 %v1705_v43 }
 0x9b2   :  { %1715 = vrot.lane.b32.xlu0 %v10284_v33, %s10085_s13 }
 0xa25   :  { %v1698_v44 = vpop.xlane.xlu0 %1697 }
 0xa26   :  { %v1700_v45 = vsub.f32 %v1689_v39, %v1698_v44  ;;  %v1997_v39 = vld [vmem:[#allocation8 + $0x58] sm:$0xff] }
 0xa27   :  { %v9375_v40 = vpack.c.bf16 %v1997_v39, %v1996_v38 }
 0xa28   :  { %v1703_v46 = vmul.f32 1.442695, %v1700_v45 }
 0xa29   :  { %v1707_v47 = vpop.xlane.xlu0 %1706 }
 0xa2a   :  { %9795 = vpow2.f32 %v1703_v46 }
 0xa2b   :  { %9797 = vrcp.f32 %v1707_v47 }
 0xa2d   :  { %v1716_v48 = vpop.permute.xlu0 %1715 }
 0xa2e   :  { %8845 = vmatpush3.msra.mxu1 %v1716_v48  ;;  %v1981_v48 = vsub.s32 5, %v10255_v20 }
 0xa2f   :  { %9372 = vmatprep.subr.bf16.mxu1 %v9371_v32 }
 0xa34   :  { %v9796_v49 = vpop.eup %9795 }
 0xa35   :  { %v9798_v50 = vpop.eup %9797  ;;  %v1708_v51 = vsel %vm300_vm2, %v9796_v49, 0.0 }
 0xa36   :  { %1709 = vadd.xlane.f32.xlu1 %v1708_v51  ;;  %v1713_v52 = vmul.f32 %v9798_v50, %v9794_v42  ;;  %v1982_v50 = vrot.slane %v10279_v30, %v1981_v48 }
 0xa38   :  { %8847 = vmatmul.mubr.msk.f32.vlgmr.msra.gmra.mrb[20].mxu1 %vm300_vm2, %v1713_v52 }
 0xa39   :  { %9374 = vmatpush3.bf16.msra.mxu1 %v9371_v32 }
 0xa3a   :  { %9376 = vmatprep.subr.bf16.mxu1 %v9375_v40 }
 0xa3d   :  { %9378 = vmatpush3.bf16.msra.mxu1 %v9375_v40  ;;  %v2190_v40 = vld [vmem:[#allocation8 + $0x60] sm:$0xff] }
 0xa3e   :  { %9387 = vmatprep.subr.bf16.mxu1 %v10087_v41 }
 0xa47   :  { %1791 = vrot.lane.b32.xlu1 %v10293_v36, %s10085_s13  ;;  %v10424_v36 = vsub.s32 1, %v10255_v20 }
 0xa49   :  { %v706_v61 = vrot.slane %v10279_v30, %v10424_v36 }
 0xac3   :  { %v1710_v33 = vpop.xlane.xlu1 %1709 }
 0xac4   :  { %9799 = vrcp.f32 %v1710_v33 }
 0xac7   :  { %v1792_v54 = vpop.permute.xlu1 %1791 }
 0xac8   :  { %8850 = vmatpush3.msra.mxu0 %v1792_v54 }
 0xac9   :  { %8854 = vmatprep.subr.mxu0 %v294_v53 }
 0xace   :  { %v9800_v55 = vpop.eup %9799 }
 0xacf   :  { %v1714_v56 = vmul.f32 %v9800_v55, %v9796_v49  ;;  %v1987_v49 = vsub.s32 6, %v10255_v20 }
 0xad1   :  { %8852 = vmatmul.mubr.msk.f32.vlgmr.msra.gmra.mrb[14].mxu0 %vm300_vm2, %v1714_v56 }
 0xad2   :  { %8855 = vmatpush3.msra.mxu0 %v294_v53  ;;  %v1988_v53 = vrot.slane %v10279_v30, %v1987_v49 }
 0xb0b   :  { %v1787_v57 = vpop.f32.mrb[20].mxu1 }
 0xb0c   :  { %v8848_v58 = vpop.f32.mrb[21].mxu1  ;;  %8856 = vmatprep.mubr.msk.f32.mxu0 %vm300_vm2, %v1787_v57 }
 0xba4   :  { %v1863_v59 = vpop.f32.mrb[14].mxu0 }
 0xba5   :  { %v8853_v60 = vpop.f32.mrb[15].mxu0  ;;  %8857 = vmatmul.mubr.msk.f32.vlgmr.msra.gmra.mrb[4].mxu0 %vm300_vm2, %v1863_v59 }
 0xba6   :  { %8878 = vmatprep.mubr.msk.f32.mxu0 %vm119_vm0, %v102_v24 }
 0xc78   :  { %v8858_v62 = vpop.f32.mrb[4].mxu0 }
 0xc79   :  { %v9579_v63 = vadd.f32 %v8858_v62, %v706_v61  ;;  %v1939_v0 = vpop.f32.mrb[5].mxu0 }
 0xc7a   :  { %v9580_v34 = vadd.f32 %v1939_v0, %v706_v61  ;;  %v2091_v61 = vrot.slane %v10267_v22, %v10424_v36 }
 0xc7b   :  { %v1951_v1 = vadd.f32 %v9579_v63, %v10242_v9 }
 0xc7c   :  { %v1950_v2 = vadd.f32 %v9580_v34, %v10235_v5  ;;  %v8282_v5 = vld [vmem:[%s11196_s3 + $0x20] sm:$0xff] }
 0xc7d   :  { %v1955_v3 = vsel %vm119_vm0, %v1951_v1, 0.0  ;;  %v9379_v16 = vpack.c.bf16 %v8283_v15, %v8282_v5 }
 0xc7e   :  { %1956 = vadd.xlane.f32.xlu0 %v1955_v3  ;;  %v1952_v4 = vsel %vm119_vm0, %v1950_v2, 0.0 }
 0xc7f   :  { %1953 = vadd.xlane.f32.xlu1 %v1952_v4  ;;  %9380 = vmatprep.subr.bf16.mxu0 %v9379_v16 }
 0xc80   :  { %9382 = vmatpush3.bf16.msra.mxu0 %v9379_v16 }
 0xc81   :  { %9384 = vmatprep.subr.bf16.mxu0 %v9383_v23 }
 0xc84   :  { %9386 = vmatpush3.bf16.msra.mxu0 %v9383_v23 }
 0xc85   :  { %9391 = vmatprep.subr.bf16.mxu0 %v10087_v41 }
 0xc87   :  { %8879 = vmatmul.mubr.msk.f32.vlgmr.msra.gmra.mrb[16].mxu0 %vm119_vm0, %v103_v25 }
 0xc88   :  { %8881 = vmatprep.mubr.msk.f32.mxu0 %vm119_vm0, %v104_v28 }
 0xc8b   :  { %8882 = vmatmul.mubr.msk.f32.gmra.mrb[18].mxu0 %vm119_vm0, %v105_v35 }
 0xc8c   :  { %8895 = vmatprep.mubr.msk.f32.mxu0 %vm10079_vm1, %v10078_v17 }
 0xd0b   :  { %v1957_v7 = vpop.xlane.xlu0 %1956 }
 0xd0c   :  { %v1960_v8 = vmul.f32 0.03125, %v1957_v7  ;;  %v1954_v11 = vpop.xlane.xlu1 %1953 }
 0xd0d   :  { %v1959_v12 = vmul.f32 0.03125, %v1954_v11  ;;  %v10492_v11 = vsub.s32 2, %v10255_v20 }
 0xd0e   :  { %v1962_v26 = vsub.f32 %v1951_v1, %v1960_v8 }
 0xd0f   :  { %v1961_v27 = vsub.f32 %v1950_v2, %v1959_v12  ;;  %v2001_v12 = vrot.slane %v10279_v30, %v10492_v11 }
 0xd10   :  { %v1964_v37 = vmul.f32 %v1962_v26, %v1962_v26 }
 0xd11   :  { %v1963_v13 = vmul.f32 %v1961_v27, %v1961_v27 }
 0xd12   :  { %v1968_v14 = vsel %vm119_vm0, %v1964_v37, 0.0 }
 0xd13   :  { %1969 = vadd.xlane.f32.xlu1 %v1968_v14  ;;  %v1965_v9 = vsel %vm119_vm0, %v1963_v13, 0.0 }
 0xd14   :  { %1966 = vadd.xlane.f32.xlu0 %v1965_v9 }
 0xd5a   :  { %v8880_v62 = vpop.f32.mrb[16].mxu0 }
 0xd5b   :  { %v2176_v63 = vadd.f32 %v8880_v62, %v2091_v61  ;;  %v2170_v0 = vpop.f32.mrb[17].mxu0 }
 0xd5c   :  { %v2171_v34 = vadd.f32 %v2170_v0, %v2091_v61 }
 0xd5e   :  { %v9388_v1 = vpack.c.bf16 %v2176_v63, %v2171_v34  ;;  %v10485_v7 = vpack.i.bf16 %v2176_v63, %v2171_v34 }
 0xda0   :  { %v1970_v42 = vpop.xlane.xlu1 %1969 }
 0xda1   :  { %v1972_v43 = vmul.f32 0.03125, %v1970_v42  ;;  %v1967_v44 = vpop.xlane.xlu0 %1966 }
 0xda2   :  { %v1971_v45 = vmul.f32 0.03125, %v1967_v44 }
 0xda3   :  { %v1974_v46 = vadd.f32 1e-05, %v1972_v43 }
 0xda4   :  { %v1973_v47 = vadd.f32 1e-05, %v1971_v45 }
 0xda5   :  { %9801 = vrsqrt.f32 %v1974_v46 }
 0xda6   :  { %9803 = vrsqrt.f32 %v1973_v47 }
 0xdaf   :  { %v9802_v51 = vpop.eup %9801 }
 0xdb0   :  { %v9804_v52 = vpop.eup %9803  ;;  %v1978_v33 = vmul.f32 %v9802_v51, %v1962_v26 }
 0xdb1   :  { %v1977_v54 = vmul.f32 %v9804_v52, %v1961_v27 }
 0xdb2   :  { %v1984_v55 = vmul.f32 %v1982_v50, %v1978_v33 }
 0xdb3   :  { %v1983_v56 = vmul.f32 %v1982_v50, %v1977_v54 }
 0xdb4   :  { %v10462_v57 = vadd.f32 %v1988_v53, %v1984_v55 }
 0xdb5   :  { %v10464_v58 = vadd.f32 %v1988_v53, %v1983_v56 }
 0xdb6   :  { %v1992_v60 = vadd.f32 %v10462_v57, %v10244_v10  ;;  %v8883_v10 = vpop.f32.mrb[18].mxu0 }
 0xdb7   :  { %v1991_v59 = vadd.f32 %v10464_v58, %v10237_v6  ;;  %v2186_v2 = vadd.f32 %v8883_v10, %v2091_v61  ;;  %v2180_v3 = vpop.f32.mrb[19].mxu0 }
 0xdb8   :  { %v2181_v4 = vadd.f32 %v2180_v3, %v2091_v61 }
 0xdb9   :  { %8867 = vmatprep.mubr.msk.f32.mxu1 %vm119_vm0, %v1991_v59 }
 0xdba   :  { %8868 = vmatmul.mubr.msk.f32.vlgmr.msra.gmra.mrb[22].mxu1 %vm119_vm0, %v1992_v60  ;;  %v9392_v22 = vpack.c.bf16 %v2186_v2, %v2181_v4  ;;  %v10489_v8 = vpack.i.bf16 %v2186_v2, %v2181_v4 }
 0xdbb   :  { %8888 = vmatprep.mubr.msk.f32.mxu1 %vm10079_vm1, %v10078_v17  ;;  %9390 = vmatpush3.bf16.xpose.msk.msra.mxu1 %vm10478_vm3, %v9388_v1 }
 0xdbc   :  { %9395 = vmatprep.subr.bf16.mxu1 %v10087_v41  ;;  %9394 = vmatpush3.bf16.xpose.msk.msra.mxu0 %vm10478_vm3, %v9392_v22 }
 0xdbd   :  { %8912 = vmatprep.subr.mxu0 %v2190_v40 }
 0xe8d   :  { %v8869_v26 = vpop.f32.mrb[22].mxu1 }
 0xe8e   :  { %v2080_v27 = vadd.f32 %v8869_v26, %v2001_v12  ;;  %v2074_v37 = vpop.f32.mrb[23].mxu1 }
 0xe8f   :  { %v2075_v13 = vadd.f32 %v2074_v37, %v2001_v12 }
 0xe90   :  { %v10496_v14 = vmul.f32 0.35355338, %v2080_v27 }
 0xe91   :  { %v10498_v9 = vmul.f32 0.35355338, %v2075_v13 }
 0xe92   :  { %8896 = vmatmul.mubr.msk.f32.vlgmr.msra.gmra.mrb[20].mxu0 %vm300_vm2, %v10496_v14 }
 0xe93   :  { %8889 = vmatmul.mubr.msk.f32.vlgmr.msra.gmra.mrb[24].mxu1 %vm300_vm2, %v10498_v9  ;;  %8913 = vmatpush3.msra.mxu0 %v2190_v40 }
 0xe94   :  { %8902 = vmatprep.mubr.msk.f32.mxu1 %vm10079_vm1, %v10078_v17  ;;  %9405 = vmatprep.subr.bf16.mxu0 %v10087_v41 }
 0xf65   :  { %v2350_v5 = vpop.f32.mrb[20].mxu0 }
 0xf66   :  { %v2271_v30 = vpop.f32.mrb[24].mxu1  ;;  %v8897_v15 = vpop.f32.mrb[21].mxu0  ;;  %v2358_v16 = vsel %vm2354_vm4, %v2350_v5, -inf }
 0xf67   :  { %2359 = vmax.xlane.f32.xlu1 %v2358_v16  ;;  %v8890_v18 = vpop.f32.mrb[25].mxu1  ;;  %v2355_v19 = vsel %vm2354_vm4, %v2271_v30, -inf }
 0xf68   :  { %2356 = vmax.xlane.f32.xlu0 %v2355_v19 }
 0xff4   :  { %v2360_v23 = vpop.xlane.xlu1 %2359 }
 0xff5   :  { %v2362_v24 = vsub.f32 %v2350_v5, %v2360_v23  ;;  %v2357_v25 = vpop.xlane.xlu0 %2356 }
 0xff6   :  { %v2361_v28 = vsub.f32 %v2271_v30, %v2357_v25 }
 0xff7   :  { %v2365_v29 = vmul.f32 1.442695, %v2362_v24 }
 0xff8   :  { %v2363_v31 = vmul.f32 1.442695, %v2361_v28 }
 0xff9   :  { %9805 = vpow2.f32 %v2365_v29 }
 0xffa   :  { %9807 = vpow2.f32 %v2363_v31 }
0x1003   :  { %v9806_v32 = vpop.eup %9805 }
0x1004   :  { %v9808_v35 = vpop.eup %9807  ;;  %v2370_v38 = vsel %vm2354_vm4, %v9806_v32, 0.0 }
0x1005   :  { %2371 = vadd.xlane.f32.xlu1 %v2370_v38  ;;  %v2367_v39 = vsel %vm2354_vm4, %v9808_v35, 0.0 }
0x1006   :  { %2368 = vadd.xlane.f32.xlu0 %v2367_v39 }
0x1016   :  { %9635 = vrot.lane.b32.xlu1 %v10489_v8, %s10080_s28 }
0x101a   :  { %9640 = vrot.lane.b32.xlu1 %v10485_v7, %s10082_s9 }
0x101c   :  { %9630 = vrot.lane.b32.xlu0 %v10485_v7, %s10080_s28 }
0x101e   :  { %2622 = vrot.lane.b32.xlu1 %v10498_v9, %s10082_s9 }
0x1020   :  { %9645 = vrot.lane.b32.xlu0 %v10489_v8, %s10082_s9 }
0x1024   :  { %2704 = vrot.lane.b32.xlu0 %v10496_v14, %s10082_s9 }
0x1092   :  { %v2372_v42 = vpop.xlane.xlu1 %2371 }
0x1093   :  { %v2369_v43 = vpop.xlane.xlu0 %2368 }
0x1094   :  { %9809 = vrcp.f32 %v2369_v43 }
0x1095   :  { %9811 = vrcp.f32 %v2372_v42 }
0x1096   :  { %v9636_v47 = vpop.permute.xlu1 %9635 }
0x1097   :  { %v9631_v44 = vpop.permute.xlu0 %9630  ;;  %v9638_v51 = vunpack.i.h.bf16 %v9636_v47  ;;  %v9637_v52 = vunpack.i.l.bf16 %v9636_v47 }
0x1098   :  { %v9633_v45 = vunpack.i.h.bf16 %v9631_v44  ;;  %v9632_v46 = vunpack.i.l.bf16 %v9631_v44 }
0x1099   :  { %v9399_v55 = vpack.c.bf16 %v9638_v51, %v9637_v52  ;;  %v2191_v51 = vld [vmem:[#allocation8 + $0x68] sm:$0xff] }
0x109a   :  { %v9396_v50 = vpack.c.bf16 %v9633_v45, %v9632_v46  ;;  %v9641_v56 = vpop.permute.xlu1 %9640 }
0x109b   :  { %v9643_v60 = vunpack.i.h.bf16 %v9641_v56  ;;  %v9642_v61 = vunpack.i.l.bf16 %v9641_v56  ;;  %v9646_v0 = vpop.permute.xlu0 %9645 }
0x109c   :  { %9397 = vmatpush3.bf16.msra.mxu1 %v9396_v50  ;;  %v9648_v34 = vunpack.i.h.bf16 %v9646_v0  ;;  %v9647_v10 = vunpack.i.l.bf16 %v9646_v0 }
0x109d   :  { %9398 = vmatprep.subr.bf16.mxu1 %v10087_v41  ;;  %v9402_v62 = vpack.c.bf16 %v9643_v60, %v9642_v61 }
0x109e   :  { %v9810_v33 = vpop.eup %9809  ;;  %v2623_v63 = vpop.permute.xlu1 %2622  ;;  %v9406_v3 = vpack.c.bf16 %v9648_v34, %v9647_v10 }
0x109f   :  { %v2375_v53 = vmul.f32 %v9810_v33, %v9808_v35  ;;  %v9812_v54 = vpop.eup %9811  ;;  %v2705_v12 = vpop.permute.xlu0 %2704 }
0x10a0   :  { %v2376_v59 = vmul.f32 %v9812_v54, %v9806_v32 }
0x10a1   :  { %8903 = vmatmul.mubr.msk.f32.vlgmr.msra.gmra.mrb[26].mxu1 %vm2354_vm4, %v2375_v53 }
0x10a2   :  { %9400 = vmatpush3.bf16.msra.mxu1 %v9399_v55  ;;  %8909 = vmatprep.mubr.msk.f32.mxu1 %vm10079_vm1, %v10078_v17 }
0x10a3   :  { %9401 = vmatprep.subr.bf16.mxu1 %v10087_v41 }
0x10a5   :  { %8910 = vmatmul.mubr.msk.f32.vlgmr.msra.gmra.mrb[28].mxu1 %vm2354_vm4, %v2376_v59 }
0x10a6   :  { %8921 = vmatprep.mubr.msk.f32.mxu1 %vm10079_vm1, %v10078_v17 }
0x10ab   :  { %9404 = vmatpush3.bf16.xpose.msk.msra.mxu1 %vm10478_vm3, %v9402_v62 }
0x10ac   :  { %9409 = vmatprep.subr.bf16.mxu1 %v10087_v41 }
0x10b2   :  { %8922 = vmatmul.mubr.msk.f32.vlgmr.msra.gmra.mrb[30].mxu1 %vm300_vm2, %v2623_v63 }
0x10b3   :  { %8935 = vmatprep.mubr.msk.f32.mxu1 %vm10079_vm1, %v10078_v17 }
0x1174   :  { %v2452_v1 = vpop.f32.mrb[26].mxu1 }
0x1175   :  { %v8904_v2 = vpop.f32.mrb[27].mxu1  ;;  %8914 = vmatprep.mubr.msk.f32.mxu0 %vm300_vm2, %v2452_v1 }
0x1178   :  { %v2531_v4 = vpop.f32.mrb[28].mxu1 }
0x1179   :  { %v8911_v22 = vpop.f32.mrb[29].mxu1  ;;  %8915 = vmatmul.mubr.msk.f32.vlgmr.msra.gmra.mrb[22].mxu0 %vm300_vm2, %v2531_v4 }
0x117a   :  { %9408 = vmatpush3.bf16.xpose.msk.msra.mxu0 %vm10478_vm3, %v9406_v3  ;;  %8928 = vmatprep.mubr.msk.f32.mxu0 %vm10079_vm1, %v10078_v17 }
0x117b   :  { %9412 = vmatprep.subr.bf16.mxu0 %v10087_v41 }
0x1181   :  { %8929 = vmatmul.mubr.msk.f32.vlgmr.msra.gmra.mrb[24].mxu0 %vm300_vm2, %v2705_v12 }
0x1182   :  { %8942 = vmatprep.mubr.msk.f32.mxu0 %vm10079_vm1, %v10078_v17 }
0x1185   :  { %v2700_v26 = vpop.f32.mrb[30].mxu1 }
0x1186   :  { %v8923_v27 = vpop.f32.mrb[31].mxu1  ;;  %v2786_v37 = vsel %vm2354_vm4, %v2700_v26, -inf }
0x1187   :  { %2787 = vmax.xlane.f32.xlu1 %v2786_v37 }
0x1214   :  { %v2788_v13 = vpop.xlane.xlu1 %2787 }
0x1215   :  { %v2792_v5 = vsub.f32 %v2700_v26, %v2788_v13 }
0x1217   :  { %v2794_v30 = vmul.f32 1.442695, %v2792_v5 }
0x1219   :  { %9813 = vpow2.f32 %v2794_v30 }
0x1223   :  { %v9814_v19 = vpop.eup %9813 }
0x1224   :  { %v2798_v23 = vsel %vm2354_vm4, %v9814_v19, 0.0 }
0x1254   :  { %v2782_v15 = vpop.f32.mrb[24].mxu0 }
0x1255   :  { %v8930_v16 = vpop.f32.mrb[25].mxu0  ;;  %v2789_v18 = vsel %vm2354_vm4, %v2782_v15, -inf }
0x1256   :  { %2790 = vmax.xlane.f32.xlu0 %v2789_v18 }
0x125a   :  { %2799 = vadd.xlane.f32.xlu0 %v2798_v23 }
0x1270   :  { %9650 = vrot.lane.b32.xlu0 %v10485_v7, %s10081_s0 }
0x1274   :  { %9665 = vrot.lane.b32.xlu0 %v10489_v8, %s10084_s11 }
0x1278   :  { %3131 = vrot.lane.b32.xlu0 %v10496_v14, %s10084_s11 }
0x12e3   :  { %v2791_v24 = vpop.xlane.xlu0 %2790 }
0x12e4   :  { %v2793_v25 = vsub.f32 %v2782_v15, %v2791_v24 }
0x12e6   :  { %v2796_v28 = vmul.f32 1.442695, %v2793_v25 }
0x12e7   :  { %v2800_v29 = vpop.xlane.xlu0 %2799 }
0x12e8   :  { %9815 = vpow2.f32 %v2796_v28 }
0x12e9   :  { %9817 = vrcp.f32 %v2800_v29 }
0x12eb   :  { %v9651_v31 = vpop.permute.xlu0 %9650 }
0x12ec   :  { %v9653_v32 = vunpack.i.h.bf16 %v9651_v31  ;;  %v9652_v35 = vunpack.i.l.bf16 %v9651_v31 }
0x12ee   :  { %v9410_v38 = vpack.c.bf16 %v9653_v32, %v9652_v35 }
0x12ef   :  { %v9666_v62 = vpop.permute.xlu0 %9665 }
0x12f0   :  { %9411 = vmatpush3.bf16.msra.mxu1 %v9410_v38  ;;  %v9668_v63 = vunpack.i.h.bf16 %v9666_v62  ;;  %v9667_v0 = vunpack.i.l.bf16 %v9666_v62 }
0x12f1   :  { %9415 = vmatprep.subr.bf16.mxu1 %v10087_v41 }
0x12f2   :  { %v9816_v39 = vpop.eup %9815  ;;  %v9420_v34 = vpack.c.bf16 %v9668_v63, %v9667_v0 }
0x12f3   :  { %v9818_v40 = vpop.eup %9817  ;;  %v2801_v42 = vsel %vm2354_vm4, %v9816_v39, 0.0  ;;  %v3132_v22 = vpop.permute.xlu0 %3131 }
0x12f4   :  { %2802 = vadd.xlane.f32.xlu1 %v2801_v42  ;;  %v2806_v43 = vmul.f32 %v9818_v40, %v9814_v19 }
0x12f6   :  { %8936 = vmatmul.mubr.msk.f32.vlgmr.msra.gmra.mrb[32].mxu1 %vm2354_vm4, %v2806_v43 }
0x12f7   :  { %8954 = vmatprep.mubr.msk.f32.mxu1 %vm10079_vm1, %v10078_v17 }
0x1305   :  { %9655 = vrot.lane.b32.xlu1 %v10489_v8, %s10081_s0 }
0x1309   :  { %9660 = vrot.lane.b32.xlu1 %v10485_v7, %s10084_s11 }
0x130d   :  { %3049 = vrot.lane.b32.xlu1 %v10498_v9, %s10084_s11 }
0x1381   :  { %v2803_v44 = vpop.xlane.xlu1 %2802 }
0x1382   :  { %9819 = vrcp.f32 %v2803_v44 }
0x1385   :  { %v9656_v45 = vpop.permute.xlu1 %9655 }
0x1386   :  { %v9658_v46 = vunpack.i.h.bf16 %v9656_v45  ;;  %v9657_v47 = vunpack.i.l.bf16 %v9656_v45 }
0x1388   :  { %v9413_v50 = vpack.c.bf16 %v9658_v46, %v9657_v47 }
0x1389   :  { %v9661_v52 = vpop.permute.xlu1 %9660 }
0x138a   :  { %v9663_v33 = vunpack.i.h.bf16 %v9661_v52  ;;  %v9662_v53 = vunpack.i.l.bf16 %v9661_v52  ;;  %9414 = vmatpush3.bf16.msra.mxu0 %v9413_v50 }
0x138b   :  { %8945 = vmatprep.subr.mxu0 %v2191_v51 }
0x138c   :  { %v9820_v54 = vpop.eup %9819  ;;  %v9416_v55 = vpack.c.bf16 %v9663_v33, %v9662_v53 }
0x138d   :  { %v2807_v56 = vmul.f32 %v9820_v54, %v9816_v39  ;;  %v3050_v59 = vpop.permute.xlu1 %3049 }
0x138e   :  { %9418 = vmatpush3.bf16.xpose.msk.msra.mxu1 %vm10478_vm3, %v9416_v55 }
0x138f   :  { %8943 = vmatmul.mubr.msk.f32.vlgmr.msra.gmra.mrb[26].mxu0 %vm2354_vm4, %v2807_v56  ;;  %9423 = vmatprep.subr.bf16.mxu1 %v10087_v41 }
0x1390   :  { %8946 = vmatpush3.msra.mxu0 %v2191_v51 }
0x1391   :  { %9419 = vmatprep.subr.bf16.mxu0 %v10087_v41 }
0x1395   :  { %8955 = vmatmul.mubr.msk.f32.vlgmr.msra.gmra.mrb[34].mxu1 %vm300_vm2, %v3050_v59 }
0x1396   :  { %8968 = vmatprep.mubr.msk.f32.mxu1 %vm10079_vm1, %v10078_v17 }
0x13c9   :  { %v2883_v60 = vpop.f32.mrb[32].mxu1 }
0x13ca   :  { %v8937_v61 = vpop.f32.mrb[33].mxu1  ;;  %8947 = vmatprep.mubr.msk.f32.mxu0 %vm300_vm2, %v2883_v60 }
0x1462   :  { %v2962_v10 = vpop.f32.mrb[26].mxu0 }
0x1463   :  { %v8944_v1 = vpop.f32.mrb[27].mxu0  ;;  %8948 = vmatmul.mubr.msk.f32.vlgmr.msra.gmra.mrb[22].mxu0 %vm300_vm2, %v2962_v10 }
0x1464   :  { %9422 = vmatpush3.bf16.xpose.msk.msra.mxu0 %vm10478_vm3, %v9420_v34  ;;  %8961 = vmatprep.mubr.msk.f32.mxu0 %vm10079_vm1, %v10078_v17 }
0x1468   :  { %v3127_v2 = vpop.f32.mrb[34].mxu1 }
0x1469   :  { %v8956_v3 = vpop.f32.mrb[35].mxu1  ;;  %v3213_v4 = vsel %vm2354_vm4, %v3127_v2, -inf }
0x146a   :  { %3214 = vmax.xlane.f32.xlu1 %v3213_v4 }
0x146b   :  { %8962 = vmatmul.mubr.msk.f32.vlgmr.msra.gmra.mrb[28].mxu0 %vm300_vm2, %v3132_v22 }
0x14f7   :  { %v3215_v12 = vpop.xlane.xlu1 %3214 }
0x14f8   :  { %v3219_v26 = vsub.f32 %v3127_v2, %v3215_v12 }
0x14fa   :  { %v3221_v27 = vmul.f32 1.442695, %v3219_v26 }
0x14fc   :  { %9821 = vpow2.f32 %v3221_v27 }
0x1506   :  { %v9822_v30 = vpop.eup %9821 }
0x1507   :  { %v3225_v15 = vsel %vm2354_vm4, %v9822_v30, 0.0 }
0x153e   :  { %v3209_v37 = vpop.f32.mrb[28].mxu0 }
0x153f   :  { %v8963_v13 = vpop.f32.mrb[29].mxu0  ;;  %v3216_v5 = vsel %vm2354_vm4, %v3209_v37, -inf }
0x1540   :  { %3217 = vmax.xlane.f32.xlu0 %v3216_v5 }
0x1544   :  { %3226 = vadd.xlane.f32.xlu0 %v3225_v15 }
0x155a   :  { %9670 = vrot.lane.b32.xlu0 %v10485_v7, %s10083_s10 }
0x155e   :  { %9685 = vrot.lane.b32.xlu0 %v10489_v8, %s10085_s13 }
0x1562   :  { %3558 = vrot.lane.b32.xlu0 %v10496_v14, %s10085_s13  ;;  %v2192_v14 = vld [vmem:[#allocation8 + $0x70] sm:$0xff] }
0x1563   :  { %8978 = vmatprep.subr.mxu0 %v2192_v14 }
0x1564   :  { %8979 = vmatpush3.msra.mxu0 %v2192_v14 }
0x1565   :  { %9433 = vmatprep.subr.bf16.mxu0 %v10087_v41 }
0x15cd   :  { %v3218_v16 = vpop.xlane.xlu0 %3217 }
0x15ce   :  { %v3220_v18 = vsub.f32 %v3209_v37, %v3218_v16 }
0x15d0   :  { %v3223_v19 = vmul.f32 1.442695, %v3220_v18 }
0x15d1   :  { %v3227_v23 = vpop.xlane.xlu0 %3226 }
0x15d2   :  { %9823 = vpow2.f32 %v3223_v19 }
0x15d3   :  { %9825 = vrcp.f32 %v3227_v23 }
0x15d5   :  { %v9671_v24 = vpop.permute.xlu0 %9670 }
0x15d6   :  { %v9673_v25 = vunpack.i.h.bf16 %v9671_v24  ;;  %v9672_v28 = vunpack.i.l.bf16 %v9671_v24 }
0x15d8   :  { %v9424_v29 = vpack.c.bf16 %v9673_v25, %v9672_v28 }
0x15d9   :  { %v9686_v54 = vpop.permute.xlu0 %9685 }
0x15da   :  { %9425 = vmatpush3.bf16.msra.mxu1 %v9424_v29  ;;  %v9688_v55 = vunpack.i.h.bf16 %v9686_v54  ;;  %v9687_v56 = vunpack.i.l.bf16 %v9686_v54 }
0x15db   :  { %9426 = vmatprep.subr.bf16.mxu1 %v10087_v41 }
0x15dc   :  { %v9824_v31 = vpop.eup %9823  ;;  %v9434_v59 = vpack.c.bf16 %v9688_v55, %v9687_v56 }
0x15dd   :  { %v9826_v32 = vpop.eup %9825  ;;  %v3228_v35 = vsel %vm2354_vm4, %v9824_v31, 0.0  ;;  %v3559_v62 = vpop.permute.xlu0 %3558 }
0x15de   :  { %3229 = vadd.xlane.f32.xlu1 %v3228_v35  ;;  %v3233_v38 = vmul.f32 %v9826_v32, %v9822_v30  ;;  %v2193_v35 = vld [vmem:[#allocation8 + $0x78] sm:$0xff] }
0x15e0   :  { %8969 = vmatmul.mubr.msk.f32.vlgmr.msra.gmra.mrb[36].mxu1 %vm2354_vm4, %v3233_v38 }
0x15e1   :  { %8975 = vmatprep.mubr.msk.f32.mxu1 %vm10079_vm1, %v10078_v17 }
0x15ef   :  { %9675 = vrot.lane.b32.xlu1 %v10489_v8, %s10083_s10 }
0x15f3   :  { %9680 = vrot.lane.b32.xlu1 %v10485_v7, %s10085_s13 }
0x15f7   :  { %3476 = vrot.lane.b32.xlu1 %v10498_v9, %s10085_s13 }
0x166b   :  { %v3230_v39 = vpop.xlane.xlu1 %3229 }
0x166c   :  { %9827 = vrcp.f32 %v3230_v39 }
0x166f   :  { %v9676_v40 = vpop.permute.xlu1 %9675 }
0x1670   :  { %v9678_v42 = vunpack.i.h.bf16 %v9676_v40  ;;  %v9677_v43 = vunpack.i.l.bf16 %v9676_v40 }
0x1672   :  { %v9427_v44 = vpack.c.bf16 %v9678_v42, %v9677_v43  ;;  %v2618_v43 = vsub.s32 3, %v10255_v20 }
0x1673   :  { %v9681_v45 = vpop.permute.xlu1 %9680 }
0x1674   :  { %9428 = vmatpush3.bf16.msra.mxu1 %v9427_v44  ;;  %v9683_v47 = vunpack.i.h.bf16 %v9681_v45  ;;  %v9682_v50 = vunpack.i.l.bf16 %v9681_v45  ;;  %v10636_v44 = vld [vmem:[#allocation10] sm:$0xff] }
0x1675   :  { %9429 = vmatprep.subr.bf16.mxu1 %v10087_v41  ;;  %v2619_v45 = vrot.slane %v10636_v44, %v2618_v43 }
0x1676   :  { %v9828_v46 = vpop.eup %9827  ;;  %v9430_v9 = vpack.c.bf16 %v9683_v47, %v9682_v50 }
0x1677   :  { %v3234_v51 = vmul.f32 %v9828_v46, %v9824_v31  ;;  %v3477_v52 = vpop.permute.xlu1 %3476 }
0x1679   :  { %8976 = vmatmul.mubr.msk.f32.vlgmr.msra.gmra.mrb[38].mxu1 %vm2354_vm4, %v3234_v51 }
0x167a   :  { %8987 = vmatprep.mubr.msk.f32.mxu1 %vm10079_vm1, %v10078_v17 }
0x167d   :  { %9432 = vmatpush3.bf16.xpose.msk.msra.mxu1 %vm10478_vm3, %v9430_v9 }
0x167e   :  { %9437 = vmatprep.subr.bf16.mxu1 %v10087_v41 }
0x1684   :  { %8988 = vmatmul.mubr.msk.f32.vlgmr.msra.gmra.mrb[40].mxu1 %vm300_vm2, %v3477_v52 }
0x1685   :  { %9001 = vmatprep.mubr.msk.f32.mxu1 %vm10079_vm1, %v10078_v17 }
0x16b3   :  { %v3310_v33 = vpop.f32.mrb[36].mxu1 }
0x16b4   :  { %v8970_v53 = vpop.f32.mrb[37].mxu1  ;;  %8980 = vmatprep.mubr.msk.f32.mxu0 %vm300_vm2, %v3310_v33 }
0x174c   :  { %v3389_v60 = vpop.f32.mrb[38].mxu1 }
0x174d   :  { %v8977_v61 = vpop.f32.mrb[39].mxu1  ;;  %8981 = vmatmul.mubr.msk.f32.vlgmr.msra.gmra.mrb[22].mxu0 %vm300_vm2, %v3389_v60 }
0x174e   :  { %9436 = vmatpush3.bf16.xpose.msk.msra.mxu0 %vm10478_vm3, %v9434_v59  ;;  %8994 = vmatprep.mubr.msk.f32.mxu0 %vm10079_vm1, %v10078_v17 }
0x174f   :  { %9440 = vmatprep.subr.bf16.mxu0 %v10087_v41 }
0x1755   :  { %8995 = vmatmul.mubr.msk.f32.vlgmr.msra.gmra.mrb[30].mxu0 %vm300_vm2, %v3559_v62 }
0x1756   :  { %9008 = vmatprep.mubr.msk.f32.mxu0 %vm10079_vm1, %v10078_v17 }
0x1757   :  { %v3554_v63 = vpop.f32.mrb[40].mxu1 }
0x1758   :  { %v8989_v0 = vpop.f32.mrb[41].mxu1  ;;  %v3640_v34 = vsel %vm2354_vm4, %v3554_v63, -inf }
0x1759   :  { %3641 = vmax.xlane.f32.xlu1 %v3640_v34  ;;  %v8331_v34 = vld [vmem:[%s11196_s3 + $0x48] sm:$0xff] }
0x17e6   :  { %v3642_v10 = vpop.xlane.xlu1 %3641 }
0x17e7   :  { %v3646_v1 = vsub.f32 %v3554_v63, %v3642_v10 }
0x17e9   :  { %v3648_v2 = vmul.f32 1.442695, %v3646_v1  ;;  %v8332_v1 = vld [vmem:[%s11196_s3 + $0x50] sm:$0xff] }
0x17eb   :  { %9829 = vpow2.f32 %v3648_v2  ;;  %v8333_v2 = vld [vmem:[%s11196_s3 + $0x58] sm:$0xff] }
0x17f5   :  { %v9830_v12 = vpop.eup %9829 }
0x17f6   :  { %v3652_v26 = vsel %vm2354_vm4, %v9830_v12, 0.0 }
0x1828   :  { %v3636_v3 = vpop.f32.mrb[30].mxu0 }
0x1829   :  { %v8996_v4 = vpop.f32.mrb[31].mxu0  ;;  %v3643_v22 = vsel %vm2354_vm4, %v3636_v3, -inf }
0x182a   :  { %3644 = vmax.xlane.f32.xlu0 %v3643_v22  ;;  %v4035_v4 = vld [vmem:[%s11198_s5] sm:$0xff]  ;;  %v4036_v22 = vld [vmem:[%s11198_s5 + $0x8] sm:$0xff] }
0x182e   :  { %3653 = vadd.xlane.f32.xlu0 %v3652_v26  ;;  %v9451_v26 = vpack.c.bf16 %v4036_v22, %v4035_v4 }
0x1844   :  { %9690 = vrot.lane.b32.xlu0 %v10485_v7, %s10086_s14 }
0x18b7   :  { %v3645_v27 = vpop.xlane.xlu0 %3644 }
0x18b8   :  { %v3647_v37 = vsub.f32 %v3636_v3, %v3645_v27  ;;  %v9447_v3 = vpack.c.bf16 %v8333_v2, %v8332_v1  ;;  %v4038_v27 = vld [vmem:[%s11198_s5 + $0x18] sm:$0xff] }
0x18ba   :  { %v3650_v13 = vmul.f32 1.442695, %v3647_v37 }
0x18bb   :  { %v3654_v5 = vpop.xlane.xlu0 %3653 }
0x18bc   :  { %9831 = vpow2.f32 %v3650_v13  ;;  %v4039_v13 = vld [vmem:[%s11198_s5 + $0x20] sm:$0xff] }
0x18bd   :  { %9833 = vrcp.f32 %v3654_v5  ;;  %v4040_v5 = vld [vmem:[%s11198_s5 + $0x28] sm:$0xff] }
0x18bf   :  { %v9691_v30 = vpop.permute.xlu0 %9690 }
0x18c0   :  { %v9693_v15 = vunpack.i.h.bf16 %v9691_v30  ;;  %v9692_v16 = vunpack.i.l.bf16 %v9691_v30  ;;  %v9459_v30 = vpack.c.bf16 %v4040_v5, %v4039_v13  ;;  %v8341_v5 = vld [vmem:[%s11196_s3 + $0x70] sm:$0xff] }
0x18c2   :  { %v9438_v18 = vpack.c.bf16 %v9693_v15, %v9692_v16 }
0x18c4   :  { %9439 = vmatpush3.bf16.msra.mxu1 %v9438_v18 }
0x18c6   :  { %v9832_v19 = vpop.eup %9831 }
0x18c7   :  { %v9834_v23 = vpop.eup %9833  ;;  %v3655_v24 = vsel %vm2354_vm4, %v9832_v19, 0.0 }
0x18c8   :  { %v3660_v25 = vmul.f32 %v9834_v23, %v9830_v12  ;;  %3656 = vadd.xlane.f32.xlu1 %v3655_v24  ;;  %v4037_v12 = vld [vmem:[%s11198_s5 + $0x10] sm:$0xff] }
0x18c9   :  { %v9455_v37 = vpack.c.bf16 %v4038_v27, %v4037_v12  ;;  %v8339_v27 = vld [vmem:[%s11196_s3 + $0x60] sm:$0xff] }
0x18ca   :  { %9002 = vmatmul.mubr.msk.f32.vlgmr.msra.gmra.mrb[42].mxu1 %vm2354_vm4, %v3660_v25  ;;  %v3933_v25 = vsub.s32 7, %v10255_v20 }
0x18d9   :  { %9695 = vrot.lane.b32.xlu1 %v10489_v8, %s10086_s14 }
0x1955   :  { %v3657_v7 = vpop.xlane.xlu1 %3656 }
0x1956   :  { %9835 = vrcp.f32 %v3657_v7  ;;  %v10678_v7 = vld [vmem:[#allocation10 + $0x8] sm:$0xff] }
0x1959   :  { %v9696_v28 = vpop.permute.xlu1 %9695 }
0x195a   :  { %v9698_v29 = vunpack.i.h.bf16 %v9696_v28  ;;  %v9697_v31 = vunpack.i.l.bf16 %v9696_v28  ;;  %v3934_v28 = vrot.slane %v10636_v44, %v3933_v25 }
0x195c   :  { %v9441_v32 = vpack.c.bf16 %v9698_v29, %v9697_v31 }
0x195e   :  { %9442 = vmatpush3.bf16.msra.mxu0 %v9441_v32 }
0x195f   :  { %9011 = vmatprep.subr.mxu0 %v2193_v35 }
0x1960   :  { %v9836_v38 = vpop.eup %9835 }
0x1961   :  { %v3661_v14 = vmul.f32 %v9836_v38, %v9832_v19  ;;  %v3940_v38 = vrot.slane %v10678_v7, %v10262_v21 }
0x1963   :  { %9009 = vmatmul.mubr.msk.f32.vlgmr.msra.gmra.mrb[32].mxu0 %vm2354_vm4, %v3661_v14 }
0x1964   :  { %9012 = vmatpush3.msra.mxu0 %v2193_v35 }
0x1965   :  { %9452 = vmatprep.subr.bf16.mxu0 %v9451_v26 }
0x199d   :  { %v3737_v39 = vpop.f32.mrb[42].mxu1 }
0x199e   :  { %v9003_v40 = vpop.f32.mrb[43].mxu1  ;;  %9013 = vmatprep.mubr.msk.f32.mxu0 %vm300_vm2, %v3737_v39 }
0x1a36   :  { %v3816_v42 = vpop.f32.mrb[32].mxu0 }
0x1a37   :  { %v9010_v8 = vpop.f32.mrb[33].mxu0  ;;  %9014 = vmatmul.mubr.msk.f32.vlgmr.msra.gmra.mrb[22].mxu0 %vm300_vm2, %v3816_v42 }
0x1a38   :  { %9454 = vmatpush3.bf16.msra.mxu0 %v9451_v26  ;;  %v4041_v8 = vld [vmem:[%s11198_s5 + $0x30] sm:$0xff] }
0x1a39   :  { %9456 = vmatprep.subr.bf16.mxu0 %v9455_v37 }
0x1a3c   :  { %9458 = vmatpush3.bf16.msra.mxu0 %v9455_v37  ;;  %v8340_v37 = vld [vmem:[%s11196_s3 + $0x68] sm:$0xff] }
0x1a3d   :  { %9460 = vmatprep.subr.bf16.mxu0 %v9459_v30  ;;  %v9467_v13 = vpack.c.bf16 %v8340_v37, %v8339_v27 }
0x1a40   :  { %9462 = vmatpush3.bf16.msra.mxu0 %v9459_v30  ;;  %v8342_v30 = vld [vmem:[%s11196_s3 + $0x78] sm:$0xff] }
0x1b0a   :  { %v9015_v46 = vpop.f32.mrb[22].mxu0 }
0x1b0b   :  { %v9581_v47 = vadd.f32 %v9015_v46, %v2619_v45  ;;  %v3892_v50 = vpop.f32.mrb[23].mxu0 }
0x1b0c   :  { %v9582_v51 = vadd.f32 %v3892_v50, %v2619_v45  ;;  %v4042_v45 = vld [vmem:[%s11198_s5 + $0x38] sm:$0xff] }
0x1b0d   :  { %v3904_v9 = vadd.f32 %v9581_v47, %v10462_v57  ;;  %v9463_v46 = vpack.c.bf16 %v4042_v45, %v4041_v8  ;;  %v9922_v47 = vld [vmem:[%s11199_s6] sm:$0xff] }
0x1b0e   :  { %v3903_v52 = vadd.f32 %v9582_v51, %v10464_v58  ;;  %v8330_v58 = vld [vmem:[%s11196_s3 + $0x40] sm:$0xff]  ;;  %v3951_v50 = vrot.slane %v9922_v47, %v10492_v11 }
0x1b0f   :  { %v3908_v33 = vsel %vm119_vm0, %v3904_v9, 0.0  ;;  %v9443_v10 = vpack.c.bf16 %v8331_v34, %v8330_v58  ;;  %9464 = vmatprep.subr.bf16.mxu0 %v9463_v46 }
0x1b10   :  { %3909 = vadd.xlane.f32.xlu0 %v3908_v33  ;;  %v3905_v53 = vsel %vm119_vm0, %v3903_v52, 0.0  ;;  %9466 = vmatpush3.bf16.msra.mxu0 %v9463_v46 }
0x1b11   :  { %3906 = vadd.xlane.f32.xlu1 %v3905_v53  ;;  %9444 = vmatprep.subr.bf16.mxu1 %v9443_v10 }
0x1b12   :  { %9446 = vmatpush3.bf16.msra.mxu1 %v9443_v10  ;;  %9068 = vmatprep.subr.mxu0 %v10078_v17 }
0x1b13   :  { %9448 = vmatprep.subr.bf16.mxu1 %v9447_v3 }
0x1b16   :  { %9450 = vmatpush3.bf16.msra.mxu1 %v9447_v3 }
0x1b17   :  { %9468 = vmatprep.subr.bf16.mxu1 %v9467_v13 }
0x1b9d   :  { %v3910_v54 = vpop.xlane.xlu0 %3909 }
0x1b9e   :  { %v3912_v55 = vmul.f32 0.03125, %v3910_v54  ;;  %v3907_v56 = vpop.xlane.xlu1 %3906 }
0x1b9f   :  { %v3911_v59 = vmul.f32 0.03125, %v3907_v56 }
0x1ba0   :  { %v3914_v60 = vsub.f32 %v3904_v9, %v3912_v55  ;;  %v4045_v55 = vsub.s32 4, %v10255_v20 }
0x1ba1   :  { %v3913_v61 = vsub.f32 %v3903_v52, %v3911_v59 }
0x1ba2   :  { %v3916_v62 = vmul.f32 %v3914_v60, %v3914_v60  ;;  %v4046_v56 = vrot.slane %v10636_v44, %v4045_v55 }
0x1ba3   :  { %v3915_v63 = vmul.f32 %v3913_v61, %v3913_v61 }
0x1ba4   :  { %v3920_v0 = vsel %vm119_vm0, %v3916_v62, 0.0 }
0x1ba5   :  { %3921 = vadd.xlane.f32.xlu1 %v3920_v0  ;;  %v3917_v57 = vsel %vm119_vm0, %v3915_v63, 0.0 }
0x1ba6   :  { %3918 = vadd.xlane.f32.xlu0 %v3917_v57 }
0x1c32   :  { %v3922_v15 = vpop.xlane.xlu1 %3921 }
0x1c33   :  { %v3924_v16 = vmul.f32 0.03125, %v3922_v15  ;;  %v3919_v18 = vpop.xlane.xlu0 %3918  ;;  %v9471_v15 = vpack.c.bf16 %v8342_v30, %v8341_v5 }
0x1c34   :  { %v3923_v19 = vmul.f32 0.03125, %v3919_v18  ;;  %v4270_v18 = vld [vmem:[#allocation8 + $0x88] sm:$0xff] }
0x1c35   :  { %v3926_v23 = vadd.f32 1e-05, %v3924_v16  ;;  %v4269_v16 = vld [vmem:[#allocation8 + $0x80] sm:$0xff] }
0x1c36   :  { %v3925_v24 = vadd.f32 1e-05, %v3923_v19  ;;  %v9475_v19 = vpack.c.bf16 %v4270_v18, %v4269_v16 }
0x1c37   :  { %9837 = vrsqrt.f32 %v3926_v23 }
0x1c38   :  { %9839 = vrsqrt.f32 %v3925_v24 }
0x1c41   :  { %v9838_v29 = vpop.eup %9837 }
0x1c42   :  { %v9840_v31 = vpop.eup %9839  ;;  %v3930_v32 = vmul.f32 %v9838_v29, %v3914_v60 }
0x1c43   :  { %v3929_v35 = vmul.f32 %v9840_v31, %v3913_v61 }
0x1c44   :  { %v3936_v14 = vmul.f32 %v3934_v28, %v3930_v32 }
0x1c45   :  { %v3935_v39 = vmul.f32 %v3934_v28, %v3929_v35  ;;  %v4160_v35 = vrot.slane %v10678_v7, %v10424_v36 }
0x1c46   :  { %v3942_v42 = vadd.f32 %v3940_v38, %v3936_v14 }
0x1c47   :  { %v3941_v40 = vadd.f32 %v3940_v38, %v3935_v39  ;;  %v4166_v39 = vrot.slane %v10678_v7, %v10492_v11  ;;  %v10738_v7 = vld [vmem:[#allocation5 + $0x8] sm:$0xff] }
0x1c49   :  { %9024 = vmatprep.mubr.msk.f32.mxu1 %vm119_vm0, %v3941_v40 }
0x1c4a   :  { %9025 = vmatmul.mubr.msk.f32.vlgmr.msra.gmra.mrb[44].mxu1 %vm119_vm0, %v3942_v42 }
0x1c4b   :  { %9470 = vmatpush3.bf16.msra.mxu1 %v9467_v13 }
0x1c4c   :  { %9472 = vmatprep.subr.bf16.mxu1 %v9471_v15 }
0x1c4f   :  { %9474 = vmatpush3.bf16.msra.mxu1 %v9471_v15 }
0x1c50   :  { %9476 = vmatprep.subr.bf16.mxu1 %v9475_v19 }
0x1d1d   :  { %v9026_v51 = vpop.f32.mrb[44].mxu1 }
0x1d1e   :  { %v4030_v9 = vadd.f32 %v9026_v51, %v3951_v50  ;;  %v4024_v52 = vpop.f32.mrb[45].mxu1  ;;  %v4272_v51 = vld [vmem:[#allocation8 + $0x98] sm:$0xff] }
0x1d1f   :  { %v4025_v33 = vadd.f32 %v4024_v52, %v3951_v50  ;;  %v4271_v50 = vld [vmem:[#allocation8 + $0x90] sm:$0xff] }
0x1d20   :  { %v4034_v54 = vmax.f32 %v4030_v9, 0.0  ;;  %v10732_v9 = vld [vmem:[#allocation5] sm:$0xff] }
0x1d21   :  { %v4033_v53 = vmax.f32 %v4025_v33, 0.0 }
0x1d23   :  { %9043 = vmatprep.mubr.msk.f32.mxu0 %vm4047_vm5, %v4033_v53  ;;  %v9479_v53 = vpack.c.bf16 %v4272_v51, %v4271_v50 }
0x1d24   :  { %9044 = vmatmul.mubr.msk.f32.vlgmr.msra.gmra.mrb[34].mxu0 %vm4047_vm5, %v4034_v54  ;;  %v10754_v54 = vld [vmem:[%s11199_s6 + $0x8] sm:$0xff] }
0x1d25   :  { %9070 = vmatprep.mubr.msk.f32.mxu0 %vm10079_vm1, %v10078_v17 }
0x1df7   :  { %v9045_v59 = vpop.f32.mrb[34].mxu0 }
0x1df8   :  { %v4126_v60 = vadd.f32 %v9045_v59, %v4046_v56  ;;  %v4120_v61 = vpop.f32.mrb[35].mxu0 }
0x1df9   :  { %v4121_v62 = vadd.f32 %v4120_v61, %v4046_v56  ;;  %v4186_v56 = vrot.slane %v10754_v54, %v10262_v21 }
0x1dfa   :  { %v4130_v63 = vadd.f32 %v4126_v60, %v3942_v42 }
0x1dfb   :  { %v4129_v0 = vadd.f32 %v4121_v62, %v3941_v40 }
0x1dfc   :  { %v4134_v57 = vsel %vm119_vm0, %v4130_v63, 0.0 }
0x1dfd   :  { %4135 = vadd.xlane.f32.xlu1 %v4134_v57  ;;  %v4131_v58 = vsel %vm119_vm0, %v4129_v0, 0.0  ;;  %v10766_v57 = vld [vmem:[#allocation10 + $0x10] sm:$0xff] }
0x1dfe   :  { %4132 = vadd.xlane.f32.xlu0 %v4131_v58  ;;  %v4276_v58 = vrot.slane %v10766_v57, %v10262_v21 }
0x1e8a   :  { %v4136_v34 = vpop.xlane.xlu1 %4135 }
0x1e8b   :  { %v4138_v10 = vmul.f32 0.03125, %v4136_v34  ;;  %v4133_v1 = vpop.xlane.xlu0 %4132 }
0x1e8c   :  { %v4137_v2 = vmul.f32 0.03125, %v4133_v1 }
0x1e8d   :  { %v4140_v3 = vsub.f32 %v4130_v63, %v4138_v10 }
0x1e8e   :  { %v4139_v4 = vsub.f32 %v4129_v0, %v4137_v2 }
0x1e8f   :  { %v4142_v22 = vmul.f32 %v4140_v3, %v4140_v3 }
0x1e90   :  { %v4141_v44 = vmul.f32 %v4139_v4, %v4139_v4 }
0x1e91   :  { %v4146_v12 = vsel %vm119_vm0, %v4142_v22, 0.0 }
0x1e92   :  { %4147 = vadd.xlane.f32.xlu1 %v4146_v12  ;;  %v4143_v26 = vsel %vm119_vm0, %v4141_v44, 0.0 }
0x1e93   :  { %4144 = vadd.xlane.f32.xlu0 %v4143_v26 }
0x1f1f   :  { %v4148_v23 = vpop.xlane.xlu1 %4147 }
0x1f20   :  { %v4150_v24 = vmul.f32 0.03125, %v4148_v23  ;;  %v4145_v28 = vpop.xlane.xlu0 %4144 }
0x1f21   :  { %v4149_v29 = vmul.f32 0.03125, %v4145_v28 }
0x1f22   :  { %v4152_v31 = vadd.f32 1e-05, %v4150_v24 }
0x1f23   :  { %v4151_v32 = vadd.f32 1e-05, %v4149_v29  ;;  %v4359_v29 = vld [vmem:[#allocation8 + $0xa0] sm:$0xff] }
0x1f24   :  { %9841 = vrsqrt.f32 %v4152_v31 }
0x1f25   :  { %9843 = vrsqrt.f32 %v4151_v32 }
0x1f2e   :  { %v9842_v38 = vpop.eup %9841 }
0x1f2f   :  { %v9844_v14 = vpop.eup %9843  ;;  %v4156_v40 = vmul.f32 %v9842_v38, %v4140_v3 }
0x1f30   :  { %v4155_v42 = vmul.f32 %v9844_v14, %v4139_v4 }
0x1f31   :  { %v4162_v8 = vmul.f32 %v4160_v35, %v4156_v40 }
0x1f32   :  { %v4161_v45 = vmul.f32 %v4160_v35, %v4155_v42 }
0x1f33   :  { %v10726_v46 = vadd.f32 %v4166_v39, %v4162_v8 }
0x1f34   :  { %v10728_v47 = vadd.f32 %v4166_v39, %v4161_v45 }
0x1f35   :  { %4170 = vst.msk [vmem:[#allocation11 + $0x8] sm:$0xff] %vm119_vm0, %v10726_v46  ;;  %v4177_v33 = vadd.f32 %v10738_v7, %v10726_v46 }
0x1f36   :  { %v4176_v52 = vadd.f32 %v10732_v9, %v10728_v47  ;;  %4169 = vst.msk [vmem:[#allocation11] sm:$0xff] %vm119_vm0, %v10728_v47 }
0x1f38   :  { %9054 = vmatprep.mubr.msk.f32.mxu1 %vm119_vm0, %v4176_v52 }
0x1f39   :  { %9055 = vmatmul.mubr.msk.f32.vlgmr.msra.gmra.mrb[46].mxu1 %vm119_vm0, %v4177_v33 }
0x1f3a   :  { %9478 = vmatpush3.bf16.msra.mxu1 %v9475_v19  ;;  %9065 = vmatprep.mubr.msk.f32.mxu1 %vm119_vm0, %v10728_v47 }
0x1f3b   :  { %9480 = vmatprep.subr.bf16.mxu1 %v9479_v53 }
0x1f3e   :  { %9482 = vmatpush3.bf16.msra.mxu1 %v9479_v53 }
0x1f3f   :  { %9073 = vmatprep.subr.mxu1 %v10078_v17 }
0x1f41   :  { %9066 = vmatmul.mubr.msk.f32.vlgmr.msra.gmra.mrb[48].mxu1 %vm119_vm0, %v10726_v46 }
0x1f42   :  { %9075 = vmatprep.mubr.msk.f32.mxu1 %vm10079_vm1, %v10078_v17 }
0x200c   :  { %v9056_v59 = vpop.f32.mrb[46].mxu1 }
0x200d   :  { %v10758_v60 = vadd.f32 %v9056_v59, %v4186_v56  ;;  %v4259_v61 = vpop.f32.mrb[47].mxu1 }
0x200e   :  { %v10760_v62 = vadd.f32 %v4259_v61, %v4186_v56 }
0x200f   :  { %4444 = vrot.lane.b32.xlu1 %v10758_v60, %s10080_s28  ;;  %v10773_v1 = vmul.f32 0.35355338, %v10758_v60 }
0x2010   :  { %4366 = vrot.lane.b32.xlu0 %v10760_v62, %s10080_s28  ;;  %v10779_v3 = vmul.f32 0.35355338, %v10760_v62 }
0x2014   :  { %v9067_v63 = vpop.f32.mrb[48].mxu1 }
0x2015   :  { %v4349_v0 = vpop.f32.mrb[49].mxu1  ;;  %v10776_v2 = vadd.f32 %v9067_v63, %v4276_v58 }
0x2016   :  { %v10782_v4 = vadd.f32 %v4349_v0, %v4276_v58 }
0x2081   :  { %v4445_v34 = vpop.permute.xlu1 %4444 }
0x2082   :  { %9074 = vmatpush3.xpose.msk.msra.mxu1 %vm300_vm2, %v4445_v34  ;;  %v4367_v10 = vpop.permute.xlu0 %4366 }
0x2083   :  { %9069 = vmatpush3.xpose.msk.msra.mxu0 %vm300_vm2, %v4367_v10  ;;  %9083 = vmatprep.subr.mxu1 %v10078_v17 }
0x2084   :  { %9078 = vmatprep.subr.mxu0 %v10078_v17 }
0x2085   :  { %9076 = vmatmul.mubr.msk.f32.vlgmr.msra.gmra.mrb[50].mxu1 %vm300_vm2, %v10773_v1 }
0x2086   :  { %9071 = vmatmul.mubr.msk.f32.vlgmr.msra.gmra.mrb[36].mxu0 %vm300_vm2, %v10779_v3  ;;  %9084 = vmatpush3.msra.mxu1 %v10776_v2 }
0x2087   :  { %9079 = vmatpush3.msra.mxu0 %v10782_v4  ;;  %9085 = vmatprep.mubr.msk.f32.mxu1 %vm10079_vm1, %v10078_v17 }
0x2088   :  { %9093 = vmatprep.subr.mxu1 %v10078_v17  ;;  %9080 = vmatprep.mubr.msk.f32.mxu0 %vm10079_vm1, %v10078_v17 }
0x2089   :  { %9088 = vmatprep.subr.mxu0 %v4359_v29 }
0x2158   :  { %v4517_v22 = vpop.f32.mrb[50].mxu1 }
0x2159   :  { %v4439_v44 = vpop.f32.mrb[36].mxu0  ;;  %v9077_v12 = vpop.f32.mrb[51].mxu1  ;;  %v4524_v26 = vsel %vm300_vm2, %v4517_v22, -inf }
0x215a   :  { %4525 = vmax.xlane.f32.xlu0 %v4524_v26  ;;  %v9072_v27 = vpop.f32.mrb[37].mxu0  ;;  %v4521_v37 = vsel %vm300_vm2, %v4439_v44, -inf }
0x215b   :  { %4522 = vmax.xlane.f32.xlu1 %v4521_v37 }
0x21e7   :  { %v4526_v13 = vpop.xlane.xlu0 %4525 }
0x21e8   :  { %v4528_v5 = vsub.f32 %v4517_v22, %v4526_v13  ;;  %v4523_v30 = vpop.xlane.xlu1 %4522 }
0x21e9   :  { %v4527_v15 = vsub.f32 %v4439_v44, %v4523_v30 }
0x21ea   :  { %v4531_v16 = vmul.f32 1.442695, %v4528_v5 }
0x21eb   :  { %v4529_v18 = vmul.f32 1.442695, %v4527_v15 }
0x21ec   :  { %9845 = vpow2.f32 %v4531_v16 }
0x21ed   :  { %9847 = vpow2.f32 %v4529_v18 }
0x21f6   :  { %v9846_v19 = vpop.eup %9845 }
0x21f7   :  { %v9848_v23 = vpop.eup %9847  ;;  %v4536_v24 = vsel %vm300_vm2, %v9846_v19, 0.0 }
0x21f8   :  { %4537 = vadd.xlane.f32.xlu1 %v4536_v24  ;;  %v4533_v28 = vsel %vm300_vm2, %v9848_v23, 0.0 }
0x21f9   :  { %4534 = vadd.xlane.f32.xlu0 %v4533_v28 }
0x2209   :  { %4776 = vrot.lane.b32.xlu1 %v10779_v3, %s10082_s9 }
0x220d   :  { %4856 = vrot.lane.b32.xlu1 %v10758_v60, %s10081_s0 }
0x220f   :  { %4778 = vrot.lane.b32.xlu0 %v10760_v62, %s10081_s0 }
0x2213   :  { %4854 = vrot.lane.b32.xlu0 %v10773_v1, %s10082_s9 }
0x2285   :  { %v4538_v31 = vpop.xlane.xlu1 %4537 }
0x2286   :  { %9849 = vrcp.f32 %v4538_v31  ;;  %v4535_v32 = vpop.xlane.xlu0 %4534 }
0x2287   :  { %9851 = vrcp.f32 %v4535_v32 }
0x2289   :  { %v4777_v42 = vpop.permute.xlu1 %4776 }
0x228a   :  { %v4779_v40 = vpop.permute.xlu0 %4778 }
0x228d   :  { %v4857_v52 = vpop.permute.xlu1 %4856 }
0x228e   :  { %v4855_v59 = vpop.permute.xlu0 %4854 }
0x2290   :  { %v9850_v35 = vpop.eup %9849 }
0x2291   :  { %v9852_v38 = vpop.eup %9851  ;;  %v4542_v14 = vmul.f32 %v9850_v35, %v9846_v19 }
0x2292   :  { %v4541_v39 = vmul.f32 %v9852_v38, %v9848_v23 }
0x2293   :  { %9086 = vmatmul.mubr.msk.f32.vlgmr.msra.gmra.mrb[52].mxu1 %vm300_vm2, %v4542_v14 }
0x2294   :  { %9094 = vmatpush3.xpose.msk.msra.mxu1 %vm300_vm2, %v4779_v40  ;;  %9081 = vmatmul.mubr.msk.f32.vlgmr.msra.gmra.mrb[38].mxu0 %vm300_vm2, %v4541_v39  ;;  %v4360_v40 = vld [vmem:[#allocation8 + $0xa8] sm:$0xff] }
0x2295   :  { %9095 = vmatprep.mubr.msk.f32.mxu1 %vm10079_vm1, %v10078_v17  ;;  %9089 = vmatpush3.msra.mxu0 %v4359_v29 }
0x2296   :  { %9098 = vmatprep.subr.mxu0 %v10078_v17  ;;  %9103 = vmatprep.subr.mxu1 %v10078_v17 }
0x2297   :  { %9096 = vmatmul.mubr.msk.f32.vlgmr.msra.gmra.mrb[54].mxu1 %vm300_vm2, %v4777_v42 }
0x2298   :  { %9105 = vmatprep.mubr.msk.f32.mxu1 %vm10079_vm1, %v10078_v17 }
0x2366   :  { %v4685_v8 = vpop.f32.mrb[52].mxu1 }
0x2367   :  { %v4612_v45 = vpop.f32.mrb[38].mxu0  ;;  %v9087_v50 = vpop.f32.mrb[53].mxu1 }
0x2368   :  { %v9082_v51 = vpop.f32.mrb[39].mxu0  ;;  %9090 = vmatprep.mubr.msk.f32.mxu0 %vm300_vm2, %v4612_v45 }
0x2369   :  { %9091 = vmatmul.mubr.msk.f32.vlgmr.msra.gmra.mrb[40].mxu0 %vm300_vm2, %v4685_v8 }
0x236a   :  { %9099 = vmatpush3.xpose.msk.msra.mxu0 %vm300_vm2, %v4857_v52  ;;  %v4850_v33 = vpop.f32.mrb[54].mxu1  ;;  %9100 = vmatprep.mubr.msk.f32.mxu0 %vm10079_vm1, %v10078_v17 }
0x236b   :  { %v9097_v53 = vpop.f32.mrb[55].mxu1  ;;  %v4932_v56 = vsel %vm300_vm2, %v4850_v33, -inf  ;;  %9108 = vmatprep.subr.mxu0 %v10078_v17 }
0x236c   :  { %4933 = vmax.xlane.f32.xlu1 %v4932_v56 }
0x236d   :  { %9101 = vmatmul.mubr.msk.f32.vlgmr.msra.gmra.mrb[42].mxu0 %vm300_vm2, %v4855_v59 }
0x236e   :  { %9110 = vmatprep.mubr.msk.f32.mxu0 %vm10079_vm1, %v10078_v17 }
0x237d   :  { %5193 = vrot.lane.b32.xlu1 %v10760_v62, %s10083_s10 }
0x2381   :  { %5191 = vrot.lane.b32.xlu1 %v10779_v3, %s10084_s11 }
0x2385   :  { %5269 = vrot.lane.b32.xlu1 %v10773_v1, %s10084_s11 }
0x23f9   :  { %v4934_v61 = vpop.xlane.xlu1 %4933 }
0x23fa   :  { %v4938_v63 = vsub.f32 %v4850_v33, %v4934_v61 }
0x23fc   :  { %v4940_v0 = vmul.f32 1.442695, %v4938_v63  ;;  %v4361_v63 = vld [vmem:[#allocation8 + $0xb0] sm:$0xff] }
0x23fd   :  { %v5194_v27 = vpop.permute.xlu1 %5193 }
0x23fe   :  { %9853 = vpow2.f32 %v4940_v0 }
0x2408   :  { %v9854_v58 = vpop.eup %9853 }
0x2409   :  { %v4944_v34 = vsel %vm300_vm2, %v9854_v58, 0.0 }
0x240a   :  { %4945 = vadd.xlane.f32.xlu0 %v4944_v34 }
0x2420   :  { %4955 = vrot.lane.b32.xlu0 %v10782_v4, %s10082_s9 }
0x2424   :  { %5271 = vrot.lane.b32.xlu0 %v10758_v60, %s10083_s10 }
0x2440   :  { %v4928_v10 = vpop.f32.mrb[42].mxu0 }
0x2441   :  { %v9102_v22 = vpop.f32.mrb[43].mxu0  ;;  %v4935_v44 = vsel %vm300_vm2, %v4928_v10, -inf }
0x2443   :  { %4936 = vmax.xlane.f32.xlu0 %v4935_v44 }
0x2459   :  { %5032 = vrot.lane.b32.xlu0 %v10776_v2, %s10082_s9 }
0x245d   :  { %5369 = vrot.lane.b32.xlu0 %v10782_v4, %s10084_s11 }
0x2461   :  { %5606 = vrot.lane.b32.xlu0 %v10760_v62, %s10086_s14  ;;  %v5192_v62 = vpop.permute.xlu1 %5191 }
0x2465   :  { %5684 = vrot.lane.b32.xlu0 %v10758_v60, %s10086_s14 }
0x2469   :  { %5604 = vrot.lane.b32.xlu0 %v10779_v3, %s10085_s13 }
0x246d   :  { %5682 = vrot.lane.b32.xlu0 %v10773_v1, %s10085_s13  ;;  %v5270_v1 = vpop.permute.xlu1 %5269 }
0x2497   :  { %v4946_v12 = vpop.xlane.xlu0 %4945 }
0x2498   :  { %9855 = vrcp.f32 %v4946_v12 }
0x249b   :  { %v4956_v26 = vpop.permute.xlu0 %4955 }
0x249c   :  { %9104 = vmatpush3.msra.mxu1 %v4956_v26 }
0x249d   :  { %9118 = vmatprep.subr.mxu1 %v10078_v17 }
0x249f   :  { %v5272_v60 = vpop.permute.xlu0 %5271 }
0x24a2   :  { %v9856_v37 = vpop.eup %9855 }
0x24a3   :  { %v4952_v13 = vmul.f32 %v9856_v37, %v9854_v58 }
0x24a5   :  { %9106 = vmatmul.mubr.msk.f32.vlgmr.msra.gmra.mrb[56].mxu1 %vm300_vm2, %v4952_v13 }
0x24a6   :  { %9119 = vmatpush3.xpose.msk.msra.mxu1 %vm300_vm2, %v5194_v27  ;;  %9120 = vmatprep.mubr.msk.f32.mxu1 %vm10079_vm1, %v10078_v17 }
0x24a7   :  { %9123 = vmatprep.subr.mxu1 %v10078_v17 }
0x24a9   :  { %9121 = vmatmul.mubr.msk.f32.vlgmr.msra.gmra.mrb[58].mxu1 %vm300_vm2, %v5192_v62 }
0x24aa   :  { %9124 = vmatpush3.xpose.msk.msra.mxu1 %vm300_vm2, %v5272_v60  ;;  %9125 = vmatprep.mubr.msk.f32.mxu1 %vm10079_vm1, %v10078_v17 }
0x24ab   :  { %9133 = vmatprep.subr.mxu1 %v10078_v17 }
0x24ad   :  { %9126 = vmatmul.mubr.msk.f32.vlgmr.msra.gmra.mrb[60].mxu1 %vm300_vm2, %v5270_v1 }
0x24ae   :  { %9135 = vmatprep.mubr.msk.f32.mxu1 %vm10079_vm1, %v10078_v17 }
0x24d0   :  { %v4937_v3 = vpop.xlane.xlu0 %4936 }
0x24d1   :  { %v4939_v5 = vsub.f32 %v4928_v10, %v4937_v3 }
0x24d3   :  { %v4942_v30 = vmul.f32 1.442695, %v4939_v5 }
0x24d4   :  { %v5033_v15 = vpop.permute.xlu0 %5032 }
0x24d5   :  { %9857 = vpow2.f32 %v4942_v30  ;;  %9109 = vmatpush3.msra.mxu0 %v5033_v15 }
0x24d6   :  { %9113 = vmatprep.subr.mxu0 %v4360_v40 }
0x24d8   :  { %v5370_v0 = vpop.permute.xlu0 %5369 }
0x24dc   :  { %v5607_v44 = vpop.permute.xlu0 %5606 }
0x24df   :  { %v9858_v16 = vpop.eup %9857 }
0x24e0   :  { %v4947_v18 = vsel %vm300_vm2, %v9858_v16, 0.0  ;;  %v5685_v37 = vpop.permute.xlu0 %5684 }
0x24e1   :  { %4948 = vadd.xlane.f32.xlu1 %v4947_v18 }
0x24e4   :  { %v5605_v62 = vpop.permute.xlu0 %5604 }
0x24e8   :  { %v5683_v30 = vpop.permute.xlu0 %5682 }
0x256e   :  { %v4949_v19 = vpop.xlane.xlu1 %4948 }
0x256f   :  { %9859 = vrcp.f32 %v4949_v19 }
0x2578   :  { %v5027_v23 = vpop.f32.mrb[56].mxu1 }
0x2579   :  { %v9860_v24 = vpop.eup %9859  ;;  %v9107_v28 = vpop.f32.mrb[57].mxu1 }
0x257a   :  { %v4953_v29 = vmul.f32 %v9860_v24, %v9858_v16 }
0x257c   :  { %9111 = vmatmul.mubr.msk.f32.vlgmr.msra.gmra.mrb[44].mxu0 %vm300_vm2, %v4953_v29  ;;  %v5265_v31 = vpop.f32.mrb[58].mxu1 }
0x257d   :  { %9115 = vmatprep.mubr.msk.f32.mxu0 %vm300_vm2, %v5027_v23  ;;  %v9122_v32 = vpop.f32.mrb[59].mxu1  ;;  %v5347_v35 = vsel %vm300_vm2, %v5265_v31, -inf  ;;  %9114 = vmatpush3.msra.mxu0 %v4360_v40 }
0x257e   :  { %5348 = vmax.xlane.f32.xlu1 %v5347_v35  ;;  %9128 = vmatprep.subr.mxu0 %v10078_v17 }
0x2580   :  { %v5343_v38 = vpop.f32.mrb[60].mxu1 }
0x2581   :  { %v9127_v14 = vpop.f32.mrb[61].mxu1  ;;  %v5350_v39 = vsel %vm300_vm2, %v5343_v38, -inf }
0x2582   :  { %5351 = vmax.xlane.f32.xlu1 %v5350_v39 }
0x260b   :  { %v5349_v42 = vpop.xlane.xlu1 %5348 }
0x260c   :  { %v5353_v8 = vsub.f32 %v5265_v31, %v5349_v42 }
0x260e   :  { %v5355_v45 = vmul.f32 1.442695, %v5353_v8 }
0x260f   :  { %v5352_v50 = vpop.xlane.xlu1 %5351 }
0x2610   :  { %9861 = vpow2.f32 %v5355_v45  ;;  %v5354_v51 = vsub.f32 %v5343_v38, %v5352_v50 }
0x2612   :  { %v5357_v52 = vmul.f32 1.442695, %v5354_v51 }
0x2614   :  { %9863 = vpow2.f32 %v5357_v52  ;;  %v4362_v52 = vld [vmem:[#allocation8 + $0xb8] sm:$0xff] }
0x261a   :  { %v9862_v33 = vpop.eup %9861 }
0x261b   :  { %v5359_v53 = vsel %vm300_vm2, %v9862_v33, 0.0 }
0x261c   :  { %5360 = vadd.xlane.f32.xlu1 %v5359_v53 }
0x261e   :  { %v9864_v56 = vpop.eup %9863 }
0x261f   :  { %v5362_v59 = vsel %vm300_vm2, %v9864_v56, 0.0 }
0x2620   :  { %5363 = vadd.xlane.f32.xlu1 %v5362_v59 }
0x2631   :  { %5445 = vrot.lane.b32.xlu1 %v10776_v2, %s10084_s11 }
0x264f   :  { %v5104_v61 = vpop.f32.mrb[44].mxu0 }
0x2650   :  { %v9112_v58 = vpop.f32.mrb[45].mxu0  ;;  %9116 = vmatmul.mubr.msk.f32.vlgmr.msra.gmra.mrb[40].mxu0 %vm300_vm2, %v5104_v61 }
0x2651   :  { %9129 = vmatpush3.msra.mxu0 %v5370_v0  ;;  %9130 = vmatprep.mubr.msk.f32.mxu0 %vm10079_vm1, %v10078_v17  ;;  %v4773_v58 = vrot.slane %v10766_v57, %v10424_v36 }
0x2652   :  { %9138 = vmatprep.subr.mxu0 %v4361_v63 }
0x26a9   :  { %v5361_v34 = vpop.xlane.xlu1 %5360 }
0x26aa   :  { %9865 = vrcp.f32 %v5361_v34 }
0x26ad   :  { %v5364_v10 = vpop.xlane.xlu1 %5363 }
0x26ae   :  { %9867 = vrcp.f32 %v5364_v10 }
0x26b1   :  { %v5446_v22 = vpop.permute.xlu1 %5445 }
0x26b2   :  { %9134 = vmatpush3.msra.mxu1 %v5446_v22 }
0x26b3   :  { %9143 = vmatprep.subr.mxu1 %v10078_v17 }
0x26b4   :  { %v9866_v12 = vpop.eup %9865 }
0x26b5   :  { %v5367_v26 = vmul.f32 %v9866_v12, %v9862_v33 }
0x26b7   :  { %9131 = vmatmul.mubr.msk.f32.vlgmr.msra.gmra.mrb[46].mxu0 %vm300_vm2, %v5367_v26 }
0x26b8   :  { %v9868_v27 = vpop.eup %9867  ;;  %9139 = vmatpush3.msra.mxu0 %v4361_v63 }
0x26b9   :  { %v5368_v13 = vmul.f32 %v9868_v27, %v9864_v56  ;;  %9148 = vmatprep.subr.mxu0 %v10078_v17 }
0x26bb   :  { %9136 = vmatmul.mubr.msk.f32.vlgmr.msra.gmra.mrb[62].mxu1 %vm300_vm2, %v5368_v13 }
0x26bc   :  { %9144 = vmatpush3.xpose.msk.msra.mxu1 %vm300_vm2, %v5607_v44  ;;  %9145 = vmatprep.mubr.msk.f32.mxu1 %vm10079_vm1, %v10078_v17 }
0x26bd   :  { %9153 = vmatprep.subr.mxu1 %v10078_v17 }
0x26bf   :  { %9146 = vmatmul.mubr.msk.f32.vlgmr.msra.gmra.mrb[64].mxu1 %vm300_vm2, %v5605_v62 }
0x26c0   :  { %9155 = vmatprep.mubr.msk.f32.mxu1 %vm10079_vm1, %v10078_v17 }
0x278a   :  { %v5441_v60 = vpop.f32.mrb[46].mxu0 }
0x278b   :  { %v9132_v1 = vpop.f32.mrb[47].mxu0  ;;  %9140 = vmatprep.mubr.msk.f32.mxu0 %vm300_vm2, %v5441_v60 }
0x278e   :  { %v5517_v3 = vpop.f32.mrb[62].mxu1 }
0x278f   :  { %v9137_v5 = vpop.f32.mrb[63].mxu1  ;;  %9141 = vmatmul.mubr.msk.f32.vlgmr.msra.gmra.mrb[40].mxu0 %vm300_vm2, %v5517_v3 }
0x2790   :  { %9149 = vmatpush3.xpose.msk.msra.mxu0 %vm300_vm2, %v5685_v37  ;;  %9150 = vmatprep.mubr.msk.f32.mxu0 %vm10079_vm1, %v10078_v17 }
0x2791   :  { %9158 = vmatprep.subr.mxu0 %v10078_v17 }
0x2792   :  { %v5678_v15 = vpop.f32.mrb[64].mxu1 }
0x2793   :  { %v9147_v16 = vpop.f32.mrb[65].mxu1  ;;  %9151 = vmatmul.mubr.msk.f32.vlgmr.msra.gmra.mrb[48].mxu0 %vm300_vm2, %v5683_v30  ;;  %v5760_v18 = vsel %vm300_vm2, %v5678_v15, -inf }
0x2794   :  { %5761 = vmax.xlane.f32.xlu1 %v5760_v18  ;;  %9160 = vmatprep.mubr.msk.f32.mxu0 %vm10079_vm1, %v10078_v17  ;;  %v8382_v18 = vld [vmem:[%s11196_s3 + $0x88] sm:$0xff] }
0x2821   :  { %v5762_v19 = vpop.xlane.xlu1 %5761 }
0x2822   :  { %v5766_v23 = vsub.f32 %v5678_v15, %v5762_v19 }
0x2824   :  { %v5768_v24 = vmul.f32 1.442695, %v5766_v23  ;;  %v8383_v23 = vld [vmem:[%s11196_s3 + $0x90] sm:$0xff] }
0x2826   :  { %9869 = vpow2.f32 %v5768_v24  ;;  %v8384_v24 = vld [vmem:[%s11196_s3 + $0x98] sm:$0xff] }
0x2830   :  { %v9870_v32 = vpop.eup %9869 }
0x2831   :  { %v5772_v35 = vsel %vm300_vm2, %v9870_v32, 0.0 }
0x2866   :  { %v5756_v28 = vpop.f32.mrb[48].mxu0 }
0x2867   :  { %v9152_v29 = vpop.f32.mrb[49].mxu0  ;;  %v5763_v31 = vsel %vm300_vm2, %v5756_v28, -inf }
0x2868   :  { %5764 = vmax.xlane.f32.xlu0 %v5763_v31  ;;  %v9926_v29 = vld [vmem:[#allocation7 + $0x8] sm:$0xff]  ;;  %v9927_v31 = vld [vmem:[#allocation7 + $0x10] sm:$0xff] }
0x286c   :  { %5773 = vadd.xlane.f32.xlu0 %v5772_v35  ;;  %v6061_v35 = vld [vmem:[#allocation8 + $0xc8] sm:$0xff] }
0x2882   :  { %5782 = vrot.lane.b32.xlu0 %v10782_v4, %s10085_s13 }
0x28f5   :  { %v5765_v38 = vpop.xlane.xlu0 %5764 }
0x28f6   :  { %v5767_v14 = vsub.f32 %v5756_v28, %v5765_v38  ;;  %v9495_v28 = vpack.c.bf16 %v8384_v24, %v8383_v23 }
0x28f8   :  { %v5770_v39 = vmul.f32 1.442695, %v5767_v14  ;;  %v6062_v14 = vld [vmem:[#allocation8 + $0xd0] sm:$0xff] }
0x28f9   :  { %v5774_v40 = vpop.xlane.xlu0 %5773 }
0x28fa   :  { %9871 = vpow2.f32 %v5770_v39  ;;  %v6063_v39 = vld [vmem:[#allocation8 + $0xd8] sm:$0xff] }
0x28fb   :  { %9873 = vrcp.f32 %v5774_v40  ;;  %v9487_v40 = vpack.c.bf16 %v6063_v39, %v6062_v14 }
0x28fd   :  { %v5783_v42 = vpop.permute.xlu0 %5782 }
0x28fe   :  { %9154 = vmatpush3.msra.mxu1 %v5783_v42  ;;  %v9928_v42 = vld [vmem:[#allocation7 + $0x18] sm:$0xff] }
0x2904   :  { %v9872_v8 = vpop.eup %9871 }
0x2905   :  { %v9874_v45 = vpop.eup %9873  ;;  %v5775_v50 = vsel %vm300_vm2, %v9872_v8, 0.0 }
0x2906   :  { %v5780_v51 = vmul.f32 %v9874_v45, %v9870_v32  ;;  %5776 = vadd.xlane.f32.xlu1 %v5775_v50  ;;  %v6060_v32 = vld [vmem:[#allocation8 + $0xc0] sm:$0xff] }
0x2907   :  { %v9483_v38 = vpack.c.bf16 %v6061_v35, %v6060_v32 }
0x2908   :  { %9156 = vmatmul.mubr.msk.f32.vlgmr.msra.gmra.mrb[66].mxu1 %vm300_vm2, %v5780_v51 }
0x2909   :  { %9484 = vmatprep.subr.bf16.mxu1 %v9483_v38 }
0x290a   :  { %9486 = vmatpush3.bf16.msra.mxu1 %v9483_v38 }
0x290b   :  { %9488 = vmatprep.subr.bf16.mxu1 %v9487_v40 }
0x290e   :  { %9490 = vmatpush3.bf16.msra.mxu1 %v9487_v40 }
0x290f   :  { %9499 = vmatprep.subr.bf16.mxu1 %v10087_v41 }
0x2917   :  { %5858 = vrot.lane.b32.xlu1 %v10776_v2, %s10085_s13  ;;  %v9925_v2 = vld [vmem:[#allocation7] sm:$0xff] }
0x2993   :  { %v5777_v4 = vpop.xlane.xlu1 %5776 }
0x2994   :  { %9875 = vrcp.f32 %v5777_v4 }
0x2997   :  { %v5859_v33 = vpop.permute.xlu1 %5858 }
0x2998   :  { %9159 = vmatpush3.msra.mxu0 %v5859_v33  ;;  %v6048_v33 = vrot.slane %v10766_v57, %v1981_v48 }
0x2999   :  { %9163 = vmatprep.subr.mxu0 %v4362_v52 }
0x299e   :  { %v9876_v53 = vpop.eup %9875 }
0x299f   :  { %v5781_v56 = vmul.f32 %v9876_v53, %v9872_v8 }
0x29a1   :  { %9161 = vmatmul.mubr.msk.f32.vlgmr.msra.gmra.mrb[50].mxu0 %vm300_vm2, %v5781_v56 }
0x29a2   :  { %9164 = vmatpush3.msra.mxu0 %v4362_v52 }
0x29db   :  { %v5854_v59 = vpop.f32.mrb[66].mxu1 }
0x29dc   :  { %v9157_v61 = vpop.f32.mrb[67].mxu1  ;;  %9165 = vmatprep.mubr.msk.f32.mxu0 %vm300_vm2, %v5854_v59 }
0x29dd   :  { %v6054_v61 = vrot.slane %v10766_v57, %v1987_v49  ;;  %v6157_v49 = vrot.slane %v10754_v54, %v10424_v36 }
0x2a74   :  { %v5930_v63 = vpop.f32.mrb[50].mxu0 }
0x2a75   :  { %v9162_v0 = vpop.f32.mrb[51].mxu0  ;;  %9166 = vmatmul.mubr.msk.f32.vlgmr.msra.gmra.mrb[40].mxu0 %vm300_vm2, %v5930_v63 }
0x2a76   :  { %9187 = vmatprep.mubr.msk.f32.mxu0 %vm119_vm0, %v9925_v2 }
0x2b48   :  { %v9167_v34 = vpop.f32.mrb[40].mxu0 }
0x2b49   :  { %v9583_v10 = vadd.f32 %v9167_v34, %v4773_v58  ;;  %v6006_v22 = vpop.f32.mrb[41].mxu0 }
0x2b4a   :  { %v9584_v44 = vadd.f32 %v6006_v22, %v4773_v58 }
0x2b4b   :  { %v6018_v12 = vadd.f32 %v9583_v10, %v10726_v46 }
0x2b4c   :  { %v6017_v26 = vadd.f32 %v9584_v44, %v10728_v47  ;;  %v8381_v47 = vld [vmem:[%s11196_s3 + $0x80] sm:$0xff] }
0x2b4d   :  { %v6022_v27 = vsel %vm119_vm0, %v6018_v12, 0.0  ;;  %v9491_v19 = vpack.c.bf16 %v8382_v18, %v8381_v47 }
0x2b4e   :  { %6023 = vadd.xlane.f32.xlu0 %v6022_v27  ;;  %v6019_v37 = vsel %vm119_vm0, %v6017_v26, 0.0 }
0x2b4f   :  { %6020 = vadd.xlane.f32.xlu1 %v6019_v37  ;;  %9492 = vmatprep.subr.bf16.mxu0 %v9491_v19 }
0x2b50   :  { %9494 = vmatpush3.bf16.msra.mxu0 %v9491_v19 }
0x2b51   :  { %9496 = vmatprep.subr.bf16.mxu0 %v9495_v28 }
0x2b54   :  { %9498 = vmatpush3.bf16.msra.mxu0 %v9495_v28 }
0x2b55   :  { %9503 = vmatprep.subr.bf16.mxu0 %v10087_v41 }
0x2b57   :  { %9188 = vmatmul.mubr.msk.f32.vlgmr.msra.gmra.mrb[52].mxu0 %vm119_vm0, %v9926_v29 }
0x2b58   :  { %9190 = vmatprep.mubr.msk.f32.mxu0 %vm119_vm0, %v9927_v31 }
0x2b5b   :  { %9191 = vmatmul.mubr.msk.f32.gmra.mrb[54].mxu0 %vm119_vm0, %v9928_v42 }
0x2b5c   :  { %9204 = vmatprep.mubr.msk.f32.mxu0 %vm10079_vm1, %v10078_v17 }
0x2bdb   :  { %v6024_v13 = vpop.xlane.xlu0 %6023 }
0x2bdc   :  { %v6026_v62 = vmul.f32 0.03125, %v6024_v13  ;;  %v6021_v60 = vpop.xlane.xlu1 %6020 }
0x2bdd   :  { %v6025_v1 = vmul.f32 0.03125, %v6021_v60 }
0x2bde   :  { %v6028_v3 = vsub.f32 %v6018_v12, %v6026_v62 }
0x2bdf   :  { %v6027_v5 = vsub.f32 %v6017_v26, %v6025_v1  ;;  %v6067_v1 = vrot.slane %v10766_v57, %v10492_v11 }
0x2be0   :  { %v6030_v30 = vmul.f32 %v6028_v3, %v6028_v3 }
0x2be1   :  { %v6029_v15 = vmul.f32 %v6027_v5, %v6027_v5 }
0x2be2   :  { %v6034_v16 = vsel %vm119_vm0, %v6030_v30, 0.0 }
0x2be3   :  { %6035 = vadd.xlane.f32.xlu1 %v6034_v16  ;;  %v6031_v46 = vsel %vm119_vm0, %v6029_v15, 0.0 }
0x2be4   :  { %6032 = vadd.xlane.f32.xlu0 %v6031_v46 }
0x2c2a   :  { %v9189_v22 = vpop.f32.mrb[52].mxu0 }
0x2c2b   :  { %v6230_v44 = vadd.f32 %v9189_v22, %v6157_v49  ;;  %v6224_v12 = vpop.f32.mrb[53].mxu0 }
0x2c2c   :  { %v6225_v26 = vadd.f32 %v6224_v12, %v6157_v49 }
0x2c2e   :  { %v9192_v27 = vpop.f32.mrb[54].mxu0  ;;  %v9500_v37 = vpack.c.bf16 %v6230_v44, %v6225_v26  ;;  %v10961_v60 = vpack.i.bf16 %v6230_v44, %v6225_v26 }
0x2c2f   :  { %v6234_v13 = vpop.f32.mrb[55].mxu0 }
0x2c30   :  { %v6235_v62 = vadd.f32 %v6234_v13, %v6157_v49 }
0x2c70   :  { %v6036_v8 = vpop.xlane.xlu1 %6035 }
0x2c71   :  { %v6038_v45 = vmul.f32 0.03125, %v6036_v8  ;;  %v6033_v50 = vpop.xlane.xlu0 %6032  ;;  %v6244_v8 = vld [vmem:[#allocation8 + $0xe0] sm:$0xff] }
0x2c72   :  { %v6037_v51 = vmul.f32 0.03125, %v6033_v50 }
0x2c73   :  { %v6040_v4 = vadd.f32 1e-05, %v6038_v45 }
0x2c74   :  { %v6039_v52 = vadd.f32 1e-05, %v6037_v51 }
0x2c75   :  { %9877 = vrsqrt.f32 %v6040_v4 }
0x2c76   :  { %9879 = vrsqrt.f32 %v6039_v52 }
0x2c7f   :  { %v9878_v53 = vpop.eup %9877 }
0x2c80   :  { %v9880_v56 = vpop.eup %9879  ;;  %v6044_v59 = vmul.f32 %v9878_v53, %v6028_v3 }
0x2c81   :  { %v6043_v63 = vmul.f32 %v9880_v56, %v6027_v5 }
0x2c82   :  { %v6050_v0 = vmul.f32 %v6048_v33, %v6044_v59 }
0x2c83   :  { %v6049_v2 = vmul.f32 %v6048_v33, %v6043_v63 }
0x2c84   :  { %v10944_v58 = vadd.f32 %v6054_v61, %v6050_v0 }
0x2c85   :  { %v10946_v34 = vadd.f32 %v6054_v61, %v6049_v2 }
0x2c86   :  { %v6058_v48 = vadd.f32 %v10738_v7, %v10944_v58 }
0x2c87   :  { %v6057_v10 = vadd.f32 %v10732_v9, %v10946_v34  ;;  %v6240_v9 = vadd.f32 %v9192_v27, %v6157_v49 }
0x2c89   :  { %9176 = vmatprep.mubr.msk.f32.mxu1 %vm119_vm0, %v6057_v10  ;;  %v9504_v7 = vpack.c.bf16 %v6240_v9, %v6235_v62  ;;  %v10965_v54 = vpack.i.bf16 %v6240_v9, %v6235_v62 }
0x2c8a   :  { %9177 = vmatmul.mubr.msk.f32.vlgmr.msra.gmra.mrb[68].mxu1 %vm119_vm0, %v6058_v48 }
0x2c8b   :  { %9197 = vmatprep.mubr.msk.f32.mxu1 %vm10079_vm1, %v10078_v17  ;;  %9502 = vmatpush3.bf16.xpose.msk.msra.mxu1 %vm10478_vm3, %v9500_v37 }
0x2c8c   :  { %9507 = vmatprep.subr.bf16.mxu1 %v10087_v41  ;;  %9506 = vmatpush3.bf16.xpose.msk.msra.mxu0 %vm10478_vm3, %v9504_v7 }
0x2c8d   :  { %9221 = vmatprep.subr.mxu0 %v6244_v8 }
0x2d5d   :  { %v9178_v3 = vpop.f32.mrb[68].mxu1 }
0x2d5e   :  { %v6146_v5 = vadd.f32 %v9178_v3, %v6067_v1  ;;  %v6140_v30 = vpop.f32.mrb[69].mxu1 }
0x2d5f   :  { %v6141_v15 = vadd.f32 %v6140_v30, %v6067_v1 }
0x2d60   :  { %v10969_v16 = vmul.f32 0.35355338, %v6146_v5 }
0x2d61   :  { %v10971_v46 = vmul.f32 0.35355338, %v6141_v15 }
0x2d62   :  { %9205 = vmatmul.mubr.msk.f32.vlgmr.msra.gmra.mrb[56].mxu0 %vm300_vm2, %v10969_v16 }
0x2d63   :  { %9198 = vmatmul.mubr.msk.f32.vlgmr.msra.gmra.mrb[70].mxu1 %vm300_vm2, %v10971_v46  ;;  %9222 = vmatpush3.msra.mxu0 %v6244_v8 }
0x2d64   :  { %9211 = vmatprep.mubr.msk.f32.mxu1 %vm10079_vm1, %v10078_v17  ;;  %9517 = vmatprep.subr.bf16.mxu0 %v10087_v41 }
0x2e35   :  { %v6404_v47 = vpop.f32.mrb[56].mxu0 }
0x2e36   :  { %v6325_v18 = vpop.f32.mrb[70].mxu1  ;;  %v9206_v57 = vpop.f32.mrb[57].mxu0  ;;  %v6411_v19 = vsel %vm2354_vm4, %v6404_v47, -inf }
0x2e37   :  { %6412 = vmax.xlane.f32.xlu1 %v6411_v19  ;;  %v9199_v23 = vpop.f32.mrb[71].mxu1  ;;  %v6408_v24 = vsel %vm2354_vm4, %v6325_v18, -inf }
0x2e38   :  { %6409 = vmax.xlane.f32.xlu0 %v6408_v24 }
0x2ec4   :  { %v6413_v28 = vpop.xlane.xlu1 %6412 }
0x2ec5   :  { %v6415_v29 = vsub.f32 %v6404_v47, %v6413_v28  ;;  %v6410_v31 = vpop.xlane.xlu0 %6409 }
0x2ec6   :  { %v6414_v32 = vsub.f32 %v6325_v18, %v6410_v31 }
0x2ec7   :  { %v6418_v35 = vmul.f32 1.442695, %v6415_v29 }
0x2ec8   :  { %v6416_v38 = vmul.f32 1.442695, %v6414_v32 }
0x2ec9   :  { %9881 = vpow2.f32 %v6418_v35 }
0x2eca   :  { %9883 = vpow2.f32 %v6416_v38 }
0x2ed3   :  { %v9882_v14 = vpop.eup %9881 }
0x2ed4   :  { %v9884_v39 = vpop.eup %9883  ;;  %v6423_v40 = vsel %vm2354_vm4, %v9882_v14, 0.0 }
0x2ed5   :  { %6424 = vadd.xlane.f32.xlu1 %v6423_v40  ;;  %v6420_v42 = vsel %vm2354_vm4, %v9884_v39, 0.0 }
0x2ed6   :  { %6421 = vadd.xlane.f32.xlu0 %v6420_v42 }
0x2ee6   :  { %9705 = vrot.lane.b32.xlu1 %v10965_v54, %s10080_s28 }
0x2eea   :  { %9710 = vrot.lane.b32.xlu1 %v10961_v60, %s10082_s9 }
0x2eec   :  { %9700 = vrot.lane.b32.xlu0 %v10961_v60, %s10080_s28 }
0x2eee   :  { %6675 = vrot.lane.b32.xlu1 %v10971_v46, %s10082_s9 }
0x2ef0   :  { %9715 = vrot.lane.b32.xlu0 %v10965_v54, %s10082_s9 }
0x2ef4   :  { %6757 = vrot.lane.b32.xlu0 %v10969_v16, %s10082_s9 }
0x2f62   :  { %v6425_v45 = vpop.xlane.xlu1 %6424 }
0x2f63   :  { %v6422_v50 = vpop.xlane.xlu0 %6421 }
0x2f64   :  { %9885 = vrcp.f32 %v6422_v50 }
0x2f65   :  { %9887 = vrcp.f32 %v6425_v45 }
0x2f66   :  { %v9706_v33 = vpop.permute.xlu1 %9705 }
0x2f67   :  { %v9701_v51 = vpop.permute.xlu0 %9700  ;;  %v9708_v56 = vunpack.i.h.bf16 %v9706_v33  ;;  %v9707_v59 = vunpack.i.l.bf16 %v9706_v33 }
0x2f68   :  { %v9703_v4 = vunpack.i.h.bf16 %v9701_v51  ;;  %v9702_v52 = vunpack.i.l.bf16 %v9701_v51 }
0x2f69   :  { %v9511_v2 = vpack.c.bf16 %v9708_v56, %v9707_v59  ;;  %v6245_v59 = vld [vmem:[#allocation8 + $0xe8] sm:$0xff] }
0x2f6a   :  { %v9508_v53 = vpack.c.bf16 %v9703_v4, %v9702_v52  ;;  %v9711_v10 = vpop.permute.xlu1 %9710 }
0x2f6b   :  { %v9713_v49 = vunpack.i.h.bf16 %v9711_v10  ;;  %v9712_v22 = vunpack.i.l.bf16 %v9711_v10  ;;  %v9716_v26 = vpop.permute.xlu0 %9715 }
0x2f6c   :  { %9509 = vmatpush3.bf16.msra.mxu1 %v9508_v53  ;;  %v9718_v27 = vunpack.i.h.bf16 %v9716_v26  ;;  %v9717_v37 = vunpack.i.l.bf16 %v9716_v26 }
0x2f6d   :  { %9510 = vmatprep.subr.bf16.mxu1 %v10087_v41  ;;  %v9514_v44 = vpack.c.bf16 %v9713_v49, %v9712_v22 }
0x2f6e   :  { %v9886_v61 = vpop.eup %9885  ;;  %v6676_v12 = vpop.permute.xlu1 %6675  ;;  %v9518_v62 = vpack.c.bf16 %v9718_v27, %v9717_v37 }
0x2f6f   :  { %v6428_v63 = vmul.f32 %v9886_v61, %v9884_v39  ;;  %v9888_v0 = vpop.eup %9887  ;;  %v6758_v3 = vpop.permute.xlu0 %6757 }
0x2f70   :  { %v6429_v48 = vmul.f32 %v9888_v0, %v9882_v14 }
0x2f71   :  { %9212 = vmatmul.mubr.msk.f32.vlgmr.msra.gmra.mrb[72].mxu1 %vm2354_vm4, %v6428_v63 }
0x2f72   :  { %9512 = vmatpush3.bf16.msra.mxu1 %v9511_v2  ;;  %9218 = vmatprep.mubr.msk.f32.mxu1 %vm10079_vm1, %v10078_v17 }
0x2f73   :  { %9513 = vmatprep.subr.bf16.mxu1 %v10087_v41 }
0x2f75   :  { %9219 = vmatmul.mubr.msk.f32.vlgmr.msra.gmra.mrb[74].mxu1 %vm2354_vm4, %v6429_v48 }
0x2f76   :  { %9230 = vmatprep.mubr.msk.f32.mxu1 %vm10079_vm1, %v10078_v17 }
0x2f7b   :  { %9516 = vmatpush3.bf16.xpose.msk.msra.mxu1 %vm10478_vm3, %v9514_v44 }
0x2f7c   :  { %9521 = vmatprep.subr.bf16.mxu1 %v10087_v41 }
0x2f82   :  { %9231 = vmatmul.mubr.msk.f32.vlgmr.msra.gmra.mrb[76].mxu1 %vm300_vm2, %v6676_v12 }
0x2f83   :  { %9244 = vmatprep.mubr.msk.f32.mxu1 %vm10079_vm1, %v10078_v17 }
0x3044   :  { %v6505_v9 = vpop.f32.mrb[72].mxu1 }
0x3045   :  { %v9213_v13 = vpop.f32.mrb[73].mxu1  ;;  %9223 = vmatprep.mubr.msk.f32.mxu0 %vm300_vm2, %v6505_v9 }
0x3048   :  { %v6584_v7 = vpop.f32.mrb[74].mxu1 }
0x3049   :  { %v9220_v1 = vpop.f32.mrb[75].mxu1  ;;  %9224 = vmatmul.mubr.msk.f32.vlgmr.msra.gmra.mrb[58].mxu0 %vm300_vm2, %v6584_v7 }
0x304a   :  { %9520 = vmatpush3.bf16.xpose.msk.msra.mxu0 %vm10478_vm3, %v9518_v62  ;;  %9237 = vmatprep.mubr.msk.f32.mxu0 %vm10079_vm1, %v10078_v17 }
0x304b   :  { %9524 = vmatprep.subr.bf16.mxu0 %v10087_v41 }
0x3051   :  { %9238 = vmatmul.mubr.msk.f32.vlgmr.msra.gmra.mrb[60].mxu0 %vm300_vm2, %v6758_v3 }
0x3052   :  { %9251 = vmatprep.mubr.msk.f32.mxu0 %vm10079_vm1, %v10078_v17 }
0x3055   :  { %v6753_v5 = vpop.f32.mrb[76].mxu1 }
0x3056   :  { %v9232_v30 = vpop.f32.mrb[77].mxu1  ;;  %v6839_v15 = vsel %vm2354_vm4, %v6753_v5, -inf }
0x3057   :  { %6840 = vmax.xlane.f32.xlu1 %v6839_v15 }
0x30e4   :  { %v6841_v47 = vpop.xlane.xlu1 %6840 }
0x30e5   :  { %v6845_v18 = vsub.f32 %v6753_v5, %v6841_v47 }
0x30e7   :  { %v6847_v57 = vmul.f32 1.442695, %v6845_v18 }
0x30e9   :  { %9889 = vpow2.f32 %v6847_v57 }
0x30f3   :  { %v9890_v28 = vpop.eup %9889 }
0x30f4   :  { %v6851_v29 = vsel %vm2354_vm4, %v9890_v28, 0.0 }
0x3124   :  { %v6835_v19 = vpop.f32.mrb[60].mxu0 }
0x3125   :  { %v9239_v23 = vpop.f32.mrb[61].mxu0  ;;  %v6842_v24 = vsel %vm2354_vm4, %v6835_v19, -inf }
0x3126   :  { %6843 = vmax.xlane.f32.xlu0 %v6842_v24 }
0x312a   :  { %6852 = vadd.xlane.f32.xlu0 %v6851_v29 }
0x3140   :  { %9720 = vrot.lane.b32.xlu0 %v10961_v60, %s10081_s0 }
0x3144   :  { %9735 = vrot.lane.b32.xlu0 %v10965_v54, %s10084_s11 }
0x3148   :  { %7184 = vrot.lane.b32.xlu0 %v10969_v16, %s10084_s11 }
0x31b3   :  { %v6844_v31 = vpop.xlane.xlu0 %6843 }
0x31b4   :  { %v6846_v32 = vsub.f32 %v6835_v19, %v6844_v31 }
0x31b6   :  { %v6849_v35 = vmul.f32 1.442695, %v6846_v32 }
0x31b7   :  { %v6853_v38 = vpop.xlane.xlu0 %6852 }
0x31b8   :  { %9891 = vpow2.f32 %v6849_v35 }
0x31b9   :  { %9893 = vrcp.f32 %v6853_v38 }
0x31bb   :  { %v9721_v14 = vpop.permute.xlu0 %9720 }
0x31bc   :  { %v9723_v39 = vunpack.i.h.bf16 %v9721_v14  ;;  %v9722_v40 = vunpack.i.l.bf16 %v9721_v14 }
0x31be   :  { %v9522_v42 = vpack.c.bf16 %v9723_v39, %v9722_v40 }
0x31bf   :  { %v9736_v12 = vpop.permute.xlu0 %9735 }
0x31c0   :  { %9523 = vmatpush3.bf16.msra.mxu1 %v9522_v42  ;;  %v9738_v26 = vunpack.i.h.bf16 %v9736_v12  ;;  %v9737_v27 = vunpack.i.l.bf16 %v9736_v12 }
0x31c1   :  { %9527 = vmatprep.subr.bf16.mxu1 %v10087_v41 }
0x31c2   :  { %v9892_v8 = vpop.eup %9891  ;;  %v9532_v37 = vpack.c.bf16 %v9738_v26, %v9737_v27 }
0x31c3   :  { %v9894_v45 = vpop.eup %9893  ;;  %v6854_v50 = vsel %vm2354_vm4, %v9892_v8, 0.0  ;;  %v7185_v3 = vpop.permute.xlu0 %7184 }
0x31c4   :  { %v6859_v51 = vmul.f32 %v9894_v45, %v9890_v28  ;;  %6855 = vadd.xlane.f32.xlu1 %v6854_v50 }
0x31c6   :  { %9245 = vmatmul.mubr.msk.f32.vlgmr.msra.gmra.mrb[78].mxu1 %vm2354_vm4, %v6859_v51 }
0x31c7   :  { %9263 = vmatprep.mubr.msk.f32.mxu1 %vm10079_vm1, %v10078_v17 }
0x31d5   :  { %9725 = vrot.lane.b32.xlu1 %v10965_v54, %s10081_s0 }
0x31d9   :  { %9730 = vrot.lane.b32.xlu1 %v10961_v60, %s10084_s11 }
0x31dd   :  { %7102 = vrot.lane.b32.xlu1 %v10971_v46, %s10084_s11 }
0x3251   :  { %v6856_v4 = vpop.xlane.xlu1 %6855 }
0x3252   :  { %9895 = vrcp.f32 %v6856_v4 }
0x3255   :  { %v9726_v52 = vpop.permute.xlu1 %9725 }
0x3256   :  { %v9728_v33 = vunpack.i.h.bf16 %v9726_v52  ;;  %v9727_v53 = vunpack.i.l.bf16 %v9726_v52 }
0x3258   :  { %v9525_v56 = vpack.c.bf16 %v9728_v33, %v9727_v53 }
0x3259   :  { %v9731_v61 = vpop.permute.xlu1 %9730 }
0x325a   :  { %v9733_v63 = vunpack.i.h.bf16 %v9731_v61  ;;  %v9732_v0 = vunpack.i.l.bf16 %v9731_v61  ;;  %9526 = vmatpush3.bf16.msra.mxu0 %v9525_v56 }
0x325b   :  { %9254 = vmatprep.subr.mxu0 %v6245_v59 }
0x325c   :  { %v9896_v2 = vpop.eup %9895  ;;  %v9528_v10 = vpack.c.bf16 %v9733_v63, %v9732_v0 }
0x325d   :  { %v6860_v48 = vmul.f32 %v9896_v2, %v9892_v8  ;;  %v7103_v49 = vpop.permute.xlu1 %7102 }
0x325e   :  { %9530 = vmatpush3.bf16.xpose.msk.msra.mxu1 %vm10478_vm3, %v9528_v10 }
0x325f   :  { %9252 = vmatmul.mubr.msk.f32.vlgmr.msra.gmra.mrb[62].mxu0 %vm2354_vm4, %v6860_v48  ;;  %9535 = vmatprep.subr.bf16.mxu1 %v10087_v41 }
0x3260   :  { %9255 = vmatpush3.msra.mxu0 %v6245_v59 }
0x3261   :  { %9531 = vmatprep.subr.bf16.mxu0 %v10087_v41 }
0x3265   :  { %9264 = vmatmul.mubr.msk.f32.vlgmr.msra.gmra.mrb[80].mxu1 %vm300_vm2, %v7103_v49 }
0x3266   :  { %9277 = vmatprep.mubr.msk.f32.mxu1 %vm10079_vm1, %v10078_v17 }
0x3299   :  { %v6936_v22 = vpop.f32.mrb[78].mxu1 }
0x329a   :  { %v9246_v44 = vpop.f32.mrb[79].mxu1  ;;  %9256 = vmatprep.mubr.msk.f32.mxu0 %vm300_vm2, %v6936_v22 }
0x3332   :  { %v7015_v9 = vpop.f32.mrb[62].mxu0 }
0x3333   :  { %v9253_v13 = vpop.f32.mrb[63].mxu0  ;;  %9257 = vmatmul.mubr.msk.f32.vlgmr.msra.gmra.mrb[58].mxu0 %vm300_vm2, %v7015_v9 }
0x3334   :  { %9534 = vmatpush3.bf16.xpose.msk.msra.mxu0 %vm10478_vm3, %v9532_v37  ;;  %9270 = vmatprep.mubr.msk.f32.mxu0 %vm10079_vm1, %v10078_v17 }
0x3338   :  { %v7180_v62 = vpop.f32.mrb[80].mxu1 }
0x3339   :  { %v9265_v7 = vpop.f32.mrb[81].mxu1  ;;  %v7266_v1 = vsel %vm2354_vm4, %v7180_v62, -inf }
0x333a   :  { %7267 = vmax.xlane.f32.xlu1 %v7266_v1 }
0x333b   :  { %9271 = vmatmul.mubr.msk.f32.vlgmr.msra.gmra.mrb[64].mxu0 %vm300_vm2, %v7185_v3 }
0x33c7   :  { %v7268_v5 = vpop.xlane.xlu1 %7267 }
0x33c8   :  { %v7272_v30 = vsub.f32 %v7180_v62, %v7268_v5 }
0x33ca   :  { %v7274_v15 = vmul.f32 1.442695, %v7272_v30 }
0x33cc   :  { %9897 = vpow2.f32 %v7274_v15 }
0x33d6   :  { %v9898_v19 = vpop.eup %9897 }
0x33d7   :  { %v7278_v23 = vsel %vm2354_vm4, %v9898_v19, 0.0 }
0x340e   :  { %v7262_v47 = vpop.f32.mrb[64].mxu0 }
0x340f   :  { %v9272_v18 = vpop.f32.mrb[65].mxu0  ;;  %v7269_v57 = vsel %vm2354_vm4, %v7262_v47, -inf }
0x3410   :  { %7270 = vmax.xlane.f32.xlu0 %v7269_v57 }
0x3414   :  { %7279 = vadd.xlane.f32.xlu0 %v7278_v23 }
0x342a   :  { %9740 = vrot.lane.b32.xlu0 %v10961_v60, %s10083_s10 }
0x342e   :  { %9755 = vrot.lane.b32.xlu0 %v10965_v54, %s10085_s13 }
0x3432   :  { %7611 = vrot.lane.b32.xlu0 %v10969_v16, %s10085_s13  ;;  %v6246_v16 = vld [vmem:[#allocation8 + $0xf0] sm:$0xff] }
0x3433   :  { %9287 = vmatprep.subr.mxu0 %v6246_v16 }
0x3434   :  { %9288 = vmatpush3.msra.mxu0 %v6246_v16 }
0x3435   :  { %9545 = vmatprep.subr.bf16.mxu0 %v10087_v41 }
0x349d   :  { %v7271_v24 = vpop.xlane.xlu0 %7270 }
0x349e   :  { %v7273_v28 = vsub.f32 %v7262_v47, %v7271_v24 }
0x34a0   :  { %v7276_v29 = vmul.f32 1.442695, %v7273_v28 }
0x34a1   :  { %v7280_v31 = vpop.xlane.xlu0 %7279 }
0x34a2   :  { %9899 = vpow2.f32 %v7276_v29 }
0x34a3   :  { %9901 = vrcp.f32 %v7280_v31 }
0x34a5   :  { %v9741_v32 = vpop.permute.xlu0 %9740 }
0x34a6   :  { %v9743_v35 = vunpack.i.h.bf16 %v9741_v32  ;;  %v9742_v38 = vunpack.i.l.bf16 %v9741_v32 }
0x34a8   :  { %v9536_v14 = vpack.c.bf16 %v9743_v35, %v9742_v38 }
0x34a9   :  { %v9756_v10 = vpop.permute.xlu0 %9755 }
0x34aa   :  { %9537 = vmatpush3.bf16.msra.mxu1 %v9536_v14  ;;  %v9758_v48 = vunpack.i.h.bf16 %v9756_v10  ;;  %v9757_v49 = vunpack.i.l.bf16 %v9756_v10 }
0x34ab   :  { %9538 = vmatprep.subr.bf16.mxu1 %v10087_v41 }
0x34ac   :  { %v9900_v39 = vpop.eup %9899  ;;  %v9546_v22 = vpack.c.bf16 %v9758_v48, %v9757_v49 }
0x34ad   :  { %v9902_v40 = vpop.eup %9901  ;;  %v7281_v42 = vsel %vm2354_vm4, %v9900_v39, 0.0  ;;  %v7612_v26 = vpop.permute.xlu0 %7611 }
0x34ae   :  { %v7286_v8 = vmul.f32 %v9902_v40, %v9898_v19  ;;  %7282 = vadd.xlane.f32.xlu1 %v7281_v42 }
0x34b0   :  { %9278 = vmatmul.mubr.msk.f32.vlgmr.msra.gmra.mrb[82].mxu1 %vm2354_vm4, %v7286_v8 }
0x34b1   :  { %9284 = vmatprep.mubr.msk.f32.mxu1 %vm10079_vm1, %v10078_v17 }
0x34bf   :  { %9745 = vrot.lane.b32.xlu1 %v10965_v54, %s10083_s10 }
0x34c3   :  { %9750 = vrot.lane.b32.xlu1 %v10961_v60, %s10085_s13 }
0x34c7   :  { %7529 = vrot.lane.b32.xlu1 %v10971_v46, %s10085_s13 }
0x353b   :  { %v7283_v45 = vpop.xlane.xlu1 %7282 }
0x353c   :  { %9903 = vrcp.f32 %v7283_v45 }
0x353f   :  { %v9746_v50 = vpop.permute.xlu1 %9745 }
0x3540   :  { %v9748_v51 = vunpack.i.h.bf16 %v9746_v50  ;;  %v9747_v4 = vunpack.i.l.bf16 %v9746_v50  ;;  %v11108_v50 = vld [vmem:[#allocation10 + $0x10] sm:$0xff] }
0x3542   :  { %v9539_v52 = vpack.c.bf16 %v9748_v51, %v9747_v4  ;;  %v6672_v51 = vrot.slane %v11108_v50, %v2618_v43 }
0x3543   :  { %v9751_v33 = vpop.permute.xlu1 %9750 }
0x3544   :  { %9540 = vmatpush3.bf16.msra.mxu1 %v9539_v52  ;;  %v9753_v59 = vunpack.i.h.bf16 %v9751_v33  ;;  %v9752_v61 = vunpack.i.l.bf16 %v9751_v33 }
0x3545   :  { %9541 = vmatprep.subr.bf16.mxu1 %v10087_v41 }
0x3546   :  { %v9904_v53 = vpop.eup %9903  ;;  %v9542_v46 = vpack.c.bf16 %v9753_v59, %v9752_v61 }
0x3547   :  { %v7287_v56 = vmul.f32 %v9904_v53, %v9900_v39  ;;  %v7530_v63 = vpop.permute.xlu1 %7529  ;;  %v6247_v39 = vld [vmem:[#allocation8 + $0xf8] sm:$0xff] }
0x3549   :  { %9285 = vmatmul.mubr.msk.f32.vlgmr.msra.gmra.mrb[84].mxu1 %vm2354_vm4, %v7287_v56 }
0x354a   :  { %9296 = vmatprep.mubr.msk.f32.mxu1 %vm10079_vm1, %v10078_v17 }
0x354d   :  { %9544 = vmatpush3.bf16.xpose.msk.msra.mxu1 %vm10478_vm3, %v9542_v46 }
0x354e   :  { %9549 = vmatprep.subr.bf16.mxu1 %v10087_v41 }
0x3554   :  { %9297 = vmatmul.mubr.msk.f32.vlgmr.msra.gmra.mrb[86].mxu1 %vm300_vm2, %v7530_v63 }
0x3555   :  { %9310 = vmatprep.mubr.msk.f32.mxu1 %vm10079_vm1, %v10078_v17 }
0x3583   :  { %v7363_v0 = vpop.f32.mrb[82].mxu1 }
0x3584   :  { %v9279_v2 = vpop.f32.mrb[83].mxu1  ;;  %9289 = vmatprep.mubr.msk.f32.mxu0 %vm300_vm2, %v7363_v0 }
0x361c   :  { %v7442_v44 = vpop.f32.mrb[84].mxu1 }
0x361d   :  { %v9286_v12 = vpop.f32.mrb[85].mxu1  ;;  %9290 = vmatmul.mubr.msk.f32.vlgmr.msra.gmra.mrb[58].mxu0 %vm300_vm2, %v7442_v44 }
0x361e   :  { %9548 = vmatpush3.bf16.xpose.msk.msra.mxu0 %vm10478_vm3, %v9546_v22  ;;  %9303 = vmatprep.mubr.msk.f32.mxu0 %vm10079_vm1, %v10078_v17  ;;  %v8430_v12 = vld [vmem:[%s11196_s3 + $0xa8] sm:$0xff] }
0x361f   :  { %9552 = vmatprep.subr.bf16.mxu0 %v10087_v41 }
0x3625   :  { %9304 = vmatmul.mubr.msk.f32.vlgmr.msra.gmra.mrb[66].mxu0 %vm300_vm2, %v7612_v26 }
0x3626   :  { %9317 = vmatprep.mubr.msk.f32.mxu0 %vm10079_vm1, %v10078_v17 }
0x3627   :  { %v7607_v27 = vpop.f32.mrb[86].mxu1 }
0x3628   :  { %v9298_v37 = vpop.f32.mrb[87].mxu1  ;;  %v7693_v9 = vsel %vm2354_vm4, %v7607_v27, -inf }
0x3629   :  { %7694 = vmax.xlane.f32.xlu1 %v7693_v9  ;;  %v8432_v37 = vld [vmem:[%s11196_s3 + $0xb8] sm:$0xff] }
0x36b6   :  { %v7695_v13 = vpop.xlane.xlu1 %7694 }
0x36b7   :  { %v7699_v62 = vsub.f32 %v7607_v27, %v7695_v13  ;;  %v8431_v27 = vld [vmem:[%s11196_s3 + $0xb0] sm:$0xff]  ;;  %v8435_v13 = vld [vmem:[%s11198_s5 + $0x40] sm:$0xff] }
0x36b8   :  { %v9559_v9 = vpack.c.bf16 %v8432_v37, %v8431_v27 }
0x36b9   :  { %v7701_v6 = vmul.f32 1.442695, %v7699_v62  ;;  %v8436_v62 = vld [vmem:[%s11198_s5 + $0x48] sm:$0xff] }
0x36bb   :  { %9905 = vpow2.f32 %v7701_v6  ;;  %v8437_v6 = vld [vmem:[%s11198_s5 + $0x50] sm:$0xff] }
0x36c5   :  { %v9906_v41 = vpop.eup %9905 }
0x36c6   :  { %v7705_v5 = vsel %vm2354_vm4, %v9906_v41, 0.0 }
0x36f8   :  { %v7689_v7 = vpop.f32.mrb[66].mxu0 }
0x36f9   :  { %v9305_v1 = vpop.f32.mrb[67].mxu0  ;;  %v7696_v3 = vsel %vm2354_vm4, %v7689_v7, -inf }
0x36fa   :  { %7697 = vmax.xlane.f32.xlu0 %v7696_v3  ;;  %v8438_v1 = vld [vmem:[%s11198_s5 + $0x58] sm:$0xff] }
0x36fb   :  { %v9567_v3 = vpack.c.bf16 %v8438_v1, %v8437_v6 }
0x36fe   :  { %7706 = vadd.xlane.f32.xlu0 %v7705_v5  ;;  %v8440_v5 = vld [vmem:[%s11198_s5 + $0x68] sm:$0xff] }
0x3714   :  { %9760 = vrot.lane.b32.xlu0 %v10961_v60, %s10086_s14 }
0x3787   :  { %v7698_v17 = vpop.xlane.xlu0 %7697 }
0x3788   :  { %v7700_v30 = vsub.f32 %v7689_v7, %v7698_v17  ;;  %v9563_v7 = vpack.c.bf16 %v8436_v62, %v8435_v13 }
0x378a   :  { %v7703_v15 = vmul.f32 1.442695, %v7700_v30 }
0x378b   :  { %v7707_v47 = vpop.xlane.xlu0 %7706 }
0x378c   :  { %9907 = vpow2.f32 %v7703_v15 }
0x378d   :  { %9909 = vrcp.f32 %v7707_v47 }
0x378f   :  { %v9761_v18 = vpop.permute.xlu0 %9760 }
0x3790   :  { %v9763_v57 = vunpack.i.h.bf16 %v9761_v18  ;;  %v9762_v19 = vunpack.i.l.bf16 %v9761_v18 }
0x3792   :  { %v9550_v23 = vpack.c.bf16 %v9763_v57, %v9762_v19 }
0x3794   :  { %9551 = vmatpush3.bf16.msra.mxu1 %v9550_v23  ;;  %v4175_v23 = vld [vmem:[#allocation10 + $0x18] sm:$0xff] }
0x3795   :  { %v8213_v13 = vrot.slane %v4175_v23, %v10424_v36 }
0x3796   :  { %v9908_v24 = vpop.eup %9907 }
0x3797   :  { %v9910_v28 = vpop.eup %9909  ;;  %v7708_v29 = vsel %vm2354_vm4, %v9908_v24, 0.0 }
0x3798   :  { %v7713_v31 = vmul.f32 %v9910_v28, %v9906_v41  ;;  %7709 = vadd.xlane.f32.xlu1 %v7708_v29  ;;  %v8439_v41 = vld [vmem:[%s11198_s5 + $0x60] sm:$0xff] }
0x3799   :  { %v9571_v17 = vpack.c.bf16 %v8440_v5, %v8439_v41 }
0x379a   :  { %9311 = vmatmul.mubr.msk.f32.vlgmr.msra.gmra.mrb[88].mxu1 %vm2354_vm4, %v7713_v31 }
0x37a9   :  { %9765 = vrot.lane.b32.xlu1 %v10965_v54, %s10086_s14 }
0x3825   :  { %v7710_v60 = vpop.xlane.xlu1 %7709 }
0x3826   :  { %9911 = vrcp.f32 %v7710_v60 }
0x3829   :  { %v9766_v32 = vpop.permute.xlu1 %9765 }
0x382a   :  { %v9768_v35 = vunpack.i.h.bf16 %v9766_v32  ;;  %v9767_v38 = vunpack.i.l.bf16 %v9766_v32  ;;  %v7993_v32 = vrot.slane %v4175_v23, %v10262_v21  ;;  %v9930_v21 = vld [vmem:[%s11199_s6 + $0x8] sm:$0xff] }
0x382c   :  { %v9553_v14 = vpack.c.bf16 %v9768_v35, %v9767_v38 }
0x382e   :  { %9554 = vmatpush3.bf16.msra.mxu0 %v9553_v14 }
0x382f   :  { %9320 = vmatprep.subr.mxu0 %v6247_v39 }
0x3830   :  { %v9912_v40 = vpop.eup %9911 }
0x3831   :  { %v7714_v42 = vmul.f32 %v9912_v40, %v9908_v24  ;;  %v7987_v24 = vrot.slane %v11108_v50, %v3933_v25  ;;  %v8441_v40 = vld [vmem:[%s11198_s5 + $0x70] sm:$0xff]  ;;  %v8442_v25 = vld [vmem:[%s11198_s5 + $0x78] sm:$0xff]  ;;  %s10088_s5 = smov [#allocation11]  }
0x3832   :  { %s8230_s6 = sshll.u32 %s10088_s5, 4  ;;  %s8231_s6 = int_to_ptr.vmem [resolvable:$true] %s8230_s6 }
0x3833   :  { %9318 = vmatmul.mubr.msk.f32.vlgmr.msra.gmra.mrb[68].mxu0 %vm2354_vm4, %v7714_v42  ;;  %v9575_v42 = vpack.c.bf16 %v8442_v25, %v8441_v40  ;;  %s10041_s28 = scalar_lea.vmem %s8231_s6, 512  ;;  %p10046_p13 = scmp.lt.s32.totalorder %s8231_s6, %s8231_s6 }
0x3834   :  { %9321 = vmatpush3.msra.mxu0 %v6247_v39  ;;  %p10042_p12 = scmp.ne.s32.totalorder %s8231_s6, %s10041_s28  ;;  %p10047_p0 = scmp.lt.s32.totalorder %s10041_s28, %s10041_s28 }
0x3835   :  { %9564 = vmatprep.subr.bf16.mxu0 %v9563_v7 }
0x3836   :  { %p10048_p1 = por %p10047_p0, %p10046_p13 }
0x3838   :  { %p10049_p2 = pnand %p10048_p1, %p10042_p12 }
0x386d   :  { %v7790_v8 = vpop.f32.mrb[88].mxu1 }
0x386e   :  { %v9312_v16 = vpop.f32.mrb[89].mxu1  ;;  %9322 = vmatprep.mubr.msk.f32.mxu0 %vm300_vm2, %v7790_v8  ;;  %v8004_v8 = vrot.slane %v9930_v21, %v10492_v11 }
0x3906   :  { %v7869_v45 = vpop.f32.mrb[68].mxu0 }
0x3907   :  { %v9319_v54 = vpop.f32.mrb[69].mxu0  ;;  %9323 = vmatmul.mubr.msk.f32.vlgmr.msra.gmra.mrb[58].mxu0 %vm300_vm2, %v7869_v45 }
0x3908   :  { %9566 = vmatpush3.bf16.msra.mxu0 %v9563_v7  ;;  %v8219_v7 = vrot.slane %v4175_v23, %v10492_v11 }
0x3909   :  { %9568 = vmatprep.subr.bf16.mxu0 %v9567_v3 }
0x390c   :  { %9570 = vmatpush3.bf16.msra.mxu0 %v9567_v3 }
0x390d   :  { %9572 = vmatprep.subr.bf16.mxu0 %v9571_v17 }
0x3910   :  { %9574 = vmatpush3.bf16.msra.mxu0 %v9571_v17 }
0x3911   :  { %9576 = vmatprep.subr.bf16.mxu0 %v9575_v42 }
0x3914   :  { %9578 = vmatpush3.bf16.msra.mxu0 %v9575_v42 }
0x39da   :  { %v9324_v4 = vpop.f32.mrb[58].mxu0 }
0x39db   :  { %v9585_v52 = vadd.f32 %v9324_v4, %v6672_v51  ;;  %v7945_v33 = vpop.f32.mrb[59].mxu0 }
0x39dc   :  { %v9586_v53 = vadd.f32 %v7945_v33, %v6672_v51  ;;  %v8100_v33 = vrot.slane %v11108_v50, %v4045_v55 }
0x39dd   :  { %v7957_v56 = vadd.f32 %v9585_v52, %v10944_v58 }
0x39de   :  { %v7956_v59 = vadd.f32 %v9586_v53, %v10946_v34  ;;  %v8429_v34 = vld [vmem:[%s11196_s3 + $0xa0] sm:$0xff] }
0x39df   :  { %v7961_v61 = vsel %vm119_vm0, %v7957_v56, 0.0  ;;  %v9555_v26 = vpack.c.bf16 %v8430_v12, %v8429_v34 }
0x39e0   :  { %7962 = vadd.xlane.f32.xlu0 %v7961_v61  ;;  %v7958_v46 = vsel %vm119_vm0, %v7956_v59, 0.0 }
0x39e1   :  { %7959 = vadd.xlane.f32.xlu1 %v7958_v46  ;;  %9556 = vmatprep.subr.bf16.mxu1 %v9555_v26 }
0x39e2   :  { %9558 = vmatpush3.bf16.msra.mxu1 %v9555_v26 }
0x39e3   :  { %9560 = vmatprep.subr.bf16.mxu1 %v9559_v9 }
0x39e6   :  { %9562 = vmatpush3.bf16.msra.mxu1 %v9559_v9 }
0x3a6d   :  { %v7963_v63 = vpop.xlane.xlu0 %7962 }
0x3a6e   :  { %v7965_v0 = vmul.f32 0.03125, %v7963_v63  ;;  %v7960_v2 = vpop.xlane.xlu1 %7959 }
0x3a6f   :  { %v7964_v10 = vmul.f32 0.03125, %v7960_v2 }
0x3a70   :  { %v7967_v48 = vsub.f32 %v7957_v56, %v7965_v0 }
0x3a71   :  { %v7966_v43 = vsub.f32 %v7956_v59, %v7964_v10 }
0x3a72   :  { %v7969_v49 = vmul.f32 %v7967_v48, %v7967_v48 }
0x3a73   :  { %v7968_v22 = vmul.f32 %v7966_v43, %v7966_v43 }
0x3a74   :  { %v7973_v44 = vsel %vm119_vm0, %v7969_v49, 0.0 }
0x3a75   :  { %7974 = vadd.xlane.f32.xlu1 %v7973_v44  ;;  %v7970_v58 = vsel %vm119_vm0, %v7968_v22, 0.0 }
0x3a76   :  { %7971 = vadd.xlane.f32.xlu0 %v7970_v58 }
0x3b02   :  { %v7975_v30 = vpop.xlane.xlu1 %7974 }
0x3b03   :  { %v7977_v15 = vmul.f32 0.03125, %v7975_v30  ;;  %v7972_v47 = vpop.xlane.xlu0 %7971 }
0x3b04   :  { %v7976_v18 = vmul.f32 0.03125, %v7972_v47 }
0x3b05   :  { %v7979_v57 = vadd.f32 1e-05, %v7977_v15 }
0x3b06   :  { %v7978_v19 = vadd.f32 1e-05, %v7976_v18 }
0x3b07   :  { %9913 = vrsqrt.f32 %v7979_v57 }
0x3b08   :  { %9915 = vrsqrt.f32 %v7978_v19 }
0x3b11   :  { %v9914_v28 = vpop.eup %9913 }
0x3b12   :  { %v9916_v29 = vpop.eup %9915  ;;  %v7983_v31 = vmul.f32 %v9914_v28, %v7967_v48 }
0x3b13   :  { %v7982_v60 = vmul.f32 %v9916_v29, %v7966_v43 }
0x3b14   :  { %v7989_v35 = vmul.f32 %v7987_v24, %v7983_v31 }
0x3b15   :  { %v7988_v38 = vmul.f32 %v7987_v24, %v7982_v60 }
0x3b16   :  { %v7995_v39 = vadd.f32 %v7993_v32, %v7989_v35 }
0x3b17   :  { %v7994_v14 = vadd.f32 %v7993_v32, %v7988_v38 }
0x3b19   :  { %9333 = vmatprep.mubr.msk.f32.mxu1 %vm119_vm0, %v7994_v14 }
0x3b1a   :  { %9334 = vmatmul.mubr.msk.f32.vlgmr.msra.gmra.mrb[90].mxu1 %vm119_vm0, %v7995_v39 }
0x3bed   :  { %v9335_v16 = vpop.f32.mrb[90].mxu1 }
0x3bee   :  { %v8083_v45 = vadd.f32 %v9335_v16, %v8004_v8  ;;  %v8077_v54 = vpop.f32.mrb[91].mxu1 }
0x3bef   :  { %v8078_v51 = vadd.f32 %v8077_v54, %v8004_v8 }
0x3bf0   :  { %v8087_v52 = vmax.f32 %v8083_v45, 0.0 }
0x3bf1   :  { %v8086_v4 = vmax.f32 %v8078_v51, 0.0 }
0x3bf3   :  { %9352 = vmatprep.mubr.msk.f32.mxu0 %vm4047_vm5, %v8086_v4 }
0x3bf4   :  { %9353 = vmatmul.mubr.msk.f32.vlgmr.msra.gmra.mrb[70].mxu0 %vm4047_vm5, %v8087_v52 }
0x3cc7   :  { %v9354_v53 = vpop.f32.mrb[70].mxu0 }
0x3cc8   :  { %v8179_v56 = vadd.f32 %v9354_v53, %v8100_v33  ;;  %v8173_v59 = vpop.f32.mrb[71].mxu0 }
0x3cc9   :  { %v8174_v61 = vadd.f32 %v8173_v59, %v8100_v33 }
0x3cca   :  { %v8183_v46 = vadd.f32 %v8179_v56, %v7995_v39 }
0x3ccb   :  { %v8182_v63 = vadd.f32 %v8174_v61, %v7994_v14 }
0x3ccc   :  { %v8187_v0 = vsel %vm119_vm0, %v8183_v46, 0.0 }
0x3ccd   :  { %8188 = vadd.xlane.f32.xlu1 %v8187_v0  ;;  %v8184_v2 = vsel %vm119_vm0, %v8182_v63, 0.0 }
0x3cce   :  { %8185 = vadd.xlane.f32.xlu0 %v8184_v2 }
0x3d5a   :  { %v8189_v10 = vpop.xlane.xlu1 %8188 }
0x3d5b   :  { %v8191_v48 = vmul.f32 0.03125, %v8189_v10  ;;  %v8186_v43 = vpop.xlane.xlu0 %8185 }
0x3d5c   :  { %v8190_v49 = vmul.f32 0.03125, %v8186_v43 }
0x3d5d   :  { %v8193_v22 = vsub.f32 %v8183_v46, %v8191_v48 }
0x3d5e   :  { %v8192_v20 = vsub.f32 %v8182_v63, %v8190_v49 }
0x3d5f   :  { %v8195_v44 = vmul.f32 %v8193_v22, %v8193_v22 }
0x3d60   :  { %v8194_v55 = vmul.f32 %v8192_v20, %v8192_v20 }
0x3d61   :  { %v8199_v50 = vsel %vm119_vm0, %v8195_v44, 0.0 }
0x3d62   :  { %8200 = vadd.xlane.f32.xlu1 %v8199_v50  ;;  %v8196_v58 = vsel %vm119_vm0, %v8194_v55, 0.0 }
0x3d63   :  { %8197 = vadd.xlane.f32.xlu0 %v8196_v58 }
0x3def   :  { %v8201_v34 = vpop.xlane.xlu1 %8200 }
0x3df0   :  { %v8203_v12 = vmul.f32 0.03125, %v8201_v34  ;;  %v8198_v26 = vpop.xlane.xlu0 %8197 }
0x3df1   :  { %v8202_v27 = vmul.f32 0.03125, %v8198_v26 }
0x3df2   :  { %v8205_v37 = vadd.f32 1e-05, %v8203_v12 }
0x3df3   :  { %v8204_v9 = vadd.f32 1e-05, %v8202_v27 }
0x3df4   :  { %9917 = vrsqrt.f32 %v8205_v37 }
0x3df5   :  { %9919 = vrsqrt.f32 %v8204_v9 }
0x3dfe   :  { %v9918_v62 = vpop.eup %9917 }
0x3dff   :  { %v9920_v6 = vpop.eup %9919  ;;  %v8209_v1 = vmul.f32 %v9918_v62, %v8193_v22 }
0x3e00   :  { %v8208_v3 = vmul.f32 %v9920_v6, %v8192_v20 }
0x3e01   :  { %v8215_v41 = vmul.f32 %v8213_v13, %v8209_v1 }
0x3e02   :  { %v8214_v5 = vmul.f32 %v8213_v13, %v8208_v3 }
0x3e03   :  { %v8221_v17 = vadd.f32 %v8219_v7, %v8215_v41 }
0x3e04   :  { %v8220_v30 = vadd.f32 %v8219_v7, %v8214_v5 }
0x3e05   :  { %8224 = vst.msk [vmem:[#allocation11 + $0x18] sm:$0xff] %vm119_vm0, %v8221_v17 }
0x3e06   :  { %8223 = vst.msk [vmem:[#allocation11 + $0x10] sm:$0xff] %vm119_vm0, %v8220_v30 }
0x3e07   :  { %10052 = shalt.err (!%p10049_p2)
}
0x3e08   :  { %s10053_s10 = scalar_lea.hbm %s11201_s8, 512 }
0x3e09   :  { %p10054_p3 = scmp.ne.s32.totalorder %s11201_s8, %s10053_s10  ;;  %p10057_p4 = scmp.lt.u32.totalorder %s10053_s10, %s11201_s8 }
0x3e0b   :  { %p10059_p5 = pnand %p10057_p4, %p10054_p3 }
0x3e0d   :  { %10062 = shalt.err (!%p10059_p5)
}
0x3e0e   :  { %8236 = dma.vmem_to_hbm [thread:$0]  %s8231_s6, 512, %s11201_s8, [#allocation4], %s10073_s17, %s10073_s17, %s10074_s18  }
0x3e0f   :  { %10069 = dma.done.wait [#allocation4], 512  }
0x3e10   :  { %10070 = vsyncadd [#allocation4], 4294966784 }
0x3e11   :  { %8240 = vsyncpa [#allocation3], 1 }
0x3e12   :  { %8241 = vsyncpa [#allocation6], 1 }
0x3e13   :  { %8242 = vsyncpa [#allocation9], 1 }
0x3e14   :  { %8243 = vsyncpa [#allocation4], 1 }

</bundles_post_ra>
